<compile_context>
chip_gen: v5e
topology: v5e:2x2
jax: 0.10.0
libtpu: 0.0.40
codegen_flags: <defaults>
</compile_context>

<pallas_src>
import functools

import jax
import jax.numpy as jnp
from jax import lax
from jax.experimental import pallas as pl
from jax.experimental.pallas import tpu as pltpu


def _mean_filter_kernel(x_ref, w_ref, b_ref, o_ref, xpad_ref, *, C, H, W, K, Nb):
    # x_ref   : (Nb, C, H, W)      input block in VMEM
    # w_ref   : (C*C*K*K,)         flat conv weights (OIHW order) in SMEM
    # b_ref   : (C,)               bias in SMEM
    # o_ref   : (Nb, C, H, W)      output block in VMEM
    # xpad_ref: (Nb, C, Hp, Wp)    f32 zero-padded scratch in VMEM
    pad = K // 2
    f32 = jnp.float32

    # In-kernel zero padding.  The scratch persists across grid steps (and is
    # per-core on v7x megacore), so re-zero the border every step; the whole
    # scratch is only a few KiB, so zeroing it all is the simplest safe option.
    xpad_ref[...] = jnp.zeros_like(xpad_ref)
    xpad_ref[:, :, pad:pad + H, pad:pad + W] = x_ref[...].astype(f32)

    # C live accumulators held in vregs; bias is added once at the final store.
    acc = [jnp.zeros((Nb, H, W), dtype=f32) for _ in range(C)]

    # ci outermost: load each padded input channel once, materialize each of
    # the K*K shifted windows once, then reuse the window for all C output
    # channels (co innermost).
    for ci in range(C):
        x_ci = xpad_ref[:, ci]                       # (Nb, Hp, Wp), already f32
        for kh in range(K):
            for kw in range(K):
                win = x_ci[:, kh:kh + H, kw:kw + W]  # (Nb, H, W)
                for co in range(C):
                    w = w_ref[((co * C + ci) * K + kh) * K + kw]
                    acc[co] = acc[co] + w * win

    # Single store per output channel; bias added here (hoisted broadcast).
    for co in range(C):
        o_ref[:, co] = (acc[co] + b_ref[co]).astype(o_ref.dtype)


def mean_filter(x, weight, bias, filter_size):
    """MeanFilter forward. x: (N, C, H, W); weight: (C, C, K, K); bias: (C,)."""
    N, C, H, W = x.shape
    K = filter_size
    if K % 2 == 0:
        # PyTorch Conv2d with padding=K//2 and even K yields (H+1, W+1) outputs;
        # this kernel only implements the shape-preserving odd-K case.
        raise NotImplementedError("mean_filter only supports odd filter_size")
    pad = K // 2
    Hp, Wp = H + 2 * pad, W + 2 * pad

    # Fold the batch into at most two grid steps: big blocks amortize the
    # per-step pipeline overhead, and two "parallel" iterations keep both
    # TensorCores busy on v7x.  (Blocks here are far below VMEM limits.)
    num_steps = 2 if (N >= 2 and N % 2 == 0) else 1
    Nb = N // num_steps

    w_flat = weight.astype(jnp.float32).reshape(-1)   # flat 1-D SMEM table
    b = bias.astype(jnp.float32)

    kernel = functools.partial(_mean_filter_kernel, C=C, H=H, W=W, K=K, Nb=Nb)

    return pl.pallas_call(
        kernel,
        out_shape=jax.ShapeDtypeStruct((N, C, H, W), x.dtype),
        grid=(num_steps,),
        in_specs=[
            # A chunk of Nb whole images per grid step (full C/H/W extents).
            pl.BlockSpec((Nb, C, H, W), lambda i: (i, 0, 0, 0)),
            # Tiny scalar tables: whole-array, SMEM (1-D to avoid SMEM padding).
            pl.BlockSpec(memory_space=pltpu.MemorySpace.SMEM),
            pl.BlockSpec(memory_space=pltpu.MemorySpace.SMEM),
        ],
        out_specs=pl.BlockSpec((Nb, C, H, W), lambda i: (i, 0, 0, 0)),
        scratch_shapes=[pltpu.VMEM((Nb, C, Hp, Wp), jnp.float32)],
        compiler_params=pltpu.CompilerParams(
            dimension_semantics=("parallel",)),
    )(x, w_flat, b)


if __name__ == "__main__":
    # MeanFilter(shape=(N, C, H, W), filter_size=3)
    N, C, H, W = 2, 4, 16, 16
    filter_size = 3

    key = jax.random.PRNGKey(0)
    kx, kb = jax.random.split(key)

    x = jax.random.normal(kx, (N, C, H, W), dtype=jnp.float32)

    # Deterministic parameter init (mirrors nn.init.constant_ on the weight;
    # bias drawn deterministically in PyTorch's default conv-bias range).
    init_weight = 1.0 / (filter_size * filter_size)
    weight = jnp.full((C, C, filter_size, filter_size), init_weight,
                      dtype=jnp.float32)
    fan_in = C * filter_size * filter_size
    bound = 1.0 / (fan_in ** 0.5)
    bias = jax.random.uniform(kb, (C,), minval=-bound, maxval=bound,
                              dtype=jnp.float32)

    out = mean_filter(x, weight, bias, filter_size)
    out = jax.block_until_ready(out)

    # Reference check against XLA's conv (same NCHW / OIHW semantics as torch).
    pad = filter_size // 2
    ref = lax.conv_general_dilated(
        x, weight, window_strides=(1, 1),
        padding=((pad, pad), (pad, pad)),
        dimension_numbers=("NCHW", "OIHW", "NCHW"),
    ) + bias[None, :, None, None]

    assert out.shape == (N, C, H, W)
    assert jnp.allclose(out, ref, atol=1e-4, rtol=1e-4), "mismatch vs reference conv"

    print("KERNEL_OK")
</pallas_src>

<mosaic_0001>
module attributes {stable_mosaic.version = 11 : i64} {
  func.func @_mean_filter_kernel(%arg0: i32, %arg1: memref<1x4x16x16xf32, #tpu.memory_space<vmem>>, %arg2: memref<144xf32, #tpu.memory_space<smem>>, %arg3: memref<4xf32, #tpu.memory_space<smem>>, %arg4: memref<1x4x16x16xf32, #tpu.memory_space<vmem>>, %arg5: memref<1x4x18x18xf32, #tpu.memory_space<vmem>>) attributes {dimension_semantics = [#tpu.dimension_semantics<parallel>], iteration_bounds = array<i64: 2>, scalar_prefetch = 0 : i64, scratch_operands = 1 : i64, tpu.core_type = #tpu.core_type<tc>, window_params = [{transform_indices = @transform_0, window_bounds = array<i64: 1, 4, 16, 16>}, {transform_indices = @transform_1, window_bounds = array<i64: 144>}, {transform_indices = @transform_2, window_bounds = array<i64: 4>}, {transform_indices = @transform_3, window_bounds = array<i64: 1, 4, 16, 16>}]} {
    %cst = arith.constant 0.000000e+00 : f32
    %0 = vector.broadcast %cst : f32 to vector<1x4x18x18xf32>
    %c0 = arith.constant 0 : index
    %c0_0 = arith.constant 0 : index
    %c0_1 = arith.constant 0 : index
    %c0_2 = arith.constant 0 : index
    %1 = vector.load %arg5[%c0, %c0_0, %c0_1, %c0_2] : memref<1x4x18x18xf32, #tpu.memory_space<vmem>>, vector<1x4x18x18xf32>
    tpu.vector_store %arg5[%c0, %c0_0, %c0_1, %c0_2], %0 {strides = array<i32>} : memref<1x4x18x18xf32, #tpu.memory_space<vmem>>, vector<1x4x18x18xf32>,
    %c0_3 = arith.constant 0 : index
    %c0_4 = arith.constant 0 : index
    %c0_5 = arith.constant 0 : index
    %c0_6 = arith.constant 0 : index
    %2 = vector.load %arg1[%c0_3, %c0_4, %c0_5, %c0_6] : memref<1x4x16x16xf32, #tpu.memory_space<vmem>>, vector<1x4x16x16xf32>
    %c0_7 = arith.constant 0 : index
    %c0_8 = arith.constant 0 : index
    %c1 = arith.constant 1 : index
    %c1_9 = arith.constant 1 : index
    %3 = vector.load %arg5[%c0_7, %c0_8, %c1, %c1_9] : memref<1x4x18x18xf32, #tpu.memory_space<vmem>>, vector<1x4x16x16xf32>
    tpu.vector_store %arg5[%c0_7, %c0_8, %c1, %c1_9], %2 {strides = array<i32>} : memref<1x4x18x18xf32, #tpu.memory_space<vmem>>, vector<1x4x16x16xf32>,
    %cst_10 = arith.constant 0.000000e+00 : f32
    %4 = vector.broadcast %cst_10 : f32 to vector<1x16x16xf32>
    %cst_11 = arith.constant 0.000000e+00 : f32
    %5 = vector.broadcast %cst_11 : f32 to vector<1x16x16xf32>
    %cst_12 = arith.constant 0.000000e+00 : f32
    %6 = vector.broadcast %cst_12 : f32 to vector<1x16x16xf32>
    %cst_13 = arith.constant 0.000000e+00 : f32
    %7 = vector.broadcast %cst_13 : f32 to vector<1x16x16xf32>
    %c0_14 = arith.constant 0 : index
    %c0_15 = arith.constant 0 : index
    %c0_16 = arith.constant 0 : index
    %c0_17 = arith.constant 0 : index
    %8 = vector.load %arg5[%c0_14, %c0_15, %c0_16, %c0_17] : memref<1x4x18x18xf32, #tpu.memory_space<vmem>>, vector<1x1x18x18xf32>
    %9 = vector.shape_cast %8 : vector<1x1x18x18xf32> to vector<1x18x18xf32>
    %10 = vector.extract_strided_slice %9 {offsets = [0, 0, 0], sizes = [1, 16, 16], strides = [1, 1, 1]} : vector<1x18x18xf32> to vector<1x16x16xf32>
    %c0_18 = arith.constant 0 : index
    %11 = memref.load %arg2[%c0_18] : memref<144xf32, #tpu.memory_space<smem>>
    %12 = vector.broadcast %11 : f32 to vector<1x16x16xf32>
    %13 = arith.mulf %12, %10 : vector<1x16x16xf32>
    %14 = arith.addf %4, %13 : vector<1x16x16xf32>
    %c36 = arith.constant 36 : index
    %15 = memref.load %arg2[%c36] : memref<144xf32, #tpu.memory_space<smem>>
    %16 = vector.broadcast %15 : f32 to vector<1x16x16xf32>
    %17 = arith.mulf %16, %10 : vector<1x16x16xf32>
    %18 = arith.addf %5, %17 : vector<1x16x16xf32>
    %c72 = arith.constant 72 : index
    %19 = memref.load %arg2[%c72] : memref<144xf32, #tpu.memory_space<smem>>
    %20 = vector.broadcast %19 : f32 to vector<1x16x16xf32>
    %21 = arith.mulf %20, %10 : vector<1x16x16xf32>
    %22 = arith.addf %6, %21 : vector<1x16x16xf32>
    %c108 = arith.constant 108 : index
    %23 = memref.load %arg2[%c108] : memref<144xf32, #tpu.memory_space<smem>>
    %24 = vector.broadcast %23 : f32 to vector<1x16x16xf32>
    %25 = arith.mulf %24, %10 : vector<1x16x16xf32>
    %26 = arith.addf %7, %25 : vector<1x16x16xf32>
    %27 = vector.extract_strided_slice %9 {offsets = [0, 0, 1], sizes = [1, 16, 16], strides = [1, 1, 1]} : vector<1x18x18xf32> to vector<1x16x16xf32>
    %c1_19 = arith.constant 1 : index
    %28 = memref.load %arg2[%c1_19] : memref<144xf32, #tpu.memory_space<smem>>
    %29 = vector.broadcast %28 : f32 to vector<1x16x16xf32>
    %30 = arith.mulf %29, %27 : vector<1x16x16xf32>
    %31 = arith.addf %14, %30 : vector<1x16x16xf32>
    %c37 = arith.constant 37 : index
    %32 = memref.load %arg2[%c37] : memref<144xf32, #tpu.memory_space<smem>>
    %33 = vector.broadcast %32 : f32 to vector<1x16x16xf32>
    %34 = arith.mulf %33, %27 : vector<1x16x16xf32>
    %35 = arith.addf %18, %34 : vector<1x16x16xf32>
    %c73 = arith.constant 73 : index
    %36 = memref.load %arg2[%c73] : memref<144xf32, #tpu.memory_space<smem>>
    %37 = vector.broadcast %36 : f32 to vector<1x16x16xf32>
    %38 = arith.mulf %37, %27 : vector<1x16x16xf32>
    %39 = arith.addf %22, %38 : vector<1x16x16xf32>
    %c109 = arith.constant 109 : index
    %40 = memref.load %arg2[%c109] : memref<144xf32, #tpu.memory_space<smem>>
    %41 = vector.broadcast %40 : f32 to vector<1x16x16xf32>
    %42 = arith.mulf %41, %27 : vector<1x16x16xf32>
    %43 = arith.addf %26, %42 : vector<1x16x16xf32>
    %44 = vector.extract_strided_slice %9 {offsets = [0, 0, 2], sizes = [1, 16, 16], strides = [1, 1, 1]} : vector<1x18x18xf32> to vector<1x16x16xf32>
    %c2 = arith.constant 2 : index
    %45 = memref.load %arg2[%c2] : memref<144xf32, #tpu.memory_space<smem>>
    %46 = vector.broadcast %45 : f32 to vector<1x16x16xf32>
    %47 = arith.mulf %46, %44 : vector<1x16x16xf32>
    %48 = arith.addf %31, %47 : vector<1x16x16xf32>
    %c38 = arith.constant 38 : index
    %49 = memref.load %arg2[%c38] : memref<144xf32, #tpu.memory_space<smem>>
    %50 = vector.broadcast %49 : f32 to vector<1x16x16xf32>
    %51 = arith.mulf %50, %44 : vector<1x16x16xf32>
    %52 = arith.addf %35, %51 : vector<1x16x16xf32>
    %c74 = arith.constant 74 : index
    %53 = memref.load %arg2[%c74] : memref<144xf32, #tpu.memory_space<smem>>
    %54 = vector.broadcast %53 : f32 to vector<1x16x16xf32>
    %55 = arith.mulf %54, %44 : vector<1x16x16xf32>
    %56 = arith.addf %39, %55 : vector<1x16x16xf32>
    %c110 = arith.constant 110 : index
    %57 = memref.load %arg2[%c110] : memref<144xf32, #tpu.memory_space<smem>>
    %58 = vector.broadcast %57 : f32 to vector<1x16x16xf32>
    %59 = arith.mulf %58, %44 : vector<1x16x16xf32>
    %60 = arith.addf %43, %59 : vector<1x16x16xf32>
    %61 = vector.extract_strided_slice %9 {offsets = [0, 1, 0], sizes = [1, 16, 16], strides = [1, 1, 1]} : vector<1x18x18xf32> to vector<1x16x16xf32>
    %c3 = arith.constant 3 : index
    %62 = memref.load %arg2[%c3] : memref<144xf32, #tpu.memory_space<smem>>
    %63 = vector.broadcast %62 : f32 to vector<1x16x16xf32>
    %64 = arith.mulf %63, %61 : vector<1x16x16xf32>
    %65 = arith.addf %48, %64 : vector<1x16x16xf32>
    %c39 = arith.constant 39 : index
    %66 = memref.load %arg2[%c39] : memref<144xf32, #tpu.memory_space<smem>>
    %67 = vector.broadcast %66 : f32 to vector<1x16x16xf32>
    %68 = arith.mulf %67, %61 : vector<1x16x16xf32>
    %69 = arith.addf %52, %68 : vector<1x16x16xf32>
    %c75 = arith.constant 75 : index
    %70 = memref.load %arg2[%c75] : memref<144xf32, #tpu.memory_space<smem>>
    %71 = vector.broadcast %70 : f32 to vector<1x16x16xf32>
    %72 = arith.mulf %71, %61 : vector<1x16x16xf32>
    %73 = arith.addf %56, %72 : vector<1x16x16xf32>
    %c111 = arith.constant 111 : index
    %74 = memref.load %arg2[%c111] : memref<144xf32, #tpu.memory_space<smem>>
    %75 = vector.broadcast %74 : f32 to vector<1x16x16xf32>
    %76 = arith.mulf %75, %61 : vector<1x16x16xf32>
    %77 = arith.addf %60, %76 : vector<1x16x16xf32>
    %78 = vector.extract_strided_slice %9 {offsets = [0, 1, 1], sizes = [1, 16, 16], strides = [1, 1, 1]} : vector<1x18x18xf32> to vector<1x16x16xf32>
    %c4 = arith.constant 4 : index
    %79 = memref.load %arg2[%c4] : memref<144xf32, #tpu.memory_space<smem>>
    %80 = vector.broadcast %79 : f32 to vector<1x16x16xf32>
    %81 = arith.mulf %80, %78 : vector<1x16x16xf32>
    %82 = arith.addf %65, %81 : vector<1x16x16xf32>
    %c40 = arith.constant 40 : index
    %83 = memref.load %arg2[%c40] : memref<144xf32, #tpu.memory_space<smem>>
    %84 = vector.broadcast %83 : f32 to vector<1x16x16xf32>
    %85 = arith.mulf %84, %78 : vector<1x16x16xf32>
    %86 = arith.addf %69, %85 : vector<1x16x16xf32>
    %c76 = arith.constant 76 : index
    %87 = memref.load %arg2[%c76] : memref<144xf32, #tpu.memory_space<smem>>
    %88 = vector.broadcast %87 : f32 to vector<1x16x16xf32>
    %89 = arith.mulf %88, %78 : vector<1x16x16xf32>
    %90 = arith.addf %73, %89 : vector<1x16x16xf32>
    %c112 = arith.constant 112 : index
    %91 = memref.load %arg2[%c112] : memref<144xf32, #tpu.memory_space<smem>>
    %92 = vector.broadcast %91 : f32 to vector<1x16x16xf32>
    %93 = arith.mulf %92, %78 : vector<1x16x16xf32>
    %94 = arith.addf %77, %93 : vector<1x16x16xf32>
    %95 = vector.extract_strided_slice %9 {offsets = [0, 1, 2], sizes = [1, 16, 16], strides = [1, 1, 1]} : vector<1x18x18xf32> to vector<1x16x16xf32>
    %c5 = arith.constant 5 : index
    %96 = memref.load %arg2[%c5] : memref<144xf32, #tpu.memory_space<smem>>
    %97 = vector.broadcast %96 : f32 to vector<1x16x16xf32>
    %98 = arith.mulf %97, %95 : vector<1x16x16xf32>
    %99 = arith.addf %82, %98 : vector<1x16x16xf32>
    %c41 = arith.constant 41 : index
    %100 = memref.load %arg2[%c41] : memref<144xf32, #tpu.memory_space<smem>>
    %101 = vector.broadcast %100 : f32 to vector<1x16x16xf32>
    %102 = arith.mulf %101, %95 : vector<1x16x16xf32>
    %103 = arith.addf %86, %102 : vector<1x16x16xf32>
    %c77 = arith.constant 77 : index
    %104 = memref.load %arg2[%c77] : memref<144xf32, #tpu.memory_space<smem>>
    %105 = vector.broadcast %104 : f32 to vector<1x16x16xf32>
    %106 = arith.mulf %105, %95 : vector<1x16x16xf32>
    %107 = arith.addf %90, %106 : vector<1x16x16xf32>
    %c113 = arith.constant 113 : index
    %108 = memref.load %arg2[%c113] : memref<144xf32, #tpu.memory_space<smem>>
    %109 = vector.broadcast %108 : f32 to vector<1x16x16xf32>
    %110 = arith.mulf %109, %95 : vector<1x16x16xf32>
    %111 = arith.addf %94, %110 : vector<1x16x16xf32>
    %112 = vector.extract_strided_slice %9 {offsets = [0, 2, 0], sizes = [1, 16, 16], strides = [1, 1, 1]} : vector<1x18x18xf32> to vector<1x16x16xf32>
    %c6 = arith.constant 6 : index
    %113 = memref.load %arg2[%c6] : memref<144xf32, #tpu.memory_space<smem>>
    %114 = vector.broadcast %113 : f32 to vector<1x16x16xf32>
    %115 = arith.mulf %114, %112 : vector<1x16x16xf32>
    %116 = arith.addf %99, %115 : vector<1x16x16xf32>
    %c42 = arith.constant 42 : index
    %117 = memref.load %arg2[%c42] : memref<144xf32, #tpu.memory_space<smem>>
    %118 = vector.broadcast %117 : f32 to vector<1x16x16xf32>
    %119 = arith.mulf %118, %112 : vector<1x16x16xf32>
    %120 = arith.addf %103, %119 : vector<1x16x16xf32>
    %c78 = arith.constant 78 : index
    %121 = memref.load %arg2[%c78] : memref<144xf32, #tpu.memory_space<smem>>
    %122 = vector.broadcast %121 : f32 to vector<1x16x16xf32>
    %123 = arith.mulf %122, %112 : vector<1x16x16xf32>
    %124 = arith.addf %107, %123 : vector<1x16x16xf32>
    %c114 = arith.constant 114 : index
    %125 = memref.load %arg2[%c114] : memref<144xf32, #tpu.memory_space<smem>>
    %126 = vector.broadcast %125 : f32 to vector<1x16x16xf32>
    %127 = arith.mulf %126, %112 : vector<1x16x16xf32>
    %128 = arith.addf %111, %127 : vector<1x16x16xf32>
    %129 = vector.extract_strided_slice %9 {offsets = [0, 2, 1], sizes = [1, 16, 16], strides = [1, 1, 1]} : vector<1x18x18xf32> to vector<1x16x16xf32>
    %c7 = arith.constant 7 : index
    %130 = memref.load %arg2[%c7] : memref<144xf32, #tpu.memory_space<smem>>
    %131 = vector.broadcast %130 : f32 to vector<1x16x16xf32>
    %132 = arith.mulf %131, %129 : vector<1x16x16xf32>
    %133 = arith.addf %116, %132 : vector<1x16x16xf32>
    %c43 = arith.constant 43 : index
    %134 = memref.load %arg2[%c43] : memref<144xf32, #tpu.memory_space<smem>>
    %135 = vector.broadcast %134 : f32 to vector<1x16x16xf32>
    %136 = arith.mulf %135, %129 : vector<1x16x16xf32>
    %137 = arith.addf %120, %136 : vector<1x16x16xf32>
    %c79 = arith.constant 79 : index
    %138 = memref.load %arg2[%c79] : memref<144xf32, #tpu.memory_space<smem>>
    %139 = vector.broadcast %138 : f32 to vector<1x16x16xf32>
    %140 = arith.mulf %139, %129 : vector<1x16x16xf32>
    %141 = arith.addf %124, %140 : vector<1x16x16xf32>
    %c115 = arith.constant 115 : index
    %142 = memref.load %arg2[%c115] : memref<144xf32, #tpu.memory_space<smem>>
    %143 = vector.broadcast %142 : f32 to vector<1x16x16xf32>
    %144 = arith.mulf %143, %129 : vector<1x16x16xf32>
    %145 = arith.addf %128, %144 : vector<1x16x16xf32>
    %146 = vector.extract_strided_slice %9 {offsets = [0, 2, 2], sizes = [1, 16, 16], strides = [1, 1, 1]} : vector<1x18x18xf32> to vector<1x16x16xf32>
    %c8 = arith.constant 8 : index
    %147 = memref.load %arg2[%c8] : memref<144xf32, #tpu.memory_space<smem>>
    %148 = vector.broadcast %147 : f32 to vector<1x16x16xf32>
    %149 = arith.mulf %148, %146 : vector<1x16x16xf32>
    %150 = arith.addf %133, %149 : vector<1x16x16xf32>
    %c44 = arith.constant 44 : index
    %151 = memref.load %arg2[%c44] : memref<144xf32, #tpu.memory_space<smem>>
    %152 = vector.broadcast %151 : f32 to vector<1x16x16xf32>
    %153 = arith.mulf %152, %146 : vector<1x16x16xf32>
    %154 = arith.addf %137, %153 : vector<1x16x16xf32>
    %c80 = arith.constant 80 : index
    %155 = memref.load %arg2[%c80] : memref<144xf32, #tpu.memory_space<smem>>
    %156 = vector.broadcast %155 : f32 to vector<1x16x16xf32>
    %157 = arith.mulf %156, %146 : vector<1x16x16xf32>
    %158 = arith.addf %141, %157 : vector<1x16x16xf32>
    %c116 = arith.constant 116 : index
    %159 = memref.load %arg2[%c116] : memref<144xf32, #tpu.memory_space<smem>>
    %160 = vector.broadcast %159 : f32 to vector<1x16x16xf32>
    %161 = arith.mulf %160, %146 : vector<1x16x16xf32>
    %162 = arith.addf %145, %161 : vector<1x16x16xf32>
    %c0_20 = arith.constant 0 : index
    %c1_21 = arith.constant 1 : index
    %c0_22 = arith.constant 0 : index
    %c0_23 = arith.constant 0 : index
    %163 = vector.load %arg5[%c0_20, %c1_21, %c0_22, %c0_23] : memref<1x4x18x18xf32, #tpu.memory_space<vmem>>, vector<1x1x18x18xf32>
    %164 = vector.shape_cast %163 : vector<1x1x18x18xf32> to vector<1x18x18xf32>
    %165 = vector.extract_strided_slice %164 {offsets = [0, 0, 0], sizes = [1, 16, 16], strides = [1, 1, 1]} : vector<1x18x18xf32> to vector<1x16x16xf32>
    %c9 = arith.constant 9 : index
    %166 = memref.load %arg2[%c9] : memref<144xf32, #tpu.memory_space<smem>>
    %167 = vector.broadcast %166 : f32 to vector<1x16x16xf32>
    %168 = arith.mulf %167, %165 : vector<1x16x16xf32>
    %169 = arith.addf %150, %168 : vector<1x16x16xf32>
    %c45 = arith.constant 45 : index
    %170 = memref.load %arg2[%c45] : memref<144xf32, #tpu.memory_space<smem>>
    %171 = vector.broadcast %170 : f32 to vector<1x16x16xf32>
    %172 = arith.mulf %171, %165 : vector<1x16x16xf32>
    %173 = arith.addf %154, %172 : vector<1x16x16xf32>
    %c81 = arith.constant 81 : index
    %174 = memref.load %arg2[%c81] : memref<144xf32, #tpu.memory_space<smem>>
    %175 = vector.broadcast %174 : f32 to vector<1x16x16xf32>
    %176 = arith.mulf %175, %165 : vector<1x16x16xf32>
    %177 = arith.addf %158, %176 : vector<1x16x16xf32>
    %c117 = arith.constant 117 : index
    %178 = memref.load %arg2[%c117] : memref<144xf32, #tpu.memory_space<smem>>
    %179 = vector.broadcast %178 : f32 to vector<1x16x16xf32>
    %180 = arith.mulf %179, %165 : vector<1x16x16xf32>
    %181 = arith.addf %162, %180 : vector<1x16x16xf32>
    %182 = vector.extract_strided_slice %164 {offsets = [0, 0, 1], sizes = [1, 16, 16], strides = [1, 1, 1]} : vector<1x18x18xf32> to vector<1x16x16xf32>
    %c10 = arith.constant 10 : index
    %183 = memref.load %arg2[%c10] : memref<144xf32, #tpu.memory_space<smem>>
    %184 = vector.broadcast %183 : f32 to vector<1x16x16xf32>
    %185 = arith.mulf %184, %182 : vector<1x16x16xf32>
    %186 = arith.addf %169, %185 : vector<1x16x16xf32>
    %c46 = arith.constant 46 : index
    %187 = memref.load %arg2[%c46] : memref<144xf32, #tpu.memory_space<smem>>
    %188 = vector.broadcast %187 : f32 to vector<1x16x16xf32>
    %189 = arith.mulf %188, %182 : vector<1x16x16xf32>
    %190 = arith.addf %173, %189 : vector<1x16x16xf32>
    %c82 = arith.constant 82 : index
    %191 = memref.load %arg2[%c82] : memref<144xf32, #tpu.memory_space<smem>>
    %192 = vector.broadcast %191 : f32 to vector<1x16x16xf32>
    %193 = arith.mulf %192, %182 : vector<1x16x16xf32>
    %194 = arith.addf %177, %193 : vector<1x16x16xf32>
    %c118 = arith.constant 118 : index
    %195 = memref.load %arg2[%c118] : memref<144xf32, #tpu.memory_space<smem>>
    %196 = vector.broadcast %195 : f32 to vector<1x16x16xf32>
    %197 = arith.mulf %196, %182 : vector<1x16x16xf32>
    %198 = arith.addf %181, %197 : vector<1x16x16xf32>
    %199 = vector.extract_strided_slice %164 {offsets = [0, 0, 2], sizes = [1, 16, 16], strides = [1, 1, 1]} : vector<1x18x18xf32> to vector<1x16x16xf32>
    %c11 = arith.constant 11 : index
    %200 = memref.load %arg2[%c11] : memref<144xf32, #tpu.memory_space<smem>>
    %201 = vector.broadcast %200 : f32 to vector<1x16x16xf32>
    %202 = arith.mulf %201, %199 : vector<1x16x16xf32>
    %203 = arith.addf %186, %202 : vector<1x16x16xf32>
    %c47 = arith.constant 47 : index
    %204 = memref.load %arg2[%c47] : memref<144xf32, #tpu.memory_space<smem>>
    %205 = vector.broadcast %204 : f32 to vector<1x16x16xf32>
    %206 = arith.mulf %205, %199 : vector<1x16x16xf32>
    %207 = arith.addf %190, %206 : vector<1x16x16xf32>
    %c83 = arith.constant 83 : index
    %208 = memref.load %arg2[%c83] : memref<144xf32, #tpu.memory_space<smem>>
    %209 = vector.broadcast %208 : f32 to vector<1x16x16xf32>
    %210 = arith.mulf %209, %199 : vector<1x16x16xf32>
    %211 = arith.addf %194, %210 : vector<1x16x16xf32>
    %c119 = arith.constant 119 : index
    %212 = memref.load %arg2[%c119] : memref<144xf32, #tpu.memory_space<smem>>
    %213 = vector.broadcast %212 : f32 to vector<1x16x16xf32>
    %214 = arith.mulf %213, %199 : vector<1x16x16xf32>
    %215 = arith.addf %198, %214 : vector<1x16x16xf32>
    %216 = vector.extract_strided_slice %164 {offsets = [0, 1, 0], sizes = [1, 16, 16], strides = [1, 1, 1]} : vector<1x18x18xf32> to vector<1x16x16xf32>
    %c12 = arith.constant 12 : index
    %217 = memref.load %arg2[%c12] : memref<144xf32, #tpu.memory_space<smem>>
    %218 = vector.broadcast %217 : f32 to vector<1x16x16xf32>
    %219 = arith.mulf %218, %216 : vector<1x16x16xf32>
    %220 = arith.addf %203, %219 : vector<1x16x16xf32>
    %c48 = arith.constant 48 : index
    %221 = memref.load %arg2[%c48] : memref<144xf32, #tpu.memory_space<smem>>
    %222 = vector.broadcast %221 : f32 to vector<1x16x16xf32>
    %223 = arith.mulf %222, %216 : vector<1x16x16xf32>
    %224 = arith.addf %207, %223 : vector<1x16x16xf32>
    %c84 = arith.constant 84 : index
    %225 = memref.load %arg2[%c84] : memref<144xf32, #tpu.memory_space<smem>>
    %226 = vector.broadcast %225 : f32 to vector<1x16x16xf32>
    %227 = arith.mulf %226, %216 : vector<1x16x16xf32>
    %228 = arith.addf %211, %227 : vector<1x16x16xf32>
    %c120 = arith.constant 120 : index
    %229 = memref.load %arg2[%c120] : memref<144xf32, #tpu.memory_space<smem>>
    %230 = vector.broadcast %229 : f32 to vector<1x16x16xf32>
    %231 = arith.mulf %230, %216 : vector<1x16x16xf32>
    %232 = arith.addf %215, %231 : vector<1x16x16xf32>
    %233 = vector.extract_strided_slice %164 {offsets = [0, 1, 1], sizes = [1, 16, 16], strides = [1, 1, 1]} : vector<1x18x18xf32> to vector<1x16x16xf32>
    %c13 = arith.constant 13 : index
    %234 = memref.load %arg2[%c13] : memref<144xf32, #tpu.memory_space<smem>>
    %235 = vector.broadcast %234 : f32 to vector<1x16x16xf32>
    %236 = arith.mulf %235, %233 : vector<1x16x16xf32>
    %237 = arith.addf %220, %236 : vector<1x16x16xf32>
    %c49 = arith.constant 49 : index
    %238 = memref.load %arg2[%c49] : memref<144xf32, #tpu.memory_space<smem>>
    %239 = vector.broadcast %238 : f32 to vector<1x16x16xf32>
    %240 = arith.mulf %239, %233 : vector<1x16x16xf32>
    %241 = arith.addf %224, %240 : vector<1x16x16xf32>
    %c85 = arith.constant 85 : index
    %242 = memref.load %arg2[%c85] : memref<144xf32, #tpu.memory_space<smem>>
    %243 = vector.broadcast %242 : f32 to vector<1x16x16xf32>
    %244 = arith.mulf %243, %233 : vector<1x16x16xf32>
    %245 = arith.addf %228, %244 : vector<1x16x16xf32>
    %c121 = arith.constant 121 : index
    %246 = memref.load %arg2[%c121] : memref<144xf32, #tpu.memory_space<smem>>
    %247 = vector.broadcast %246 : f32 to vector<1x16x16xf32>
    %248 = arith.mulf %247, %233 : vector<1x16x16xf32>
    %249 = arith.addf %232, %248 : vector<1x16x16xf32>
    %250 = vector.extract_strided_slice %164 {offsets = [0, 1, 2], sizes = [1, 16, 16], strides = [1, 1, 1]} : vector<1x18x18xf32> to vector<1x16x16xf32>
    %c14 = arith.constant 14 : index
    %251 = memref.load %arg2[%c14] : memref<144xf32, #tpu.memory_space<smem>>
    %252 = vector.broadcast %251 : f32 to vector<1x16x16xf32>
    %253 = arith.mulf %252, %250 : vector<1x16x16xf32>
    %254 = arith.addf %237, %253 : vector<1x16x16xf32>
    %c50 = arith.constant 50 : index
    %255 = memref.load %arg2[%c50] : memref<144xf32, #tpu.memory_space<smem>>
    %256 = vector.broadcast %255 : f32 to vector<1x16x16xf32>
    %257 = arith.mulf %256, %250 : vector<1x16x16xf32>
    %258 = arith.addf %241, %257 : vector<1x16x16xf32>
    %c86 = arith.constant 86 : index
    %259 = memref.load %arg2[%c86] : memref<144xf32, #tpu.memory_space<smem>>
    %260 = vector.broadcast %259 : f32 to vector<1x16x16xf32>
    %261 = arith.mulf %260, %250 : vector<1x16x16xf32>
    %262 = arith.addf %245, %261 : vector<1x16x16xf32>
    %c122 = arith.constant 122 : index
    %263 = memref.load %arg2[%c122] : memref<144xf32, #tpu.memory_space<smem>>
    %264 = vector.broadcast %263 : f32 to vector<1x16x16xf32>
    %265 = arith.mulf %264, %250 : vector<1x16x16xf32>
    %266 = arith.addf %249, %265 : vector<1x16x16xf32>
    %267 = vector.extract_strided_slice %164 {offsets = [0, 2, 0], sizes = [1, 16, 16], strides = [1, 1, 1]} : vector<1x18x18xf32> to vector<1x16x16xf32>
    %c15 = arith.constant 15 : index
    %268 = memref.load %arg2[%c15] : memref<144xf32, #tpu.memory_space<smem>>
    %269 = vector.broadcast %268 : f32 to vector<1x16x16xf32>
    %270 = arith.mulf %269, %267 : vector<1x16x16xf32>
    %271 = arith.addf %254, %270 : vector<1x16x16xf32>
    %c51 = arith.constant 51 : index
    %272 = memref.load %arg2[%c51] : memref<144xf32, #tpu.memory_space<smem>>
    %273 = vector.broadcast %272 : f32 to vector<1x16x16xf32>
    %274 = arith.mulf %273, %267 : vector<1x16x16xf32>
    %275 = arith.addf %258, %274 : vector<1x16x16xf32>
    %c87 = arith.constant 87 : index
    %276 = memref.load %arg2[%c87] : memref<144xf32, #tpu.memory_space<smem>>
    %277 = vector.broadcast %276 : f32 to vector<1x16x16xf32>
    %278 = arith.mulf %277, %267 : vector<1x16x16xf32>
    %279 = arith.addf %262, %278 : vector<1x16x16xf32>
    %c123 = arith.constant 123 : index
    %280 = memref.load %arg2[%c123] : memref<144xf32, #tpu.memory_space<smem>>
    %281 = vector.broadcast %280 : f32 to vector<1x16x16xf32>
    %282 = arith.mulf %281, %267 : vector<1x16x16xf32>
    %283 = arith.addf %266, %282 : vector<1x16x16xf32>
    %284 = vector.extract_strided_slice %164 {offsets = [0, 2, 1], sizes = [1, 16, 16], strides = [1, 1, 1]} : vector<1x18x18xf32> to vector<1x16x16xf32>
    %c16 = arith.constant 16 : index
    %285 = memref.load %arg2[%c16] : memref<144xf32, #tpu.memory_space<smem>>
    %286 = vector.broadcast %285 : f32 to vector<1x16x16xf32>
    %287 = arith.mulf %286, %284 : vector<1x16x16xf32>
    %288 = arith.addf %271, %287 : vector<1x16x16xf32>
    %c52 = arith.constant 52 : index
    %289 = memref.load %arg2[%c52] : memref<144xf32, #tpu.memory_space<smem>>
    %290 = vector.broadcast %289 : f32 to vector<1x16x16xf32>
    %291 = arith.mulf %290, %284 : vector<1x16x16xf32>
    %292 = arith.addf %275, %291 : vector<1x16x16xf32>
    %c88 = arith.constant 88 : index
    %293 = memref.load %arg2[%c88] : memref<144xf32, #tpu.memory_space<smem>>
    %294 = vector.broadcast %293 : f32 to vector<1x16x16xf32>
    %295 = arith.mulf %294, %284 : vector<1x16x16xf32>
    %296 = arith.addf %279, %295 : vector<1x16x16xf32>
    %c124 = arith.constant 124 : index
    %297 = memref.load %arg2[%c124] : memref<144xf32, #tpu.memory_space<smem>>
    %298 = vector.broadcast %297 : f32 to vector<1x16x16xf32>
    %299 = arith.mulf %298, %284 : vector<1x16x16xf32>
    %300 = arith.addf %283, %299 : vector<1x16x16xf32>
    %301 = vector.extract_strided_slice %164 {offsets = [0, 2, 2], sizes = [1, 16, 16], strides = [1, 1, 1]} : vector<1x18x18xf32> to vector<1x16x16xf32>
    %c17 = arith.constant 17 : index
    %302 = memref.load %arg2[%c17] : memref<144xf32, #tpu.memory_space<smem>>
    %303 = vector.broadcast %302 : f32 to vector<1x16x16xf32>
    %304 = arith.mulf %303, %301 : vector<1x16x16xf32>
    %305 = arith.addf %288, %304 : vector<1x16x16xf32>
    %c53 = arith.constant 53 : index
    %306 = memref.load %arg2[%c53] : memref<144xf32, #tpu.memory_space<smem>>
    %307 = vector.broadcast %306 : f32 to vector<1x16x16xf32>
    %308 = arith.mulf %307, %301 : vector<1x16x16xf32>
    %309 = arith.addf %292, %308 : vector<1x16x16xf32>
    %c89 = arith.constant 89 : index
    %310 = memref.load %arg2[%c89] : memref<144xf32, #tpu.memory_space<smem>>
    %311 = vector.broadcast %310 : f32 to vector<1x16x16xf32>
    %312 = arith.mulf %311, %301 : vector<1x16x16xf32>
    %313 = arith.addf %296, %312 : vector<1x16x16xf32>
    %c125 = arith.constant 125 : index
    %314 = memref.load %arg2[%c125] : memref<144xf32, #tpu.memory_space<smem>>
    %315 = vector.broadcast %314 : f32 to vector<1x16x16xf32>
    %316 = arith.mulf %315, %301 : vector<1x16x16xf32>
    %317 = arith.addf %300, %316 : vector<1x16x16xf32>
    %c0_24 = arith.constant 0 : index
    %c2_25 = arith.constant 2 : index
    %c0_26 = arith.constant 0 : index
    %c0_27 = arith.constant 0 : index
    %318 = vector.load %arg5[%c0_24, %c2_25, %c0_26, %c0_27] : memref<1x4x18x18xf32, #tpu.memory_space<vmem>>, vector<1x1x18x18xf32>
    %319 = vector.shape_cast %318 : vector<1x1x18x18xf32> to vector<1x18x18xf32>
    %320 = vector.extract_strided_slice %319 {offsets = [0, 0, 0], sizes = [1, 16, 16], strides = [1, 1, 1]} : vector<1x18x18xf32> to vector<1x16x16xf32>
    %c18 = arith.constant 18 : index
    %321 = memref.load %arg2[%c18] : memref<144xf32, #tpu.memory_space<smem>>
    %322 = vector.broadcast %321 : f32 to vector<1x16x16xf32>
    %323 = arith.mulf %322, %320 : vector<1x16x16xf32>
    %324 = arith.addf %305, %323 : vector<1x16x16xf32>
    %c54 = arith.constant 54 : index
    %325 = memref.load %arg2[%c54] : memref<144xf32, #tpu.memory_space<smem>>
    %326 = vector.broadcast %325 : f32 to vector<1x16x16xf32>
    %327 = arith.mulf %326, %320 : vector<1x16x16xf32>
    %328 = arith.addf %309, %327 : vector<1x16x16xf32>
    %c90 = arith.constant 90 : index
    %329 = memref.load %arg2[%c90] : memref<144xf32, #tpu.memory_space<smem>>
    %330 = vector.broadcast %329 : f32 to vector<1x16x16xf32>
    %331 = arith.mulf %330, %320 : vector<1x16x16xf32>
    %332 = arith.addf %313, %331 : vector<1x16x16xf32>
    %c126 = arith.constant 126 : index
    %333 = memref.load %arg2[%c126] : memref<144xf32, #tpu.memory_space<smem>>
    %334 = vector.broadcast %333 : f32 to vector<1x16x16xf32>
    %335 = arith.mulf %334, %320 : vector<1x16x16xf32>
    %336 = arith.addf %317, %335 : vector<1x16x16xf32>
    %337 = vector.extract_strided_slice %319 {offsets = [0, 0, 1], sizes = [1, 16, 16], strides = [1, 1, 1]} : vector<1x18x18xf32> to vector<1x16x16xf32>
    %c19 = arith.constant 19 : index
    %338 = memref.load %arg2[%c19] : memref<144xf32, #tpu.memory_space<smem>>
    %339 = vector.broadcast %338 : f32 to vector<1x16x16xf32>
    %340 = arith.mulf %339, %337 : vector<1x16x16xf32>
    %341 = arith.addf %324, %340 : vector<1x16x16xf32>
    %c55 = arith.constant 55 : index
    %342 = memref.load %arg2[%c55] : memref<144xf32, #tpu.memory_space<smem>>
    %343 = vector.broadcast %342 : f32 to vector<1x16x16xf32>
    %344 = arith.mulf %343, %337 : vector<1x16x16xf32>
    %345 = arith.addf %328, %344 : vector<1x16x16xf32>
    %c91 = arith.constant 91 : index
    %346 = memref.load %arg2[%c91] : memref<144xf32, #tpu.memory_space<smem>>
    %347 = vector.broadcast %346 : f32 to vector<1x16x16xf32>
    %348 = arith.mulf %347, %337 : vector<1x16x16xf32>
    %349 = arith.addf %332, %348 : vector<1x16x16xf32>
    %c127 = arith.constant 127 : index
    %350 = memref.load %arg2[%c127] : memref<144xf32, #tpu.memory_space<smem>>
    %351 = vector.broadcast %350 : f32 to vector<1x16x16xf32>
    %352 = arith.mulf %351, %337 : vector<1x16x16xf32>
    %353 = arith.addf %336, %352 : vector<1x16x16xf32>
    %354 = vector.extract_strided_slice %319 {offsets = [0, 0, 2], sizes = [1, 16, 16], strides = [1, 1, 1]} : vector<1x18x18xf32> to vector<1x16x16xf32>
    %c20 = arith.constant 20 : index
    %355 = memref.load %arg2[%c20] : memref<144xf32, #tpu.memory_space<smem>>
    %356 = vector.broadcast %355 : f32 to vector<1x16x16xf32>
    %357 = arith.mulf %356, %354 : vector<1x16x16xf32>
    %358 = arith.addf %341, %357 : vector<1x16x16xf32>
    %c56 = arith.constant 56 : index
    %359 = memref.load %arg2[%c56] : memref<144xf32, #tpu.memory_space<smem>>
    %360 = vector.broadcast %359 : f32 to vector<1x16x16xf32>
    %361 = arith.mulf %360, %354 : vector<1x16x16xf32>
    %362 = arith.addf %345, %361 : vector<1x16x16xf32>
    %c92 = arith.constant 92 : index
    %363 = memref.load %arg2[%c92] : memref<144xf32, #tpu.memory_space<smem>>
    %364 = vector.broadcast %363 : f32 to vector<1x16x16xf32>
    %365 = arith.mulf %364, %354 : vector<1x16x16xf32>
    %366 = arith.addf %349, %365 : vector<1x16x16xf32>
    %c128 = arith.constant 128 : index
    %367 = memref.load %arg2[%c128] : memref<144xf32, #tpu.memory_space<smem>>
    %368 = vector.broadcast %367 : f32 to vector<1x16x16xf32>
    %369 = arith.mulf %368, %354 : vector<1x16x16xf32>
    %370 = arith.addf %353, %369 : vector<1x16x16xf32>
    %371 = vector.extract_strided_slice %319 {offsets = [0, 1, 0], sizes = [1, 16, 16], strides = [1, 1, 1]} : vector<1x18x18xf32> to vector<1x16x16xf32>
    %c21 = arith.constant 21 : index
    %372 = memref.load %arg2[%c21] : memref<144xf32, #tpu.memory_space<smem>>
    %373 = vector.broadcast %372 : f32 to vector<1x16x16xf32>
    %374 = arith.mulf %373, %371 : vector<1x16x16xf32>
    %375 = arith.addf %358, %374 : vector<1x16x16xf32>
    %c57 = arith.constant 57 : index
    %376 = memref.load %arg2[%c57] : memref<144xf32, #tpu.memory_space<smem>>
    %377 = vector.broadcast %376 : f32 to vector<1x16x16xf32>
    %378 = arith.mulf %377, %371 : vector<1x16x16xf32>
    %379 = arith.addf %362, %378 : vector<1x16x16xf32>
    %c93 = arith.constant 93 : index
    %380 = memref.load %arg2[%c93] : memref<144xf32, #tpu.memory_space<smem>>
    %381 = vector.broadcast %380 : f32 to vector<1x16x16xf32>
    %382 = arith.mulf %381, %371 : vector<1x16x16xf32>
    %383 = arith.addf %366, %382 : vector<1x16x16xf32>
    %c129 = arith.constant 129 : index
    %384 = memref.load %arg2[%c129] : memref<144xf32, #tpu.memory_space<smem>>
    %385 = vector.broadcast %384 : f32 to vector<1x16x16xf32>
    %386 = arith.mulf %385, %371 : vector<1x16x16xf32>
    %387 = arith.addf %370, %386 : vector<1x16x16xf32>
    %388 = vector.extract_strided_slice %319 {offsets = [0, 1, 1], sizes = [1, 16, 16], strides = [1, 1, 1]} : vector<1x18x18xf32> to vector<1x16x16xf32>
    %c22 = arith.constant 22 : index
    %389 = memref.load %arg2[%c22] : memref<144xf32, #tpu.memory_space<smem>>
    %390 = vector.broadcast %389 : f32 to vector<1x16x16xf32>
    %391 = arith.mulf %390, %388 : vector<1x16x16xf32>
    %392 = arith.addf %375, %391 : vector<1x16x16xf32>
    %c58 = arith.constant 58 : index
    %393 = memref.load %arg2[%c58] : memref<144xf32, #tpu.memory_space<smem>>
    %394 = vector.broadcast %393 : f32 to vector<1x16x16xf32>
    %395 = arith.mulf %394, %388 : vector<1x16x16xf32>
    %396 = arith.addf %379, %395 : vector<1x16x16xf32>
    %c94 = arith.constant 94 : index
    %397 = memref.load %arg2[%c94] : memref<144xf32, #tpu.memory_space<smem>>
    %398 = vector.broadcast %397 : f32 to vector<1x16x16xf32>
    %399 = arith.mulf %398, %388 : vector<1x16x16xf32>
    %400 = arith.addf %383, %399 : vector<1x16x16xf32>
    %c130 = arith.constant 130 : index
    %401 = memref.load %arg2[%c130] : memref<144xf32, #tpu.memory_space<smem>>
    %402 = vector.broadcast %401 : f32 to vector<1x16x16xf32>
    %403 = arith.mulf %402, %388 : vector<1x16x16xf32>
    %404 = arith.addf %387, %403 : vector<1x16x16xf32>
    %405 = vector.extract_strided_slice %319 {offsets = [0, 1, 2], sizes = [1, 16, 16], strides = [1, 1, 1]} : vector<1x18x18xf32> to vector<1x16x16xf32>
    %c23 = arith.constant 23 : index
    %406 = memref.load %arg2[%c23] : memref<144xf32, #tpu.memory_space<smem>>
    %407 = vector.broadcast %406 : f32 to vector<1x16x16xf32>
    %408 = arith.mulf %407, %405 : vector<1x16x16xf32>
    %409 = arith.addf %392, %408 : vector<1x16x16xf32>
    %c59 = arith.constant 59 : index
    %410 = memref.load %arg2[%c59] : memref<144xf32, #tpu.memory_space<smem>>
    %411 = vector.broadcast %410 : f32 to vector<1x16x16xf32>
    %412 = arith.mulf %411, %405 : vector<1x16x16xf32>
    %413 = arith.addf %396, %412 : vector<1x16x16xf32>
    %c95 = arith.constant 95 : index
    %414 = memref.load %arg2[%c95] : memref<144xf32, #tpu.memory_space<smem>>
    %415 = vector.broadcast %414 : f32 to vector<1x16x16xf32>
    %416 = arith.mulf %415, %405 : vector<1x16x16xf32>
    %417 = arith.addf %400, %416 : vector<1x16x16xf32>
    %c131 = arith.constant 131 : index
    %418 = memref.load %arg2[%c131] : memref<144xf32, #tpu.memory_space<smem>>
    %419 = vector.broadcast %418 : f32 to vector<1x16x16xf32>
    %420 = arith.mulf %419, %405 : vector<1x16x16xf32>
    %421 = arith.addf %404, %420 : vector<1x16x16xf32>
    %422 = vector.extract_strided_slice %319 {offsets = [0, 2, 0], sizes = [1, 16, 16], strides = [1, 1, 1]} : vector<1x18x18xf32> to vector<1x16x16xf32>
    %c24 = arith.constant 24 : index
    %423 = memref.load %arg2[%c24] : memref<144xf32, #tpu.memory_space<smem>>
    %424 = vector.broadcast %423 : f32 to vector<1x16x16xf32>
    %425 = arith.mulf %424, %422 : vector<1x16x16xf32>
    %426 = arith.addf %409, %425 : vector<1x16x16xf32>
    %c60 = arith.constant 60 : index
    %427 = memref.load %arg2[%c60] : memref<144xf32, #tpu.memory_space<smem>>
    %428 = vector.broadcast %427 : f32 to vector<1x16x16xf32>
    %429 = arith.mulf %428, %422 : vector<1x16x16xf32>
    %430 = arith.addf %413, %429 : vector<1x16x16xf32>
    %c96 = arith.constant 96 : index
    %431 = memref.load %arg2[%c96] : memref<144xf32, #tpu.memory_space<smem>>
    %432 = vector.broadcast %431 : f32 to vector<1x16x16xf32>
    %433 = arith.mulf %432, %422 : vector<1x16x16xf32>
    %434 = arith.addf %417, %433 : vector<1x16x16xf32>
    %c132 = arith.constant 132 : index
    %435 = memref.load %arg2[%c132] : memref<144xf32, #tpu.memory_space<smem>>
    %436 = vector.broadcast %435 : f32 to vector<1x16x16xf32>
    %437 = arith.mulf %436, %422 : vector<1x16x16xf32>
    %438 = arith.addf %421, %437 : vector<1x16x16xf32>
    %439 = vector.extract_strided_slice %319 {offsets = [0, 2, 1], sizes = [1, 16, 16], strides = [1, 1, 1]} : vector<1x18x18xf32> to vector<1x16x16xf32>
    %c25 = arith.constant 25 : index
    %440 = memref.load %arg2[%c25] : memref<144xf32, #tpu.memory_space<smem>>
    %441 = vector.broadcast %440 : f32 to vector<1x16x16xf32>
    %442 = arith.mulf %441, %439 : vector<1x16x16xf32>
    %443 = arith.addf %426, %442 : vector<1x16x16xf32>
    %c61 = arith.constant 61 : index
    %444 = memref.load %arg2[%c61] : memref<144xf32, #tpu.memory_space<smem>>
    %445 = vector.broadcast %444 : f32 to vector<1x16x16xf32>
    %446 = arith.mulf %445, %439 : vector<1x16x16xf32>
    %447 = arith.addf %430, %446 : vector<1x16x16xf32>
    %c97 = arith.constant 97 : index
    %448 = memref.load %arg2[%c97] : memref<144xf32, #tpu.memory_space<smem>>
    %449 = vector.broadcast %448 : f32 to vector<1x16x16xf32>
    %450 = arith.mulf %449, %439 : vector<1x16x16xf32>
    %451 = arith.addf %434, %450 : vector<1x16x16xf32>
    %c133 = arith.constant 133 : index
    %452 = memref.load %arg2[%c133] : memref<144xf32, #tpu.memory_space<smem>>
    %453 = vector.broadcast %452 : f32 to vector<1x16x16xf32>
    %454 = arith.mulf %453, %439 : vector<1x16x16xf32>
    %455 = arith.addf %438, %454 : vector<1x16x16xf32>
    %456 = vector.extract_strided_slice %319 {offsets = [0, 2, 2], sizes = [1, 16, 16], strides = [1, 1, 1]} : vector<1x18x18xf32> to vector<1x16x16xf32>
    %c26 = arith.constant 26 : index
    %457 = memref.load %arg2[%c26] : memref<144xf32, #tpu.memory_space<smem>>
    %458 = vector.broadcast %457 : f32 to vector<1x16x16xf32>
    %459 = arith.mulf %458, %456 : vector<1x16x16xf32>
    %460 = arith.addf %443, %459 : vector<1x16x16xf32>
    %c62 = arith.constant 62 : index
    %461 = memref.load %arg2[%c62] : memref<144xf32, #tpu.memory_space<smem>>
    %462 = vector.broadcast %461 : f32 to vector<1x16x16xf32>
    %463 = arith.mulf %462, %456 : vector<1x16x16xf32>
    %464 = arith.addf %447, %463 : vector<1x16x16xf32>
    %c98 = arith.constant 98 : index
    %465 = memref.load %arg2[%c98] : memref<144xf32, #tpu.memory_space<smem>>
    %466 = vector.broadcast %465 : f32 to vector<1x16x16xf32>
    %467 = arith.mulf %466, %456 : vector<1x16x16xf32>
    %468 = arith.addf %451, %467 : vector<1x16x16xf32>
    %c134 = arith.constant 134 : index
    %469 = memref.load %arg2[%c134] : memref<144xf32, #tpu.memory_space<smem>>
    %470 = vector.broadcast %469 : f32 to vector<1x16x16xf32>
    %471 = arith.mulf %470, %456 : vector<1x16x16xf32>
    %472 = arith.addf %455, %471 : vector<1x16x16xf32>
    %c0_28 = arith.constant 0 : index
    %c3_29 = arith.constant 3 : index
    %c0_30 = arith.constant 0 : index
    %c0_31 = arith.constant 0 : index
    %473 = vector.load %arg5[%c0_28, %c3_29, %c0_30, %c0_31] : memref<1x4x18x18xf32, #tpu.memory_space<vmem>>, vector<1x1x18x18xf32>
    %474 = vector.shape_cast %473 : vector<1x1x18x18xf32> to vector<1x18x18xf32>
    %475 = vector.extract_strided_slice %474 {offsets = [0, 0, 0], sizes = [1, 16, 16], strides = [1, 1, 1]} : vector<1x18x18xf32> to vector<1x16x16xf32>
    %c27 = arith.constant 27 : index
    %476 = memref.load %arg2[%c27] : memref<144xf32, #tpu.memory_space<smem>>
    %477 = vector.broadcast %476 : f32 to vector<1x16x16xf32>
    %478 = arith.mulf %477, %475 : vector<1x16x16xf32>
    %479 = arith.addf %460, %478 : vector<1x16x16xf32>
    %c63 = arith.constant 63 : index
    %480 = memref.load %arg2[%c63] : memref<144xf32, #tpu.memory_space<smem>>
    %481 = vector.broadcast %480 : f32 to vector<1x16x16xf32>
    %482 = arith.mulf %481, %475 : vector<1x16x16xf32>
    %483 = arith.addf %464, %482 : vector<1x16x16xf32>
    %c99 = arith.constant 99 : index
    %484 = memref.load %arg2[%c99] : memref<144xf32, #tpu.memory_space<smem>>
    %485 = vector.broadcast %484 : f32 to vector<1x16x16xf32>
    %486 = arith.mulf %485, %475 : vector<1x16x16xf32>
    %487 = arith.addf %468, %486 : vector<1x16x16xf32>
    %c135 = arith.constant 135 : index
    %488 = memref.load %arg2[%c135] : memref<144xf32, #tpu.memory_space<smem>>
    %489 = vector.broadcast %488 : f32 to vector<1x16x16xf32>
    %490 = arith.mulf %489, %475 : vector<1x16x16xf32>
    %491 = arith.addf %472, %490 : vector<1x16x16xf32>
    %492 = vector.extract_strided_slice %474 {offsets = [0, 0, 1], sizes = [1, 16, 16], strides = [1, 1, 1]} : vector<1x18x18xf32> to vector<1x16x16xf32>
    %c28 = arith.constant 28 : index
    %493 = memref.load %arg2[%c28] : memref<144xf32, #tpu.memory_space<smem>>
    %494 = vector.broadcast %493 : f32 to vector<1x16x16xf32>
    %495 = arith.mulf %494, %492 : vector<1x16x16xf32>
    %496 = arith.addf %479, %495 : vector<1x16x16xf32>
    %c64 = arith.constant 64 : index
    %497 = memref.load %arg2[%c64] : memref<144xf32, #tpu.memory_space<smem>>
    %498 = vector.broadcast %497 : f32 to vector<1x16x16xf32>
    %499 = arith.mulf %498, %492 : vector<1x16x16xf32>
    %500 = arith.addf %483, %499 : vector<1x16x16xf32>
    %c100 = arith.constant 100 : index
    %501 = memref.load %arg2[%c100] : memref<144xf32, #tpu.memory_space<smem>>
    %502 = vector.broadcast %501 : f32 to vector<1x16x16xf32>
    %503 = arith.mulf %502, %492 : vector<1x16x16xf32>
    %504 = arith.addf %487, %503 : vector<1x16x16xf32>
    %c136 = arith.constant 136 : index
    %505 = memref.load %arg2[%c136] : memref<144xf32, #tpu.memory_space<smem>>
    %506 = vector.broadcast %505 : f32 to vector<1x16x16xf32>
    %507 = arith.mulf %506, %492 : vector<1x16x16xf32>
    %508 = arith.addf %491, %507 : vector<1x16x16xf32>
    %509 = vector.extract_strided_slice %474 {offsets = [0, 0, 2], sizes = [1, 16, 16], strides = [1, 1, 1]} : vector<1x18x18xf32> to vector<1x16x16xf32>
    %c29 = arith.constant 29 : index
    %510 = memref.load %arg2[%c29] : memref<144xf32, #tpu.memory_space<smem>>
    %511 = vector.broadcast %510 : f32 to vector<1x16x16xf32>
    %512 = arith.mulf %511, %509 : vector<1x16x16xf32>
    %513 = arith.addf %496, %512 : vector<1x16x16xf32>
    %c65 = arith.constant 65 : index
    %514 = memref.load %arg2[%c65] : memref<144xf32, #tpu.memory_space<smem>>
    %515 = vector.broadcast %514 : f32 to vector<1x16x16xf32>
    %516 = arith.mulf %515, %509 : vector<1x16x16xf32>
    %517 = arith.addf %500, %516 : vector<1x16x16xf32>
    %c101 = arith.constant 101 : index
    %518 = memref.load %arg2[%c101] : memref<144xf32, #tpu.memory_space<smem>>
    %519 = vector.broadcast %518 : f32 to vector<1x16x16xf32>
    %520 = arith.mulf %519, %509 : vector<1x16x16xf32>
    %521 = arith.addf %504, %520 : vector<1x16x16xf32>
    %c137 = arith.constant 137 : index
    %522 = memref.load %arg2[%c137] : memref<144xf32, #tpu.memory_space<smem>>
    %523 = vector.broadcast %522 : f32 to vector<1x16x16xf32>
    %524 = arith.mulf %523, %509 : vector<1x16x16xf32>
    %525 = arith.addf %508, %524 : vector<1x16x16xf32>
    %526 = vector.extract_strided_slice %474 {offsets = [0, 1, 0], sizes = [1, 16, 16], strides = [1, 1, 1]} : vector<1x18x18xf32> to vector<1x16x16xf32>
    %c30 = arith.constant 30 : index
    %527 = memref.load %arg2[%c30] : memref<144xf32, #tpu.memory_space<smem>>
    %528 = vector.broadcast %527 : f32 to vector<1x16x16xf32>
    %529 = arith.mulf %528, %526 : vector<1x16x16xf32>
    %530 = arith.addf %513, %529 : vector<1x16x16xf32>
    %c66 = arith.constant 66 : index
    %531 = memref.load %arg2[%c66] : memref<144xf32, #tpu.memory_space<smem>>
    %532 = vector.broadcast %531 : f32 to vector<1x16x16xf32>
    %533 = arith.mulf %532, %526 : vector<1x16x16xf32>
    %534 = arith.addf %517, %533 : vector<1x16x16xf32>
    %c102 = arith.constant 102 : index
    %535 = memref.load %arg2[%c102] : memref<144xf32, #tpu.memory_space<smem>>
    %536 = vector.broadcast %535 : f32 to vector<1x16x16xf32>
    %537 = arith.mulf %536, %526 : vector<1x16x16xf32>
    %538 = arith.addf %521, %537 : vector<1x16x16xf32>
    %c138 = arith.constant 138 : index
    %539 = memref.load %arg2[%c138] : memref<144xf32, #tpu.memory_space<smem>>
    %540 = vector.broadcast %539 : f32 to vector<1x16x16xf32>
    %541 = arith.mulf %540, %526 : vector<1x16x16xf32>
    %542 = arith.addf %525, %541 : vector<1x16x16xf32>
    %543 = vector.extract_strided_slice %474 {offsets = [0, 1, 1], sizes = [1, 16, 16], strides = [1, 1, 1]} : vector<1x18x18xf32> to vector<1x16x16xf32>
    %c31 = arith.constant 31 : index
    %544 = memref.load %arg2[%c31] : memref<144xf32, #tpu.memory_space<smem>>
    %545 = vector.broadcast %544 : f32 to vector<1x16x16xf32>
    %546 = arith.mulf %545, %543 : vector<1x16x16xf32>
    %547 = arith.addf %530, %546 : vector<1x16x16xf32>
    %c67 = arith.constant 67 : index
    %548 = memref.load %arg2[%c67] : memref<144xf32, #tpu.memory_space<smem>>
    %549 = vector.broadcast %548 : f32 to vector<1x16x16xf32>
    %550 = arith.mulf %549, %543 : vector<1x16x16xf32>
    %551 = arith.addf %534, %550 : vector<1x16x16xf32>
    %c103 = arith.constant 103 : index
    %552 = memref.load %arg2[%c103] : memref<144xf32, #tpu.memory_space<smem>>
    %553 = vector.broadcast %552 : f32 to vector<1x16x16xf32>
    %554 = arith.mulf %553, %543 : vector<1x16x16xf32>
    %555 = arith.addf %538, %554 : vector<1x16x16xf32>
    %c139 = arith.constant 139 : index
    %556 = memref.load %arg2[%c139] : memref<144xf32, #tpu.memory_space<smem>>
    %557 = vector.broadcast %556 : f32 to vector<1x16x16xf32>
    %558 = arith.mulf %557, %543 : vector<1x16x16xf32>
    %559 = arith.addf %542, %558 : vector<1x16x16xf32>
    %560 = vector.extract_strided_slice %474 {offsets = [0, 1, 2], sizes = [1, 16, 16], strides = [1, 1, 1]} : vector<1x18x18xf32> to vector<1x16x16xf32>
    %c32 = arith.constant 32 : index
    %561 = memref.load %arg2[%c32] : memref<144xf32, #tpu.memory_space<smem>>
    %562 = vector.broadcast %561 : f32 to vector<1x16x16xf32>
    %563 = arith.mulf %562, %560 : vector<1x16x16xf32>
    %564 = arith.addf %547, %563 : vector<1x16x16xf32>
    %c68 = arith.constant 68 : index
    %565 = memref.load %arg2[%c68] : memref<144xf32, #tpu.memory_space<smem>>
    %566 = vector.broadcast %565 : f32 to vector<1x16x16xf32>
    %567 = arith.mulf %566, %560 : vector<1x16x16xf32>
    %568 = arith.addf %551, %567 : vector<1x16x16xf32>
    %c104 = arith.constant 104 : index
    %569 = memref.load %arg2[%c104] : memref<144xf32, #tpu.memory_space<smem>>
    %570 = vector.broadcast %569 : f32 to vector<1x16x16xf32>
    %571 = arith.mulf %570, %560 : vector<1x16x16xf32>
    %572 = arith.addf %555, %571 : vector<1x16x16xf32>
    %c140 = arith.constant 140 : index
    %573 = memref.load %arg2[%c140] : memref<144xf32, #tpu.memory_space<smem>>
    %574 = vector.broadcast %573 : f32 to vector<1x16x16xf32>
    %575 = arith.mulf %574, %560 : vector<1x16x16xf32>
    %576 = arith.addf %559, %575 : vector<1x16x16xf32>
    %577 = vector.extract_strided_slice %474 {offsets = [0, 2, 0], sizes = [1, 16, 16], strides = [1, 1, 1]} : vector<1x18x18xf32> to vector<1x16x16xf32>
    %c33 = arith.constant 33 : index
    %578 = memref.load %arg2[%c33] : memref<144xf32, #tpu.memory_space<smem>>
    %579 = vector.broadcast %578 : f32 to vector<1x16x16xf32>
    %580 = arith.mulf %579, %577 : vector<1x16x16xf32>
    %581 = arith.addf %564, %580 : vector<1x16x16xf32>
    %c69 = arith.constant 69 : index
    %582 = memref.load %arg2[%c69] : memref<144xf32, #tpu.memory_space<smem>>
    %583 = vector.broadcast %582 : f32 to vector<1x16x16xf32>
    %584 = arith.mulf %583, %577 : vector<1x16x16xf32>
    %585 = arith.addf %568, %584 : vector<1x16x16xf32>
    %c105 = arith.constant 105 : index
    %586 = memref.load %arg2[%c105] : memref<144xf32, #tpu.memory_space<smem>>
    %587 = vector.broadcast %586 : f32 to vector<1x16x16xf32>
    %588 = arith.mulf %587, %577 : vector<1x16x16xf32>
    %589 = arith.addf %572, %588 : vector<1x16x16xf32>
    %c141 = arith.constant 141 : index
    %590 = memref.load %arg2[%c141] : memref<144xf32, #tpu.memory_space<smem>>
    %591 = vector.broadcast %590 : f32 to vector<1x16x16xf32>
    %592 = arith.mulf %591, %577 : vector<1x16x16xf32>
    %593 = arith.addf %576, %592 : vector<1x16x16xf32>
    %594 = vector.extract_strided_slice %474 {offsets = [0, 2, 1], sizes = [1, 16, 16], strides = [1, 1, 1]} : vector<1x18x18xf32> to vector<1x16x16xf32>
    %c34 = arith.constant 34 : index
    %595 = memref.load %arg2[%c34] : memref<144xf32, #tpu.memory_space<smem>>
    %596 = vector.broadcast %595 : f32 to vector<1x16x16xf32>
    %597 = arith.mulf %596, %594 : vector<1x16x16xf32>
    %598 = arith.addf %581, %597 : vector<1x16x16xf32>
    %c70 = arith.constant 70 : index
    %599 = memref.load %arg2[%c70] : memref<144xf32, #tpu.memory_space<smem>>
    %600 = vector.broadcast %599 : f32 to vector<1x16x16xf32>
    %601 = arith.mulf %600, %594 : vector<1x16x16xf32>
    %602 = arith.addf %585, %601 : vector<1x16x16xf32>
    %c106 = arith.constant 106 : index
    %603 = memref.load %arg2[%c106] : memref<144xf32, #tpu.memory_space<smem>>
    %604 = vector.broadcast %603 : f32 to vector<1x16x16xf32>
    %605 = arith.mulf %604, %594 : vector<1x16x16xf32>
    %606 = arith.addf %589, %605 : vector<1x16x16xf32>
    %c142 = arith.constant 142 : index
    %607 = memref.load %arg2[%c142] : memref<144xf32, #tpu.memory_space<smem>>
    %608 = vector.broadcast %607 : f32 to vector<1x16x16xf32>
    %609 = arith.mulf %608, %594 : vector<1x16x16xf32>
    %610 = arith.addf %593, %609 : vector<1x16x16xf32>
    %611 = vector.extract_strided_slice %474 {offsets = [0, 2, 2], sizes = [1, 16, 16], strides = [1, 1, 1]} : vector<1x18x18xf32> to vector<1x16x16xf32>
    %c35 = arith.constant 35 : index
    %612 = memref.load %arg2[%c35] : memref<144xf32, #tpu.memory_space<smem>>
    %613 = vector.broadcast %612 : f32 to vector<1x16x16xf32>
    %614 = arith.mulf %613, %611 : vector<1x16x16xf32>
    %615 = arith.addf %598, %614 : vector<1x16x16xf32>
    %c71 = arith.constant 71 : index
    %616 = memref.load %arg2[%c71] : memref<144xf32, #tpu.memory_space<smem>>
    %617 = vector.broadcast %616 : f32 to vector<1x16x16xf32>
    %618 = arith.mulf %617, %611 : vector<1x16x16xf32>
    %619 = arith.addf %602, %618 : vector<1x16x16xf32>
    %c107 = arith.constant 107 : index
    %620 = memref.load %arg2[%c107] : memref<144xf32, #tpu.memory_space<smem>>
    %621 = vector.broadcast %620 : f32 to vector<1x16x16xf32>
    %622 = arith.mulf %621, %611 : vector<1x16x16xf32>
    %623 = arith.addf %606, %622 : vector<1x16x16xf32>
    %c143 = arith.constant 143 : index
    %624 = memref.load %arg2[%c143] : memref<144xf32, #tpu.memory_space<smem>>
    %625 = vector.broadcast %624 : f32 to vector<1x16x16xf32>
    %626 = arith.mulf %625, %611 : vector<1x16x16xf32>
    %627 = arith.addf %610, %626 : vector<1x16x16xf32>
    %c0_32 = arith.constant 0 : index
    %628 = memref.load %arg3[%c0_32] : memref<4xf32, #tpu.memory_space<smem>>
    %629 = vector.broadcast %628 : f32 to vector<1x16x16xf32>
    %630 = arith.addf %615, %629 : vector<1x16x16xf32>
    %c0_33 = arith.constant 0 : index
    %c0_34 = arith.constant 0 : index
    %c0_35 = arith.constant 0 : index
    %c0_36 = arith.constant 0 : index
    %631 = vector.load %arg4[%c0_33, %c0_34, %c0_35, %c0_36] : memref<1x4x16x16xf32, #tpu.memory_space<vmem>>, vector<1x1x16x16xf32>
    %632 = vector.shape_cast %631 : vector<1x1x16x16xf32> to vector<1x16x16xf32>
    %633 = vector.shape_cast %630 : vector<1x16x16xf32> to vector<1x1x16x16xf32>
    tpu.vector_store %arg4[%c0_33, %c0_34, %c0_35, %c0_36], %633 {strides = array<i32>} : memref<1x4x16x16xf32, #tpu.memory_space<vmem>>, vector<1x1x16x16xf32>,
    %c1_37 = arith.constant 1 : index
    %634 = memref.load %arg3[%c1_37] : memref<4xf32, #tpu.memory_space<smem>>
    %635 = vector.broadcast %634 : f32 to vector<1x16x16xf32>
    %636 = arith.addf %619, %635 : vector<1x16x16xf32>
    %c0_38 = arith.constant 0 : index
    %c1_39 = arith.constant 1 : index
    %c0_40 = arith.constant 0 : index
    %c0_41 = arith.constant 0 : index
    %637 = vector.load %arg4[%c0_38, %c1_39, %c0_40, %c0_41] : memref<1x4x16x16xf32, #tpu.memory_space<vmem>>, vector<1x1x16x16xf32>
    %638 = vector.shape_cast %637 : vector<1x1x16x16xf32> to vector<1x16x16xf32>
    %639 = vector.shape_cast %636 : vector<1x16x16xf32> to vector<1x1x16x16xf32>
    tpu.vector_store %arg4[%c0_38, %c1_39, %c0_40, %c0_41], %639 {strides = array<i32>} : memref<1x4x16x16xf32, #tpu.memory_space<vmem>>, vector<1x1x16x16xf32>,
    %c2_42 = arith.constant 2 : index
    %640 = memref.load %arg3[%c2_42] : memref<4xf32, #tpu.memory_space<smem>>
    %641 = vector.broadcast %640 : f32 to vector<1x16x16xf32>
    %642 = arith.addf %623, %641 : vector<1x16x16xf32>
    %c0_43 = arith.constant 0 : index
    %c2_44 = arith.constant 2 : index
    %c0_45 = arith.constant 0 : index
    %c0_46 = arith.constant 0 : index
    %643 = vector.load %arg4[%c0_43, %c2_44, %c0_45, %c0_46] : memref<1x4x16x16xf32, #tpu.memory_space<vmem>>, vector<1x1x16x16xf32>
    %644 = vector.shape_cast %643 : vector<1x1x16x16xf32> to vector<1x16x16xf32>
    %645 = vector.shape_cast %642 : vector<1x16x16xf32> to vector<1x1x16x16xf32>
    tpu.vector_store %arg4[%c0_43, %c2_44, %c0_45, %c0_46], %645 {strides = array<i32>} : memref<1x4x16x16xf32, #tpu.memory_space<vmem>>, vector<1x1x16x16xf32>,
    %c3_47 = arith.constant 3 : index
    %646 = memref.load %arg3[%c3_47] : memref<4xf32, #tpu.memory_space<smem>>
    %647 = vector.broadcast %646 : f32 to vector<1x16x16xf32>
    %648 = arith.addf %627, %647 : vector<1x16x16xf32>
    %c0_48 = arith.constant 0 : index
    %c3_49 = arith.constant 3 : index
    %c0_50 = arith.constant 0 : index
    %c0_51 = arith.constant 0 : index
    %649 = vector.load %arg4[%c0_48, %c3_49, %c0_50, %c0_51] : memref<1x4x16x16xf32, #tpu.memory_space<vmem>>, vector<1x1x16x16xf32>
    %650 = vector.shape_cast %649 : vector<1x1x16x16xf32> to vector<1x16x16xf32>
    %651 = vector.shape_cast %648 : vector<1x16x16xf32> to vector<1x1x16x16xf32>
    tpu.vector_store %arg4[%c0_48, %c3_49, %c0_50, %c0_51], %651 {strides = array<i32>} : memref<1x4x16x16xf32, #tpu.memory_space<vmem>>, vector<1x1x16x16xf32>,
    return
  }
  func.func @transform_0(%arg0: i32) -> (i32, i32, i32, i32) {
    %c0_i32 = arith.constant 0 : i32
    %c0_i32_0 = arith.constant 0 : i32
    %c0_i32_1 = arith.constant 0 : i32
    %c0_i32_2 = arith.constant 0 : i32
    return %arg0, %c0_i32, %c0_i32_0, %c0_i32_1 : i32, i32, i32, i32
  }
  func.func @transform_1(%arg0: i32) -> i32 {
    %c0_i32 = arith.constant 0 : i32
    %c0_i32_0 = arith.constant 0 : i32
    return %c0_i32 : i32
  }
  func.func @transform_2(%arg0: i32) -> i32 {
    %c0_i32 = arith.constant 0 : i32
    %c0_i32_0 = arith.constant 0 : i32
    return %c0_i32 : i32
  }
  func.func @transform_3(%arg0: i32) -> (i32, i32, i32, i32) {
    %c0_i32 = arith.constant 0 : i32
    %c0_i32_0 = arith.constant 0 : i32
    %c0_i32_1 = arith.constant 0 : i32
    %c0_i32_2 = arith.constant 0 : i32
    return %arg0, %c0_i32, %c0_i32_0, %c0_i32_1 : i32, i32, i32, i32
  }
}

</mosaic_0001>

<bundles_post_ra>
// kernel: tpu_custom_call.1
= control target key start
LH: loop header
LB: loop body
LE: loop exit
PB: predicated region body
PF: predicated region fallthrough
CT: control target
= control target key end

     0   :  { %s5380_s0 = inlined_call_operand.hbm [shape: f32[2,4,16,16], index: 0, kind: input, shape index: {}]   ;;  %s5381_s1 = inlined_call_operand.hbm [shape: f32[144], index: 1, kind: input, shape index: {}]   ;;  %s5382_s2 = inlined_call_operand.vmem [shape: f32[4], index: 2, kind: input, shape index: {}]   ;;  %s5383_s3 = inlined_call_operand.hbm [shape: f32[2,4,16,16], index: 3, kind: output, shape index: {}]  }
   0x1   :  { %5391 = sst [smem:[#allocation15_spill]] %s5380_s0 }
   0x2   :  { %5392 = sst [smem:[#allocation16_spill]] %s5381_s1 }
   0x3   :  { %8 = vsyncpa [#allocation4], 0 }
   0x4   :  { %10 = vsyncpa [#allocation4 + $0x1], 0 }
   0x5   :  { %11 = vsyncpa [#allocation6], 0 }
   0x6   :  { %12 = vsyncpa [#allocation7], 0 }
   0x7   :  { %13 = vsyncpa [#allocation5], 0 }
   0x8   :  { %15 = vsyncpa [#allocation5 + $0x1], 0  ;;  %s3293_s12 = smov 0   ;;  %s3295_s13 = smov 0  }
   0x9   :  { %s3297_s14 = smov 0   ;;  %s3299_s15 = smov 0  }
   0xa LB: > { %s3314_s16 = sadd.s32 4294967295, %s3261_s15   ;;  %s2871_s17 = sadd.s32 4294967294, %s3261_s15   ;;  %s3261_s15 = sphi %s3299_s15, %s5414_s15   ;;  %s3257_s14 = sphi %s3297_s14, %s5413_s14   ;;  %s3253_s13 = sphi %s3295_s13, %s5412_s13   ;;  %s3249_s12 = sphi %s3293_s12, %s5411_s12  }
   0xb   : > { %s3318_s18 = sadd.s32 1, %s3261_s15   ;;  %s28_s19 = sadd.s32 1, %s3257_s14 }
   0xc   : > { %s25_s20 = ssub.s32 %s3261_s15, %s3318_s18  ;;  %p35_p0 = scmp.ne.s32.totalorder %s3257_s14, %s3253_s13 }
   0xd   : > { %p26_p1 = scmp.eq.s32.totalorder %s25_s20, 0  ;;  %p36_p2 = scmp.eq.s32.totalorder %s3261_s15, 0 }
   0xe   : > { %p41_p3 = scmp.ne.s32.totalorder %s3253_s13, %s3249_s12  ;;  %p42_p4 = scmp.eq.s32.totalorder %s3314_s16, 0 }
   0xf   : > { %s3330_s21 = scalar_select %p26_p1, %s3257_s14, %s28_s19  }
  0x10   : > { %p3332_p5 = por %p36_p2, %p35_p0  ;;  %p3338_p6 = por %p42_p4, %p41_p3 }
  0x11   : > { %p107_p7 = scmp.eq.s32.totalorder %s3314_s16, 1  ;;  %p113_p8 = scmp.eq.s32.totalorder %s2871_s17, 1 }
  0x12   : > { %p2872_p9 = scmp.ge.s32.totalorder %s3261_s15, 1  ;;  %p120_p10 = scmp.lt.s32.totalorder %s3261_s15, 3 }
  0x13   : > { %p3345_p11 = por %p107_p7, %p35_p0  ;;  %p3349_p12 = por %p113_p8, %p41_p3 }
  0x14   : > { %p3353_p13 = pnand %p2872_p9, %p120_p10  ;;  %s5398_s1 = sld [smem:[#allocation16_spill]] }
  0x15   : > { %p3072_p2 = scmp.lt.s32.totalorder %s3261_s15, 2  ;;  %s142_s5 = sshll.u32 %s5382_s2, 4  ;;  %s143_s5 = int_to_ptr.vmem [resolvable:$true] %s142_s5 }
  0x16   : > { %p3055_p1 = pneg %p3353_p13  ;;  %s3263_s7 = smov [#allocation8]  }
  0x17   : > { %p3371_p7 = pnand %p3072_p2, %p3332_p5  ;;  %s153_s8 = sand.u32 1, %s3257_s14  }
  0x18   : > { %p3056_p3 = pnand %p3055_p1, %p42_p4  ;;  %s3264_s9 = smov [#allocation9]  }
  0x19   : > { %s2876_s10 = sshll.u32 %s153_s8, 6  ;;  %s3041_s11 = sshll.u32 %s3261_s15, 6 }
  0x1a   : > { %s132_s29 = sshll.u32 %s5398_s1, 4  ;;  %s5400_s0 = sld [smem:[#allocation15_spill]]  ;;  %s133_s29 = int_to_ptr.hbm [resolvable:$true] %s132_s29 }
  0x1b   : > { %3058 = dma.hbm_to_smem (!%p3056_p3), %s133_s29, 32, %s3263_s7, [#allocation6]  }
  0x1c   : > { %3061 = dma.vmem_to_smem (!%p3056_p3), %s143_s5, 16, %s3264_s9, [#allocation7]  }
  0x1d   : > { %s157_s27 = scalar_lea.vmem [#allocation3], %s2876_s10  ;;  %s154_s30 = scalar_lea.sflag [#allocation4], %s153_s8 }
  0x1e   : > { %s165_s28 = sshll.u32 %s157_s27, 4  ;;  %p3161_p8 = pneg %p3371_p7  ;;  %s166_s28 = int_to_ptr.vmem [resolvable:$true] %s165_s28 }
  0x20   : > { %s162_s20 = scalar_lea.hbm %s5400_s0, %s3041_s11  ;;  %s3164_s7 = scalar_lea.hbm %s5400_s0, 128 }
  0x21   : > { %s163_s22 = sshll.u32 %s162_s20, 4  ;;  %s164_s22 = int_to_ptr.hbm [resolvable:$true] %s163_s22 }
  0x22   : > { %s3157_s4 = sshra.s32 %s164_s22, 4  ;;  %s3158_s4 = int_to_ptr.hbm [resolvable:$true] %s3157_s4 }
  0x23   : > { %s3159_s1 = scalar_lea.hbm %s3158_s4, 64  ;;  %p3165_p1 = scmp.lt.s32.totalorder %s3158_s4, %s5400_s0 }
  0x24   : > { %p3160_p5 = scmp.ne.s32.totalorder %s3158_s4, %s3159_s1  ;;  %p3166_p2 = scmp.lt.s32.totalorder %s3164_s7, %s3159_s1 }
  0x26   : > { %p3162_p9 = pnand %p3161_p8, %p3160_p5  ;;  %p3167_p3 = por %p3166_p2, %p3165_p1 }
  0x28   : > { %p3163_p10 = pneg %p3162_p9 }
  0x2a   : > { %p3168_p0 = pnand %p3167_p3, %p3163_p10 }
  0x2c   : > { %3171 = shalt.err (!%p3168_p0)
}
  0x2d   : > { %s3265_s8 = smov 128   ;;  %s3266_s10 = smov 8  }
  0x2e   : > { %3065 = dma.hbm_to_vmem [thread:$0]  (!%p3371_p7), %s164_s22, 1024, %s166_s28, %s154_s30, %s3265_s8, %s3265_s8, %s3266_s10  }
  0x2f   : > { %177 = sbr.rel (%p3353_p13) target bundleno = 820 (0x334), region = 32  ;;  %s3393_s17 = sand.u32 (!%p3353_p13), 1, %s3253_s13  }
  0x30   : > { %s5384_s19 = sshll.u32 (!%p3353_p13), %s3393_s17, 6  ;;  %s180_s1 = scalar_lea.sflag (!%p3353_p13), [#allocation4], %s3393_s17 }
  0x31   : > { %s3399_s20 = scalar_lea.vmem (!%p3353_p13), [#allocation3], %s5384_s19 }
  0x34   : > { %3232 = dma.done.wait (%p3338_p6), %s180_s1, 1024  }
  0x35   : > { %3234 = vsyncadd (%p3338_p6), %s180_s1, 4294966272 }
  0x36   : > { %3236 = dma.done.wait (%p42_p4), [#allocation6], 32  }
  0x37   : > { %3238 = vsyncadd (%p42_p4), [#allocation6], 4294967264 }
  0x38   : > { %3240 = dma.done.wait (%p42_p4), [#allocation7], 16  }
  0x39   : > { %3242 = vsyncadd (%p42_p4), [#allocation7], 4294967280 }
  0x3a   : > { %199 = sfence }
  0x3b   : > { %v232_v0 = vld [vmem:[%s3399_s20] sm:$0xff]  ;;  %v234_v1 = vld [vmem:[%s3399_s20 + $0x10] sm:$0xff]  ;;  %s3267_s23 = smov 1   ;;  %v233_v3 = vld [vmem:[%s3399_s20 + $0x8] sm:$0xff]  ;;  %vm218_vm0 = vcmask 146432   ;;  %v3268_v5 = vmov 0.0  }
  0x3c   : > { %248 = vrot.lane.b32.xlu0 %v232_v0, %s3267_s23  ;;  %252 = vrot.lane.b32.xlu1 %v234_v1, %s3267_s23  ;;  %v236_v2 = vld [vmem:[%s3399_s20 + $0x20] sm:$0xff]  ;;  %v235_v4 = vld [vmem:[%s3399_s20 + $0x18] sm:$0xff]  ;;  %219 = vst.msk [vmem:[#allocation2] sm:$0xff] %vm218_vm0, %v3268_v5  ;;  %vm221_vm1 = vcmask 140288   ;;  %s3421_s26 = sld [smem:[#allocation8 + $0x25]]  ;;  %vm272_vm2 = vcmask 138248  }
  0x3d   : > { %256 = vrot.lane.b32.xlu2 %v236_v2, %s3267_s23  ;;  %220 = vst.msk [vmem:[#allocation2 + $0x8] sm:$0xff] %vm218_vm0, %v3268_v5  ;;  %v237_v6 = vld [vmem:[%s3399_s20 + $0x28] sm:$0xff]  ;;  %v239_v7 = vld [vmem:[%s3399_s20 + $0x38] sm:$0xff]  ;;  %v238_v8 = vld [vmem:[%s3399_s20 + $0x30] sm:$0xff]  ;;  %s3423_s6 = sld [smem:[#allocation8 + $0x1]]  ;;  %s5385_s20 = smov 127  }
  0x3e   : > { %223 = vst.msk [vmem:[#allocation2 + $0x18] sm:$0xff] %vm218_vm0, %v3268_v5  ;;  %s3425_s27 = sld [smem:[#allocation8 + $0x49]]  ;;  %vm428_vm3 = vcmask 1046528   ;;  %vm665_vm4 = vcmask 1045504   ;;  %vm2734_vm5 = vcmask 130048  }
  0x3f   : > { %224 = vst.msk [vmem:[#allocation2 + $0x20] sm:$0xff] %vm218_vm0, %v3268_v5  ;;  %s3427_s28 = sld [smem:[#allocation8 + $0x2]] }
  0x40   : > { %226 = vst.msk [vmem:[#allocation2 + $0x30] sm:$0xff] %vm218_vm0, %v3268_v5  ;;  %s3429_s22 = sld [smem:[#allocation8 + $0x6d]] }
  0x41   : > { %227 = vst.msk [vmem:[#allocation2 + $0x38] sm:$0xff] %vm218_vm0, %v3268_v5  ;;  %s3432_s30 = sld [smem:[#allocation8 + $0x26]] }
  0x42   : > { %229 = vst.msk [vmem:[#allocation2 + $0x48] sm:$0xff] %vm218_vm0, %v3268_v5  ;;  %s3434_s4 = sld [smem:[#allocation8 + $0x6e]]  ;;  %v323_v10 = vstv %s3421_s26 }
  0x43   : > { %230 = vst.msk [vmem:[#allocation2 + $0x50] sm:$0xff] %vm218_vm0, %v3268_v5  ;;  %s3436_s29 = sld [smem:[#allocation8 + $0x4a]]  ;;  %v309_v11 = vstv %s3423_s6 }
  0x44   : > { %250 = vrot.lane.b32.xlu0 %v233_v3, %s3267_s23  ;;  %254 = vrot.lane.b32.xlu1 %v235_v4, %s3267_s23  ;;  %222 = vst.msk [vmem:[#allocation2 + $0x10] sm:$0x3] %vm221_vm1, %v3268_v5  ;;  %s3438_s5 = sld [smem:[#allocation8 + $0x4]]  ;;  %v337_v17 = vstv %s3425_s27  ;;  %s5401_s27 = smov 127  }
  0x45   : > { %258 = vrot.lane.b32.xlu2 %v237_v6, %s3267_s23  ;;  %225 = vst.msk [vmem:[#allocation2 + $0x28] sm:$0x3] %vm221_vm1, %v3268_v5  ;;  %s3440_s7 = sld [smem:[#allocation8 + $0x4c]]  ;;  %v365_v18 = vstv %s3427_s28 }
  0x46   : > { %228 = vst.msk [vmem:[#allocation2 + $0x40] sm:$0x3] %vm221_vm1, %v3268_v5  ;;  %s3444_s9 = sld [smem:[#allocation8 + $0x28]]  ;;  %v351_v19 = vstv %s3429_s22 }
  0x47   : > { %231 = vst.msk [vmem:[#allocation2 + $0x58] sm:$0x3] %vm221_vm1, %v3268_v5  ;;  %s3446_s11 = sld [smem:[#allocation8 + $0x70]]  ;;  %v379_v23 = vstv %s3432_s30 }
  0x48   : > { %s3450_s8 = sld [smem:[#allocation8 + $0x7]]  ;;  %v407_v24 = vstv %s3434_s4 }
  0x49   : > { %s3455_s10 = sld [smem:[#allocation8 + $0x71]]  ;;  %v393_v25 = vstv %s3436_s29 }
  0x4a   : > { %s3457_s1 = sld [smem:[#allocation8 + $0x2b]]  ;;  %v490_v26 = vstv %s3438_s5 }
  0x4b   : > { %s3461_s26 = sld [smem:[#allocation8 + $0x4f]]  ;;  %v3484_v27 = vstv %s3440_s7 }
  0x4c   : > { %262 = vrot.lane.b32.xlu1 %v239_v7, %s3267_s23  ;;  %260 = vrot.lane.b32.xlu0 %v238_v8, %s3267_s23  ;;  %s2914_s23 = sld [smem:[#allocation8 + $0x73]]  ;;  %v511_v28 = vstv %s3444_s9 }
  0x4d   : > { %s3463_s6 = sld [smem:[#allocation8 + $0x8]]  ;;  %v3490_v29 = vstv %s3446_s11 }
  0x4e   : > { %s3465_s19 = sld [smem:[#allocation8 + $0x50]]  ;;  %v3494_v30 = vstv %s3450_s8 }
  0x4f   : > { %s3467_s0 = sld [smem:[#allocation8 + $0x2c]]  ;;  %v3497_v31 = vstv %s3455_s10 }
  0x50   : > { %v3500_v32 = vstv %s3457_s1  ;;  %s3664_s28 = sld [smem:[#allocation8 + $0x4b]] }
  0x51   : > { %v3515_v37 = vstv %s3461_s26  ;;  %s3676_s22 = sld [smem:[#allocation8 + $0x3]] }
  0x52   : > { %v3509_v35 = vstv %s2914_s23  ;;  %s3716_s30 = sld [smem:[#allocation8 + $0x6f]] }
  0x53   : > { %v3518_v38 = vstv %s3463_s6  ;;  %s3733_s4 = sld [smem:[#allocation8 + $0x6]] }
  0x54   : > { %v3521_v39 = vstv %s3465_s19  ;;  %s3658_s19 = sld [smem:[#allocation8 + $0x27]] }
  0x55   : > { %v3528_v43 = vstv %s3467_s0  ;;  %s3270_s0 = smov 126   ;;  %s3746_s29 = sld [smem:[#allocation8 + $0x4e]] }
  0x56   : > { %s3754_s5 = sld [smem:[#allocation8 + $0x72]] }
  0x57   : > { %s3770_s7 = sld [smem:[#allocation8 + $0x2a]] }
  0x58   : > { %s3783_s9 = sld [smem:[#allocation8 + $0x29]] }
  0x59   : > { %s3794_s11 = sld [smem:[#allocation8 + $0x5]] }
  0x5a   : > { %s2905_s8 = sld [smem:[#allocation8 + $0x4d]] }
  0x5b   : > { %s284_s10 = sld [smem:[#allocation8]] }
  0x5c   : > { %s3939_s1 = sld [smem:[#allocation8 + $0x2e]] }
  0x5d   : > { %s3943_s23 = sld [smem:[#allocation8 + $0x48]] }
  0x5e   : > { %s3957_s26 = sld [smem:[#allocation8 + $0x52]] }
  0x5f   : > { %s3960_s6 = sld [smem:[#allocation8 + $0x24]] }
  0xae   : > { %v249_v9 = vpop.permute.xlu0 %248 }
  0xaf   : > { %273 = vst.msk [vmem:[#allocation2 + $0x1] sm:$0xff] %vm272_vm2, %v249_v9 }
  0xb6   : > { %v3448_v12 = vld [vmem:[#allocation2] sm:$0xff]  ;;  %v251_v13 = vpop.permute.xlu0 %250 }
  0xb7   : > { %274 = vst.msk [vmem:[#allocation2 + $0x9] sm:$0xff] %vm272_vm2, %v251_v13  ;;  %v324_v14 = vmul.f32 %v323_v10, %v3448_v12  ;;  %v310_v15 = vmul.f32 %v309_v11, %v3448_v12  ;;  %v3503_v33 = vmul.f32 %v490_v26, %v3448_v12  ;;  %v3507_v34 = vmul.f32 %v3484_v27, %v3448_v12 }
  0xb8   : > { %v3512_v36 = vmul.f32 %v511_v28, %v3448_v12  ;;  %v338_v40 = vmul.f32 %v337_v17, %v3448_v12  ;;  %v366_v41 = vmul.f32 %v365_v18, %v3448_v12  ;;  %v728_v42 = vmul.f32 %v3494_v30, %v3448_v12 }
  0xb9   : > { %328 = vrot.lane.b32.xlu1 %v324_v14, %s5385_s20  ;;  %314 = vrot.lane.b32.xlu2 %v310_v15, %s5385_s20  ;;  %s3478_s20 = sld [smem:[#allocation8 + $0x74]]  ;;  %v352_v44 = vmul.f32 %v351_v19, %v3448_v12  ;;  %v3532_v45 = vmul.f32 %v379_v23, %v3448_v12  ;;  %v3535_v46 = vmul.f32 %v407_v24, %v3448_v12  ;;  %v497_v49 = vrot.slane %v3503_v33, 1 }
  0xba   : > { %v3538_v47 = vmul.f32 %v393_v25, %v3448_v12  ;;  %v539_v50 = vrot.slane %v3507_v34, 1  ;;  %v638_v51 = vmul.f32 %v3497_v31, %v3448_v12  ;;  %v518_v54 = vrot.slane %v3512_v36, 1 }
  0xbb   : > { %v749_v55 = vmul.f32 %v3500_v32, %v3448_v12  ;;  %v791_v56 = vmul.f32 %v3509_v35, %v3448_v12  ;;  %v734_v58 = vrot.slane %v728_v42, 2  ;;  %v770_v60 = vmul.f32 %v3515_v37, %v3448_v12 }
  0xbc   : > { %v812_v0 = vmul.f32 %v3518_v38, %v3448_v12  ;;  %v644_v3 = vrot.slane %v638_v51, 1 }
  0xbe   : > { %v3469_v16 = vld [vmem:[#allocation2 + $0x8] sm:$0xff]  ;;  %v3540_v48 = vld [vmem:[#allocation2 + $0x10] sm:$0x3] }
  0xbf   : > { %v311_v20 = vmul.f32 %v309_v11, %v3469_v16  ;;  %v339_v21 = vmul.f32 %v337_v17, %v3469_v16  ;;  %v325_v22 = vmul.f32 %v323_v10, %v3469_v16  ;;  %v3547_v52 = vstv %s3478_s20  ;;  %s3941_s20 = sld [smem:[#allocation8 + $0xa]] }
  0xc0   : > { %v3550_v53 = vmul.f32 %v490_v26, %v3469_v16  ;;  %v3561_v57 = vmul.f32 %v3494_v30, %v3469_v16  ;;  %v3565_v59 = vmul.f32 %v3497_v31, %v3469_v16  ;;  %v353_v61 = vmul.f32 %v351_v19, %v3469_v16 }
  0xc1   : > { %316 = vrot.lane.b32.xlu0 %v311_v20, %s5401_s27  ;;  %344 = vrot.lane.b32.xlu1 %v339_v21, %s5401_s27  ;;  %v381_v62 = vmul.f32 %v379_v23, %v3469_v16  ;;  %v3573_v63 = vmul.f32 %v490_v26, %v3540_v48  ;;  %v3579_v1 = vmul.f32 %v3484_v27, %v3469_v16  ;;  %v755_v21 = vrot.slane %v749_v55, 2 }
  0xc2   : > { %330 = vrot.lane.b32.xlu2 %v325_v22, %s5401_s27  ;;  %v5387_v2 = vrot.slane %v3561_v57, 2  ;;  %v5389_v4 = vrot.slane %v3565_v59, 1  ;;  %v367_v5 = vmul.f32 %v365_v18, %v3469_v16  ;;  %v3585_v6 = vmul.f32 %v393_v25, %v3469_v16 }
  0xc3   : > { %v498_v7 = vrot.slane %v3550_v53, 1  ;;  %v3589_v8 = vmul.f32 %v407_v24, %v3469_v16  ;;  %v3592_v9 = vmul.f32 %v511_v28, %v3469_v16  ;;  %v3606_v13 = vmul.f32 %v3500_v32, %v3469_v16 }
  0xc4   : > { %v3597_v10 = vsel %vm665_vm4, %v734_v58, %v5387_v2  ;;  %v3602_v11 = vsel %vm428_vm3, %v644_v3, %v5389_v4  ;;  %v500_v14 = vrot.slane %v3573_v63, 1  ;;  %v3610_v15 = vmul.f32 %v511_v28, %v3540_v48 }
  0xc5   : > { %v3614_v17 = vmul.f32 %v3490_v29, %v3469_v16  ;;  %v792_v18 = vmul.f32 %v3509_v35, %v3469_v16  ;;  %v5390_v19 = vrot.slane %v3579_v1, 1  ;;  %v5388_v20 = vrot.slane %v3606_v13, 2 }
  0xc6   : > { %v771_v22 = vmul.f32 %v3515_v37, %v3469_v16  ;;  %v3624_v23 = vmul.f32 %v3490_v29, %v3540_v48  ;;  %v3628_v24 = vmul.f32 %v3484_v27, %v3540_v48  ;;  %v797_v25 = vrot.slane %v791_v56, 2 }
  0xc7   : > { %v798_v26 = vrot.slane %v792_v18, 2  ;;  %v3635_v28 = vsel %vm428_vm3, %v497_v49, %v498_v7  ;;  %v3640_v33 = vsel %vm665_vm4, %v755_v21, %v5388_v20  ;;  %v519_v27 = vrot.slane %v3592_v9, 1 }
  0xc8   : > { %v813_v49 = vmul.f32 %v3518_v38, %v3469_v16  ;;  %v814_v55 = vmul.f32 %v3518_v38, %v3540_v48  ;;  %v793_v56 = vmul.f32 %v3509_v35, %v3540_v48  ;;  %v818_v58 = vrot.slane %v812_v0, 2 }
  0xc9   : > { %342 = vrot.lane.b32.xlu0 %v338_v40, %s5401_s27  ;;  %370 = vrot.lane.b32.xlu1 %v366_v41, %s3270_s0  ;;  %v776_v40 = vrot.slane %v770_v60, 2  ;;  %v777_v41 = vrot.slane %v771_v22, 2  ;;  %v3645_v42 = vsel %vm665_vm4, %v797_v25, %v798_v26  ;;  %v833_v38 = vmul.f32 %v3528_v43, %v3448_v12 }
  0xca   : > { %356 = vrot.lane.b32.xlu2 %v352_v44, %s5401_s27  ;;  %v772_v44 = vmul.f32 %v3515_v37, %v3540_v48  ;;  %v854_v37 = vmul.f32 %v3521_v39, %v3448_v12  ;;  %v821_v63 = vrot.slane %v814_v55, 2  ;;  %v800_v3 = vrot.slane %v793_v56, 2 }
  0xcb   : > { %v3652_v51 = vsel %vm665_vm4, %v776_v40, %v777_v41  ;;  %v834_v35 = vmul.f32 %v3528_v43, %v3469_v16  ;;  %v839_v40 = vrot.slane %v833_v38, 2  ;;  %v835_v55 = vmul.f32 %v3528_v43, %v3540_v48 }
  0xcc   : > { %v779_v60 = vrot.slane %v772_v44, 2  ;;  %v860_v18 = vrot.slane %v854_v37, 2  ;;  %v3682_v25 = vsel %vm665_vm4, %v798_v26, %v800_v3  ;;  %v876_v56 = vmul.f32 %v3547_v52, %v3469_v16 }
  0xcd   : > { %v840_v44 = vrot.slane %v834_v35, 2  ;;  %v856_v43 = vmul.f32 %v3521_v39, %v3540_v48  ;;  %v875_v53 = vmul.f32 %v3547_v52, %v3448_v12  ;;  %v3726_v34 = vsel %vm428_vm3, %v518_v54, %v519_v27 }
  0xce   : > { %v3671_v0 = vsel %vm665_vm4, %v777_v41, %v779_v60  ;;  %v877_v60 = vmul.f32 %v3547_v52, %v3540_v48  ;;  %v882_v37 = vrot.slane %v876_v56, 2 }
  0xcf   : > { %v881_v52 = vrot.slane %v875_v53, 2 }
  0xd1   : > { %358 = vrot.lane.b32.xlu0 %v353_v61, %s5401_s27  ;;  %386 = vrot.lane.b32.xlu1 %v381_v62, %s3270_s0  ;;  %v819_v61 = vrot.slane %v813_v49, 2  ;;  %v855_v62 = vmul.f32 %v3521_v39, %v3469_v16  ;;  %v521_v49 = vrot.slane %v3610_v15, 1 }
  0xd2   : > { %372 = vrot.lane.b32.xlu2 %v367_v5, %s3270_s0 }
  0xd3   : > { %v3674_v5 = vsel %vm665_vm4, %v818_v58, %v819_v61  ;;  %v861_v21 = vrot.slane %v855_v62, 2  ;;  %v3679_v22 = vsel %vm665_vm4, %v819_v61, %v821_v63  ;;  %v3698_v58 = vsel %vm665_vm4, %v839_v40, %v840_v44 }
  0xd4   : > { %v842_v61 = vrot.slane %v835_v55, 2  ;;  %v884_v62 = vrot.slane %v877_v60, 2  ;;  %v3749_v40 = vsel %vm665_vm4, %v881_v52, %v882_v37  ;;  %v257_v52 = vpop.permute.xlu2 %256 }
  0xd5   : > { %v3686_v41 = vsel %vm665_vm4, %v860_v18, %v861_v21  ;;  %v421_v18 = vstv %s3676_s22  ;;  %277 = vst.msk [vmem:[#allocation2 + $0x31] sm:$0xff] %vm272_vm2, %v257_v52  ;;  %v693_v52 = vstv %s3746_s29  ;;  %s3983_s22 = sld [smem:[#allocation8 + $0x76]] }
  0xd6   : > { %v3736_v63 = vsel %vm665_vm4, %v882_v37, %v884_v62  ;;  %v423_v55 = vmul.f32 %v421_v18, %v3469_v16  ;;  %v696_v26 = vmul.f32 %v693_v52, %v3540_v48  ;;  %s4028_s29 = sld [smem:[#allocation8 + $0x53]] }
  0xd8   : > { %v430_v37 = vrot.slane %v423_v55, 1  ;;  %v658_v55 = vstv %s3733_s4  ;;  %s4023_s4 = sld [smem:[#allocation8 + $0x77]] }
  0xd9   : > { %384 = vrot.lane.b32.xlu0 %v3532_v45, %s3270_s0  ;;  %412 = vrot.lane.b32.xlu1 %v3535_v46, %s3270_s0  ;;  %v501_v45 = vsel %vm428_vm3, %v498_v7, %v500_v14  ;;  %v3714_v46 = vsel %vm428_vm3, %v539_v50, %v5390_v19  ;;  %v3729_v50 = vsel %vm665_vm4, %v840_v44, %v842_v61  ;;  %v439_v7 = vstv %s3658_s19  ;;  %s3969_s19 = sld [smem:[#allocation8 + $0x6c]] }
  0xda   : > { %398 = vrot.lane.b32.xlu2 %v3538_v47, %s3270_s0  ;;  %v863_v47 = vrot.slane %v856_v43, 2  ;;  %v456_v14 = vstv %s3664_s28  ;;  %v440_v38 = vmul.f32 %v439_v7, %v3448_v12  ;;  %v441_v36 = vmul.f32 %v439_v7, %v3469_v16  ;;  %s3981_s28 = sld [smem:[#allocation8 + $0xb]] }
  0xdb   : > { %v458_v54 = vmul.f32 %v456_v14, %v3469_v16  ;;  %v459_v35 = vmul.f32 %v456_v14, %v3540_v48  ;;  %v422_v61 = vmul.f32 %v421_v18, %v3448_v12  ;;  %v442_v53 = vmul.f32 %v439_v7, %v3540_v48 }
  0xdc   : > { %v3739_v3 = vsel %vm665_vm4, %v861_v21, %v863_v47  ;;  %v446_v44 = vrot.slane %v440_v38, 1  ;;  %v424_v21 = vmul.f32 %v421_v18, %v3540_v48  ;;  %v447_v56 = vrot.slane %v441_v36, 1 }
  0xdd   : > { %v464_v60 = vrot.slane %v458_v54, 1  ;;  %v466_v43 = vrot.slane %v459_v35, 1  ;;  %v457_v47 = vmul.f32 %v456_v14, %v3448_v12  ;;  %v473_v54 = vstv %s3716_s30  ;;  %s4004_s30 = sld [smem:[#allocation8 + $0x2f]] }
  0xde   : > { %v432_v62 = vrot.slane %v424_v21, 1  ;;  %v3764_v38 = vsel %vm428_vm3, %v446_v44, %v447_v56  ;;  %v449_v14 = vrot.slane %v442_v53, 1  ;;  %v476_v18 = vmul.f32 %v473_v54, %v3540_v48 }
  0xdf   : > { %v3767_v36 = vsel %vm428_vm3, %v464_v60, %v466_v43  ;;  %v463_v7 = vrot.slane %v457_v47, 1  ;;  %v474_v44 = vmul.f32 %v473_v54, %v3448_v12  ;;  %v661_v53 = vmul.f32 %v658_v55, %v3540_v48 }
  0xe0   : > { %v3789_v43 = vsel %vm428_vm3, %v447_v56, %v449_v14  ;;  %v483_v47 = vrot.slane %v476_v18, 1  ;;  %v710_v18 = vstv %s3754_s5  ;;  %v595_v19 = vstv %s3783_s9  ;;  %s2935_s5 = sld [smem:[#allocation8 + $0xd]] }
  0xe1   : > { %400 = vrot.lane.b32.xlu0 %v3585_v6, %s3270_s0  ;;  %504 = vrot.lane.b32.xlu1 %v501_v45, %s5401_s27  ;;  %v429_v6 = vrot.slane %v422_v61, 1  ;;  %v3774_v45 = vsel %vm428_vm3, %v430_v37, %v432_v62  ;;  %v3786_v21 = vsel %vm428_vm3, %v463_v7, %v464_v60  ;;  %v660_v62 = vmul.f32 %v658_v55, %v3469_v16  ;;  %s2936_s9 = sld [smem:[#allocation8 + $0x31]] }
  0xe2   : > { %414 = vrot.lane.b32.xlu2 %v3589_v8, %s3270_s0  ;;  %v475_v8 = vmul.f32 %v473_v54, %v3469_v16  ;;  %v694_v54 = vmul.f32 %v693_v52, %v3448_v12  ;;  %v695_v60 = vmul.f32 %v693_v52, %v3469_v16  ;;  %v659_v7 = vmul.f32 %v658_v55, %v3448_v12 }
  0xe3   : > { %v3778_v35 = vsel %vm428_vm3, %v429_v6, %v430_v37  ;;  %v480_v37 = vrot.slane %v474_v44, 1  ;;  %v667_v6 = vrot.slane %v660_v62, 2  ;;  %v712_v20 = vmul.f32 %v710_v18, %v3469_v16 }
  0xe4   : > { %v481_v61 = vrot.slane %v475_v8, 1  ;;  %v669_v8 = vrot.slane %v661_v53, 2  ;;  %v700_v44 = vrot.slane %v694_v54, 2  ;;  %v701_v62 = vrot.slane %v695_v60, 2 }
  0xe5   : > { %v666_v2 = vrot.slane %v659_v7, 2  ;;  %v718_v54 = vrot.slane %v712_v20, 2  ;;  %v703_v52 = vrot.slane %v696_v26, 2  ;;  %v596_v26 = vmul.f32 %v595_v19, %v3448_v12 }
  0xe6   : > { %v3800_v56 = vsel %vm428_vm3, %v481_v61, %v483_v47  ;;  %v3803_v14 = vsel %vm428_vm3, %v480_v37, %v481_v61  ;;  %v3814_v55 = vsel %vm665_vm4, %v667_v6, %v669_v8  ;;  %v713_v61 = vmul.f32 %v710_v18, %v3540_v48  ;;  %v259_v37 = vpop.permute.xlu2 %258 }
  0xe7   : > { %v676_v47 = vstv %s3770_s7  ;;  %v3823_v53 = vsel %vm665_vm4, %v666_v2, %v667_v6  ;;  %278 = vst.msk [vmem:[#allocation2 + $0x39] sm:$0xff] %vm272_vm2, %v259_v37  ;;  %v5403_v37 = vrot.slane %v3614_v17, 1  ;;  %v598_v17 = vmul.f32 %v595_v19, %v3540_v48  ;;  %s2937_s7 = sld [smem:[#allocation8 + $0x55]] }
  0xe8   : > { %v678_v60 = vmul.f32 %v676_v47, %v3469_v16  ;;  %v679_v7 = vmul.f32 %v676_v47, %v3540_v48  ;;  %v677_v8 = vmul.f32 %v676_v47, %v3448_v12  ;;  %v574_v47 = vstv %s3794_s11  ;;  %s2938_s11 = sld [smem:[#allocation8 + $0x79]] }
  0xe9   : > { %502 = vrot.lane.b32.xlu0 %v3635_v28, %s5401_s27  ;;  %544 = vrot.lane.b32.xlu1 %v3714_v46, %s5401_s27  ;;  %v711_v28 = vmul.f32 %v710_v18, %v3448_v12  ;;  %v3820_v46 = vsel %vm665_vm4, %v700_v44, %v701_v62  ;;  %v542_v18 = vrot.slane %v3628_v24, 1  ;;  %v554_v24 = vmul.f32 %v3490_v29, %v3448_v12 }
  0xea   : > { %523 = vrot.lane.b32.xlu2 %v3726_v34, %s5401_s27  ;;  %v720_v34 = vrot.slane %v713_v61, 2  ;;  %v684_v44 = vrot.slane %v678_v60, 2  ;;  %v686_v20 = vrot.slane %v679_v7, 2  ;;  %v683_v6 = vrot.slane %v677_v8, 2 }
  0xeb   : > { %v717_v4 = vrot.slane %v711_v28, 2  ;;  %v522_v61 = vsel %vm428_vm3, %v519_v27, %v521_v49  ;;  %v5402_v28 = vrot.slane %v3624_v23, 1  ;;  %v5404_v29 = vrot.slane %v3579_v1, 1 }
  0xec   : > { %v3833_v2 = vsel %vm665_vm4, %v718_v54, %v720_v34  ;;  %v3853_v15 = vsel %vm665_vm4, %v684_v44, %v686_v20  ;;  %v3856_v9 = vsel %vm665_vm4, %v683_v6, %v684_v44  ;;  %v576_v27 = vmul.f32 %v574_v47, %v3469_v16 }
  0xed   : > { %v3836_v39 = vsel %vm665_vm4, %v717_v4, %v718_v54  ;;  %v564_v60 = vsel %vm428_vm3, %v5403_v37, %v5402_v28  ;;  %v597_v4 = vmul.f32 %v595_v19, %v3469_v16  ;;  %v543_v23 = vsel %vm428_vm3, %v5404_v29, %v542_v18  ;;  %v253_v54 = vpop.permute.xlu1 %252 }
  0xee   : > { %v3865_v49 = vsel %vm665_vm4, %v701_v62, %v703_v52  ;;  %v575_v34 = vmul.f32 %v574_v47, %v3448_v12  ;;  %275 = vst.msk [vmem:[#allocation2 + $0x19] sm:$0xff] %vm272_vm2, %v253_v54  ;;  %v560_v8 = vrot.slane %v554_v24, 1  ;;  %v582_v44 = vrot.slane %v576_v27, 1 }
  0xef   : > { %v603_v7 = vrot.slane %v597_v4, 1  ;;  %v602_v1 = vrot.slane %v596_v26, 1  ;;  %v5405_v18 = vmov %v5403_v37  ;;  %v616_v62 = vstv %s2905_s8  ;;  %s2940_s8 = sld [smem:[#allocation8 + $0x32]] }
  0xf0   : > { %v562_v20 = vsel %vm428_vm3, %v560_v8, %v5405_v18  ;;  %v581_v6 = vrot.slane %v575_v34, 1  ;;  %v577_v52 = vmul.f32 %v574_v47, %v3540_v48  ;;  %v618_v28 = vmul.f32 %v616_v62, %v3469_v16 }
  0xf1   : > { %525 = vrot.lane.b32.xlu0 %v522_v61, %s5401_s27  ;;  %567 = vrot.lane.b32.xlu1 %v564_v60, %s5401_s27  ;;  %v604_v61 = vsel %vm428_vm3, %v602_v1, %v603_v7  ;;  %v619_v37 = vmul.f32 %v616_v62, %v3540_v48  ;;  %v617_v19 = vmul.f32 %v616_v62, %v3448_v12 }
  0xf2   : > { %546 = vrot.lane.b32.xlu2 %v543_v23, %s5401_s27  ;;  %v583_v24 = vsel %vm428_vm3, %v581_v6, %v582_v44  ;;  %v584_v4 = vrot.slane %v577_v52, 1  ;;  %v624_v29 = vrot.slane %v618_v28, 1  ;;  %v605_v23 = vrot.slane %v598_v17, 1 }
  0xf3   : > { %v626_v47 = vrot.slane %v619_v37, 1  ;;  %v623_v8 = vrot.slane %v617_v19, 1  ;;  %v751_v18 = vmul.f32 %v3500_v32, %v3540_v48  ;;  %v5407_v52 = vrot.slane %v3606_v13, 2 }
  0xf4   : > { %v585_v27 = vsel %vm428_vm3, %v582_v44, %v584_v4  ;;  %v606_v54 = vsel %vm428_vm3, %v603_v7, %v605_v23  ;;  %v640_v44 = vmul.f32 %v3497_v31, %v3540_v48  ;;  %v730_v7 = vmul.f32 %v3494_v30, %v3540_v48 }
  0xf5   : > { %v255_v60 = vpop.permute.xlu1 %254  ;;  %v627_v26 = vsel %vm428_vm3, %v624_v29, %v626_v47  ;;  %v625_v1 = vsel %vm428_vm3, %v623_v8, %v624_v29  ;;  %v758_v62 = vrot.slane %v751_v18, 2  ;;  %v5408_v30 = vrot.slane %v3561_v57, 2 }
  0xf6   : > { %276 = vst.msk [vmem:[#allocation2 + $0x21] sm:$0xff] %vm272_vm2, %v255_v60  ;;  %v647_v6 = vrot.slane %v640_v44, 1  ;;  %v737_v31 = vrot.slane %v730_v7, 2 }
  0xf8   : > { %v738_v48 = vsel %vm665_vm4, %v5408_v30, %v737_v31 }
  0xf9   : > { %565 = vrot.lane.b32.xlu0 %v562_v20, %s5401_s27  ;;  %607 = vrot.lane.b32.xlu1 %v604_v61, %s3270_s0  ;;  %v261_v20 = vpop.permute.xlu0 %260  ;;  %v5406_v61 = vrot.slane %v3565_v59, 1 }
  0xfa   : > { %586 = vrot.lane.b32.xlu2 %v583_v24, %s3270_s0  ;;  %279 = vst.msk [vmem:[#allocation2 + $0x49] sm:$0xff] %vm272_vm2, %v261_v20  ;;  %v303_v20 = vstv %s3969_s19  ;;  %s2949_s19 = sld [smem:[#allocation8 + $0x58]] }
  0xfb   : > { %v648_v32 = vsel %vm428_vm3, %v5406_v61, %v647_v6  ;;  %v305_v6 = vmul.f32 %v303_v20, %v3469_v16 }
  0xfd   : > { %v263_v34 = vpop.permute.xlu1 %262  ;;  %v3978_v23 = vld [vmem:[#allocation2 + $0x20] sm:$0xff] }
  0xfe   : > { %280 = vst.msk [vmem:[#allocation2 + $0x51] sm:$0xff] %vm272_vm2, %v263_v34  ;;  %v291_v34 = vstv %s3960_s6  ;;  %s2950_s6 = sld [smem:[#allocation8 + $0x7c]] }
  0xff   : > { %v293_v44 = vmul.f32 %v291_v34, %v3469_v16 }
 0x101   : > { %588 = vrot.lane.b32.xlu0 %v585_v27, %s3270_s0  ;;  %630 = vrot.lane.b32.xlu1 %v627_v26, %s3270_s0 }
 0x102   : > { %609 = vrot.lane.b32.xlu2 %v606_v54, %s3270_s0  ;;  %v951_v54 = vstv %s3957_s26  ;;  %s2948_s26 = sld [smem:[#allocation8 + $0x34]] }
 0x109   : > { %628 = vrot.lane.b32.xlu0 %v625_v1, %s3270_s0  ;;  %739 = vrot.lane.b32.xlu1 %v3597_v10, %s5401_s27  ;;  %v759_v10 = vsel %vm665_vm4, %v5407_v52, %v758_v62  ;;  %v953_v1 = vmul.f32 %v951_v54, %v3978_v23 }
 0x10a   : > { %649 = vrot.lane.b32.xlu2 %v3602_v11, %s3270_s0 }
 0x111   : > { %651 = vrot.lane.b32.xlu0 %v648_v32, %s3270_s0  ;;  %762 = vrot.lane.b32.xlu1 %v759_v10, %s5401_s27  ;;  %v979_v10 = vstv %s3981_s28  ;;  %s2951_s28 = sld [smem:[#allocation8 + $0x11]] }
 0x112   : > { %741 = vrot.lane.b32.xlu2 %v738_v48, %s5401_s27 }
 0x113   : > { %v315_v11 = vpop.permute.xlu2 %314 }
 0x119   : > { %760 = vrot.lane.b32.xlu0 %v3640_v33, %s5401_s27  ;;  %802 = vrot.lane.b32.xlu1 %v3645_v42, %s5401_s27  ;;  %v285_v42 = vstv %s284_s10  ;;  %s2939_s10 = sld [smem:[#allocation8 + $0xe]] }
 0x11a   : > { %781 = vrot.lane.b32.xlu2 %v3652_v51, %s5401_s27  ;;  %v287_v51 = vmul.f32 %v285_v42, %v3469_v16  ;;  %v286_v37 = vmul.f32 %v285_v42, %v3448_v12  ;;  %v292_v42 = vmul.f32 %v291_v34, %v3448_v12 }
 0x11c   : > { %v331_v59 = vpop.permute.xlu2 %330  ;;  %v320_v60 = vadd.f32 %v315_v11, %v286_v37 }
 0x121   : > { %783 = vrot.lane.b32.xlu0 %v3671_v0, %s5401_s27  ;;  %825 = vrot.lane.b32.xlu1 %v3679_v22, %s3270_s0  ;;  %v3954_v22 = vld [vmem:[#allocation2 + $0x18] sm:$0xff] }
 0x122   : > { %804 = vrot.lane.b32.xlu2 %v3682_v25, %s5401_s27  ;;  %v952_v11 = vmul.f32 %v951_v54, %v3954_v22 }
 0x124   : > { %v3929_v57 = vpop.permute.xlu2 %356 }
 0x129   : > { %823 = vrot.lane.b32.xlu0 %v3674_v5, %s3270_s0  ;;  %865 = vrot.lane.b32.xlu1 %v3686_v41, %s3270_s0 }
 0x12a   : > { %844 = vrot.lane.b32.xlu2 %v3698_v58, %s3270_s0  ;;  %v937_v58 = vstv %s3939_s1  ;;  %s2941_s1 = sld [smem:[#allocation8 + $0x56]] }
 0x12b   : > { %v3937_v13 = vpop.permute.xlu1 %328  ;;  %v939_v18 = vmul.f32 %v937_v58, %v3978_v23 }
 0x12c   : > { %v373_v33 = vpop.permute.xlu2 %372 }
 0x131   : > { %846 = vrot.lane.b32.xlu0 %v3729_v50, %s3270_s0  ;;  %888 = vrot.lane.b32.xlu1 %v3736_v63, %s3270_s0  ;;  %v923_v50 = vstv %s3941_s20  ;;  %v297_v63 = vstv %s3943_s23  ;;  %s2947_s20 = sld [smem:[#allocation8 + $0x10]] }
 0x132   : > { %867 = vrot.lane.b32.xlu2 %v3739_v3, %s3270_s0  ;;  %v938_v3 = vmul.f32 %v937_v58, %v3954_v22  ;;  %v924_v24 = vmul.f32 %v923_v50, %v3954_v22  ;;  %v298_v4 = vmul.f32 %v297_v63, %v3448_v12  ;;  %v925_v8 = vmul.f32 %v923_v50, %v3978_v23  ;;  %s2942_s23 = sld [smem:[#allocation8 + $0x7a]] }
 0x133   : > { %v317_v0 = vpop.permute.xlu0 %316  ;;  %v3952_v5 = vpop.permute.xlu1 %344 }
 0x134   : > { %v321_v25 = vadd.f32 %v317_v0, %v287_v51  ;;  %v399_v41 = vpop.permute.xlu2 %398 }
 0x136   : > { %v377_v28 = vadd.f32 %v373_v33, %v321_v25  ;;  %v304_v33 = vmul.f32 %v303_v20, %v3448_v12  ;;  %v334_v25 = vadd.f32 %v3937_v13, %v292_v42 }
 0x138   : > { %v3967_v17 = vadd.f32 %v3774_v45, %v377_v28 }
 0x139   : > { %886 = vrot.lane.b32.xlu0 %v3749_v40, %s3270_s0  ;;  %942 = vrot.lane.b32.xlu1 %v938_v3, %s5401_s27 }
 0x13a   : > { %928 = vrot.lane.b32.xlu2 %v924_v24, %s5401_s27  ;;  %v299_v24 = vmul.f32 %v297_v63, %v3469_v16  ;;  %v1103_v16 = vstv %s2935_s5  ;;  %s4218_s5 = sld [smem:[#allocation8 + $0x7d]] }
 0x13b   : > { %v343_v29 = vpop.permute.xlu0 %342  ;;  %v371_v47 = vpop.permute.xlu1 %370  ;;  %v1105_v34 = vmul.f32 %v1103_v16, %v3978_v23 }
 0x13c   : > { %v348_v45 = vadd.f32 %v343_v29, %v298_v4  ;;  %v376_v27 = vadd.f32 %v371_v47, %v320_v60  ;;  %v415_v26 = vpop.permute.xlu2 %414  ;;  %v981_v60 = vmul.f32 %v979_v10, %v3978_v23 }
 0x13d   : > { %v1111_v20 = vrot.slane %v1105_v34, 1 }
 0x13e   : > { %v404_v40 = vadd.f32 %v399_v41, %v348_v45  ;;  %v3986_v19 = vadd.f32 %v3778_v35, %v376_v27  ;;  %v335_v35 = vadd.f32 %v331_v59, %v293_v44  ;;  %v980_v59 = vmul.f32 %v979_v10, %v3954_v22  ;;  %v4049_v27 = vld [vmem:[#allocation2 + $0x28] sm:$0x3] }
 0x13f   : > { %v1021_v45 = vstv %s4023_s4  ;;  %v1104_v10 = vmul.f32 %v1103_v16, %v3954_v22  ;;  %s2952_s4 = sld [smem:[#allocation8 + $0x35]] }
 0x140   : > { %v3994_v7 = vadd.f32 %v3786_v21, %v404_v40  ;;  %v965_v21 = vstv %s3983_s22  ;;  %s4193_s22 = sld [smem:[#allocation8 + $0x9]] }
 0x141   : > { %930 = vrot.lane.b32.xlu0 %v925_v8, %s5401_s27  ;;  %958 = vrot.lane.b32.xlu1 %v953_v1, %s5401_s27  ;;  %v966_v51 = vmul.f32 %v965_v21, %v3954_v22  ;;  %v967_v3 = vmul.f32 %v965_v21, %v3978_v23  ;;  %v1106_v8 = vmul.f32 %v1103_v16, %v4049_v27 }
 0x142   : > { %944 = vrot.lane.b32.xlu2 %v939_v18, %s5401_s27 }
 0x143   : > { %v359_v62 = vpop.permute.xlu0 %358  ;;  %v387_v31 = vpop.permute.xlu1 %386 }
 0x144   : > { %v363_v61 = vadd.f32 %v359_v62, %v305_v6  ;;  %v391_v32 = vadd.f32 %v387_v31, %v335_v35  ;;  %v4001_v52 = vpop.permute.xlu2 %523  ;;  %v1113_v35 = vrot.slane %v1106_v8, 1  ;;  %v1145_v6 = vstv %s2937_s7  ;;  %s4226_s7 = sld [smem:[#allocation8 + $0x75]] }
 0x145   : > { %v1124_v31 = vstv %s2936_s9  ;;  %s4252_s9 = sld [smem:[#allocation8 + $0x51]] }
 0x146   : > { %v419_v30 = vadd.f32 %v415_v26, %v363_v61  ;;  %v4008_v48 = vadd.f32 %v3789_v43, %v391_v32  ;;  %v362_v43 = vadd.f32 %v3929_v57, %v304_v33  ;;  %v1007_v26 = vstv %s4028_s29  ;;  %s4202_s29 = sld [smem:[#allocation8 + $0x2d]] }
 0x147   : > { %v1008_v40 = vmul.f32 %v1007_v26, %v3954_v22  ;;  %v1009_v61 = vmul.f32 %v1007_v26, %v3978_v23  ;;  %v1023_v32 = vmul.f32 %v1021_v45, %v3978_v23  ;;  %v1114_v21 = vsel %vm428_vm3, %v1111_v20, %v1113_v35 }
 0x148   : > { %v4016_v0 = vadd.f32 %v3800_v56, %v419_v30  ;;  %v993_v56 = vstv %s4004_s30  ;;  %v1146_v30 = vmul.f32 %v1145_v6, %v3954_v22  ;;  %v1126_v33 = vmul.f32 %v1124_v31, %v3978_v23  ;;  %s2953_s30 = sld [smem:[#allocation8 + $0x59]] }
 0x149   : > { %956 = vrot.lane.b32.xlu0 %v952_v11, %s5401_s27  ;;  %984 = vrot.lane.b32.xlu1 %v980_v59, %s3270_s0  ;;  %v995_v37 = vmul.f32 %v993_v56, %v3978_v23  ;;  %v994_v54 = vmul.f32 %v993_v56, %v3954_v22  ;;  %v1147_v11 = vmul.f32 %v1145_v6, %v3978_v23 }
 0x14a   : > { %970 = vrot.lane.b32.xlu2 %v966_v51, %s5401_s27  ;;  %v1125_v59 = vmul.f32 %v1124_v31, %v3954_v22  ;;  %v1132_v56 = vrot.slane %v1126_v33, 1 }
 0x14b   : > { %v385_v41 = vpop.permute.xlu0 %384  ;;  %v413_v58 = vpop.permute.xlu1 %412 }
 0x14c   : > { %v390_v12 = vadd.f32 %v385_v41, %v334_v25  ;;  %v418_v50 = vadd.f32 %v413_v58, %v362_v43  ;;  %v4025_v28 = vpop.permute.xlu2 %546  ;;  %v1166_v43 = vstv %s2938_s11  ;;  %v1110_v58 = vrot.slane %v1104_v10, 1  ;;  %s4274_s11 = sld [smem:[#allocation8 + $0x37]] }
 0x14e   : > { %v4031_v57 = vadd.f32 %v3764_v38, %v390_v12  ;;  %v4034_v13 = vadd.f32 %v3803_v14, %v418_v50  ;;  %v349_v38 = vadd.f32 %v3952_v5, %v299_v24  ;;  %v1022_v5 = vmul.f32 %v1021_v45, %v3954_v22 }
 0x14f   : > { %v1153_v12 = vrot.slane %v1147_v11, 1  ;;  %v1131_v50 = vrot.slane %v1125_v59, 1  ;;  %v1168_v24 = vmul.f32 %v1166_v43, %v3978_v23 }
 0x150   : > { %v529_v45 = vadd.f32 %v4001_v52, %v4031_v57  ;;  %v1167_v57 = vmul.f32 %v1166_v43, %v3954_v22 }
 0x151   : > { %972 = vrot.lane.b32.xlu0 %v967_v3, %s5401_s27  ;;  %1000 = vrot.lane.b32.xlu1 %v995_v37, %s3270_s0  ;;  %v1127_v37 = vmul.f32 %v1124_v31, %v4049_v27  ;;  %v1174_v34 = vrot.slane %v1168_v24, 1 }
 0x152   : > { %986 = vrot.lane.b32.xlu2 %v981_v60, %s3270_s0  ;;  %v1112_v60 = vsel %vm428_vm3, %v1110_v58, %v1111_v20  ;;  %v1187_v20 = vstv %s2939_s10  ;;  %v1173_v11 = vrot.slane %v1167_v57, 1  ;;  %s4305_s10 = sld [smem:[#allocation8 + $0x5b]] }
 0x153   : > { %v401_v4 = vpop.permute.xlu0 %400  ;;  %v4046_v14 = vpop.permute.xlu1 %504 }
 0x154   : > { %v405_v29 = vadd.f32 %v401_v4, %v349_v38  ;;  %v587_v47 = vpop.permute.xlu2 %586  ;;  %v1169_v4 = vmul.f32 %v1166_v43, %v4049_v27  ;;  %v509_v10 = vadd.f32 %v4046_v14, %v3967_v17 }
 0x156   : > { %v4053_v63 = vadd.f32 %v3767_v36, %v405_v29  ;;  %v1133_v29 = vsel %vm428_vm3, %v1131_v50, %v1132_v56  ;;  %v1176_v8 = vrot.slane %v1169_v4, 1 }
 0x159   : > { %998 = vrot.lane.b32.xlu0 %v994_v54, %s3270_s0  ;;  %1026 = vrot.lane.b32.xlu1 %v1022_v5, %s3270_s0  ;;  %v1134_v54 = vrot.slane %v1127_v37, 1 }
 0x15a   : > { %1012 = vrot.lane.b32.xlu2 %v1008_v40, %s3270_s0 }
 0x15b   : > { %v503_v1 = vpop.permute.xlu0 %502  ;;  %v4063_v36 = vpop.permute.xlu1 %544  ;;  %v1135_v52 = vsel %vm428_vm3, %v1132_v56, %v1134_v54  ;;  %v1250_v54 = vstv %s2942_s23  ;;  %s4326_s23 = sld [smem:[#allocation8 + $0x7f]] }
 0x15c   : > { %v508_v44 = vadd.f32 %v503_v1, %v3986_v19  ;;  %v610_v18 = vpop.permute.xlu2 %609 }
 0x15e   : > { %v592_v62 = vadd.f32 %v587_v47, %v508_v44  ;;  %v1148_v47 = vmul.f32 %v1145_v6, %v4049_v27  ;;  %v1208_v44 = vstv %s2940_s8  ;;  %v1177_v6 = vsel %vm428_vm3, %v1174_v34, %v1176_v8  ;;  %s4281_s8 = sld [smem:[#allocation8 + $0x13]] }
 0x160   : > { %v4073_v19 = vadd.f32 %v3823_v53, %v592_v62  ;;  %v1152_v53 = vrot.slane %v1146_v30, 1  ;;  %v1155_v1 = vrot.slane %v1148_v47, 1  ;;  %v1210_v62 = vmul.f32 %v1208_v44, %v3978_v23 }
 0x161   : > { %1014 = vrot.lane.b32.xlu0 %v1009_v61, %s3270_s0  ;;  %1117 = vrot.lane.b32.xlu1 %v1114_v21, %s5401_s27  ;;  %v1188_v61 = vmul.f32 %v1187_v20, %v3954_v22  ;;  %v551_v21 = vadd.f32 %v4025_v28, %v4053_v63  ;;  %v1190_v28 = vmul.f32 %v1187_v20, %v4049_v27 }
 0x162   : > { %1028 = vrot.lane.b32.xlu2 %v1023_v32, %s3270_s0  ;;  %v1154_v38 = vsel %vm428_vm3, %v1152_v53, %v1153_v12  ;;  %v1189_v32 = vmul.f32 %v1187_v20, %v3978_v23  ;;  %v1229_v53 = vstv %s2941_s1  ;;  %v1175_v63 = vsel %vm428_vm3, %v1173_v11, %v1174_v34  ;;  %s2932_s1 = sld [smem:[#allocation8 + $0x30]] }
 0x163   : > { %v526_v42 = vpop.permute.xlu0 %525  ;;  %v4080_v51 = vpop.permute.xlu1 %567  ;;  %v1231_v50 = vmul.f32 %v1229_v53, %v3978_v23  ;;  %v1232_v56 = vmul.f32 %v1229_v53, %v4049_v27 }
 0x164   : > { %v530_v25 = vadd.f32 %v526_v42, %v4008_v48  ;;  %v650_v41 = vpop.permute.xlu2 %649  ;;  %v1195_v58 = vrot.slane %v1189_v32, 1  ;;  %v1360_v32 = vstv %s2948_s26  ;;  %s2931_s26 = sld [smem:[#allocation8 + $0xc]] }
 0x165   : > { %v1239_v47 = vrot.slane %v1232_v56, 1 }
 0x166   : > { %v614_v3 = vadd.f32 %v610_v18, %v530_v25  ;;  %v1216_v25 = vrot.slane %v1210_v62, 1 }
 0x168   : > { %v4089_v48 = vadd.f32 %v3853_v15, %v614_v3  ;;  %v1211_v3 = vmul.f32 %v1208_v44, %v4049_v27 }
 0x169   : > { %1115 = vrot.lane.b32.xlu0 %v1112_v60, %s5401_s27  ;;  %1157 = vrot.lane.b32.xlu1 %v1154_v38, %s5401_s27  ;;  %v1197_v60 = vrot.slane %v1190_v28, 1  ;;  %v1402_v28 = vstv %s2950_s6  ;;  %s2933_s6 = sld [smem:[#allocation8 + $0x54]] }
 0x16a   : > { %1136 = vrot.lane.b32.xlu2 %v1133_v29, %s5401_s27  ;;  %v1237_v29 = vrot.slane %v1231_v50, 1 }
 0x16b   : > { %v566_v26 = vpop.permute.xlu0 %565  ;;  %v608_v16 = vpop.permute.xlu1 %607 }
 0x16c   : > { %v571_v5 = vadd.f32 %v566_v26, %v4034_v13  ;;  %v613_v15 = vadd.f32 %v608_v16, %v529_v45  ;;  %v4099_v40 = vpop.permute.xlu2 %741  ;;  %v1209_v13 = vmul.f32 %v1208_v44, %v3954_v22  ;;  %v1218_v45 = vrot.slane %v1211_v3, 1 }
 0x16d   : > { %v1339_v26 = vstv %s2947_s20  ;;  %v572_v44 = vadd.f32 %v4080_v51, %v4016_v0  ;;  %v1253_v0 = vmul.f32 %v1250_v54, %v4049_v27  ;;  %v1404_v3 = vmul.f32 %v1402_v28, %v3978_v23  ;;  %s4324_s20 = sld [smem:[#allocation8 + $0x14]] }
 0x16e   : > { %v655_v18 = vadd.f32 %v650_v41, %v571_v5  ;;  %v4102_v35 = vadd.f32 %v3856_v9, %v613_v15  ;;  %v1156_v9 = vsel %vm428_vm3, %v1153_v12, %v1155_v1  ;;  %v1215_v43 = vrot.slane %v1209_v13, 1 }
 0x16f   : > { %v1194_v41 = vrot.slane %v1188_v61, 1  ;;  %v1230_v5 = vmul.f32 %v1229_v53, %v3954_v22  ;;  %v1340_v15 = vmul.f32 %v1339_v26, %v3954_v22  ;;  %v1341_v34 = vmul.f32 %v1339_v26, %v3978_v23 }
 0x170   : > { %v4110_v31 = vadd.f32 %v3836_v39, %v655_v18  ;;  %v1217_v12 = vsel %vm428_vm3, %v1215_v43, %v1216_v25  ;;  %v1219_v8 = vsel %vm428_vm3, %v1216_v25, %v1218_v45  ;;  %v1252_v1 = vmul.f32 %v1250_v54, %v3978_v23 }
 0x171   : > { %1138 = vrot.lane.b32.xlu0 %v1135_v52, %s5401_s27  ;;  %1180 = vrot.lane.b32.xlu1 %v1177_v6, %s5401_s27  ;;  %v1236_v6 = vrot.slane %v1230_v5, 1  ;;  %v1346_v13 = vrot.slane %v1340_v15, 2  ;;  %v1347_v62 = vrot.slane %v1341_v34, 2  ;;  %v1260_v25 = vrot.slane %v1253_v0, 1 }
 0x172   : > { %1159 = vrot.lane.b32.xlu2 %v1156_v9, %s5401_s27  ;;  %v1258_v61 = vrot.slane %v1252_v1, 1  ;;  %v1423_v15 = vstv %s2951_s28  ;;  %s4366_s28 = sld [smem:[#allocation8 + $0x80]] }
 0x173   : > { %v589_v39 = vpop.permute.xlu0 %588  ;;  %v631_v30 = vpop.permute.xlu1 %630  ;;  %v1238_v51 = vsel %vm428_vm3, %v1236_v6, %v1237_v29  ;;  %v1425_v1 = vmul.f32 %v1423_v15, %v3978_v23  ;;  %v1405_v6 = vmul.f32 %v1402_v28, %v4049_v27 }
 0x174   : > { %v593_v59 = vadd.f32 %v589_v39, %v509_v10  ;;  %v635_v33 = vadd.f32 %v631_v30, %v551_v21  ;;  %v4122_v42 = vpop.permute.xlu2 %781  ;;  %v1348_v21 = vsel %vm665_vm4, %v1346_v13, %v1347_v62  ;;  %v1362_v39 = vmul.f32 %v1360_v32, %v3978_v23 }
 0x175   : > { %v1363_v30 = vmul.f32 %v1360_v32, %v4049_v27  ;;  %v1261_v50 = vsel %vm428_vm3, %v1258_v61, %v1260_v25  ;;  %v1424_v25 = vmul.f32 %v1423_v15, %v3954_v22 }
 0x176   : > { %v4125_v17 = vadd.f32 %v3814_v55, %v593_v59  ;;  %v4128_v14 = vadd.f32 %v3865_v49, %v635_v33  ;;  %v1196_v55 = vsel %vm428_vm3, %v1194_v41, %v1195_v58  ;;  %v550_v49 = vadd.f32 %v4063_v36, %v3994_v7 }
 0x177   : > { %v1198_v7 = vsel %vm428_vm3, %v1195_v58, %v1197_v60  ;;  %v1240_v36 = vsel %vm428_vm3, %v1237_v29, %v1239_v47  ;;  %v1368_v41 = vrot.slane %v1362_v39, 2  ;;  %v1370_v58 = vrot.slane %v1363_v30, 2 }
 0x178   : > { %v1412_v30 = vrot.slane %v1405_v6, 2 }
 0x179   : > { %1178 = vrot.lane.b32.xlu0 %v1175_v63, %s5401_s27  ;;  %1220 = vrot.lane.b32.xlu1 %v1217_v12, %s3270_s0  ;;  %v1381_v63 = vstv %s2949_s19  ;;  %v1361_v12 = vmul.f32 %v1360_v32, %v3954_v22  ;;  %v1371_v56 = vsel %vm665_vm4, %v1368_v41, %v1370_v58  ;;  %s4346_s19 = sld [smem:[#allocation8 + $0x38]] }
 0x17a   : > { %1199 = vrot.lane.b32.xlu2 %v1196_v55, %s3270_s0  ;;  %v1403_v55 = vmul.f32 %v1402_v28, %v3954_v22  ;;  %v1383_v60 = vmul.f32 %v1381_v63, %v3978_v23 }
 0x17b   : > { %v629_v37 = vpop.permute.xlu0 %628  ;;  %v4142_v24 = vpop.permute.xlu1 %739 }
 0x17c   : > { %v634_v38 = vadd.f32 %v629_v37, %v550_v49  ;;  %v4144_v4 = vpop.permute.xlu2 %804  ;;  %v1382_v37 = vmul.f32 %v1381_v63, %v3954_v22  ;;  %v1389_v5 = vrot.slane %v1383_v60, 2  ;;  %v745_v13 = vadd.f32 %v4142_v24, %v4073_v19 }
 0x17d   : > { %v1444_v19 = vstv %s2952_s4  ;;  %s2934_s4 = sld [smem:[#allocation8 + $0x78]] }
 0x17e   : > { %v4147_v16 = vadd.f32 %v3820_v46, %v634_v38  ;;  %v1251_v46 = vmul.f32 %v1250_v54, %v3954_v22  ;;  %v1409_v54 = vrot.slane %v1403_v55, 2 }
 0x180   : > { %v1257_v9 = vrot.slane %v1251_v46, 1 }
 0x181   : > { %1201 = vrot.lane.b32.xlu0 %v1198_v7, %s3270_s0  ;;  %1243 = vrot.lane.b32.xlu1 %v1240_v36, %s3270_s0  ;;  %v1410_v7 = vrot.slane %v1404_v3, 2  ;;  %v1388_v36 = vrot.slane %v1382_v37, 2 }
 0x182   : > { %1222 = vrot.lane.b32.xlu2 %v1219_v8, %s3270_s0  ;;  %v1259_v11 = vsel %vm428_vm3, %v1257_v9, %v1258_v61  ;;  %v1384_v8 = vmul.f32 %v1381_v63, %v4049_v27 }
 0x183   : > { %v652_v18 = vpop.permute.xlu0 %651  ;;  %v4162_v20 = vpop.permute.xlu1 %762  ;;  %v1413_v63 = vsel %vm665_vm4, %v1410_v7, %v1412_v30 }
 0x184   : > { %v656_v52 = vadd.f32 %v652_v18, %v572_v44  ;;  %v4164_v57 = vpop.permute.xlu2 %844  ;;  %v1426_v44 = vmul.f32 %v1423_v15, %v4049_v27  ;;  %v1390_v18 = vsel %vm665_vm4, %v1388_v36, %v1389_v5  ;;  %v1391_v61 = vrot.slane %v1384_v8, 2 }
 0x186   : > { %v4167_v10 = vadd.f32 %v3833_v2, %v656_v52  ;;  %v1342_v2 = vmul.f32 %v1339_v26, %v4049_v27  ;;  %v1367_v26 = vrot.slane %v1361_v12, 2  ;;  %v899_v52 = vstv %s4193_s22  ;;  %s4368_s22 = sld [smem:[#allocation8 + $0x5c]] }
 0x187   : > { %v900_v32 = vmul.f32 %v899_v52, %v3954_v22  ;;  %v1433_v39 = vrot.slane %v1426_v44, 2  ;;  %v1392_v24 = vsel %vm665_vm4, %v1389_v5, %v1391_v61  ;;  %v1445_v12 = vmul.f32 %v1444_v19, %v3954_v22 }
 0x188   : > { %v1349_v53 = vrot.slane %v1342_v2, 2  ;;  %v1369_v46 = vsel %vm665_vm4, %v1367_v26, %v1368_v41  ;;  %v809_v3 = vadd.f32 %v4144_v4, %v4167_v10  ;;  %v1447_v5 = vmul.f32 %v1444_v19, %v4049_v27 }
 0x189   : > { %1241 = vrot.lane.b32.xlu0 %v1238_v51, %s3270_s0  ;;  %1351 = vrot.lane.b32.xlu1 %v1348_v21, %s5401_s27  ;;  %v1431_v21 = vrot.slane %v1425_v1, 2 }
 0x18a   : > { %1262 = vrot.lane.b32.xlu2 %v1259_v11, %s3270_s0  ;;  %v1350_v49 = vsel %vm665_vm4, %v1347_v62, %v1349_v53  ;;  %v1465_v11 = vstv %s2953_s30  ;;  %s2971_s30 = sld [smem:[#allocation8 + $0x16]] }
 0x18b   : > { %v4179_v59 = vpop.permute.xlu0 %760  ;;  %v4181_v33 = vpop.permute.xlu1 %802  ;;  %v1434_v41 = vsel %vm665_vm4, %v1431_v21, %v1433_v39  ;;  %v1466_v58 = vmul.f32 %v1465_v11, %v3954_v22  ;;  %v4231_v53 = vmul.f32 %v1465_v11, %v3978_v23  ;;  %v1468_v44 = vmul.f32 %v1465_v11, %v4049_v27 }
 0x18c   : > { %v868_v43 = vpop.permute.xlu2 %867  ;;  %v766_v55 = vadd.f32 %v4179_v59, %v4102_v35  ;;  %v1451_v35 = vrot.slane %v1445_v12, 2  ;;  %v911_v11 = vstv %s4252_s9  ;;  %v1549_v12 = vstv %s4274_s11  ;;  %s2943_s9 = sld [smem:[#allocation8 + $0xf]] }
 0x18d   : > { %v1475_v30 = vrot.slane %v1468_v44, 2  ;;  %s2976_s11 = sld [smem:[#allocation8 + $0x3b]] }
 0x18e   : > { %v850_v4 = vadd.f32 %v4164_v57, %v766_v55 }
 0x191   : > { %1264 = vrot.lane.b32.xlu0 %v1261_v50, %s3270_s0  ;;  %1374 = vrot.lane.b32.xlu1 %v1371_v56, %s5401_s27  ;;  %v1446_v50 = vmul.f32 %v1444_v19, %v3978_v23  ;;  %v767_v56 = vadd.f32 %v4162_v20, %v4089_v48  ;;  %v1472_v48 = vrot.slane %v1466_v58, 2  ;;  %v1473_v20 = vrot.slane %v4231_v53, 2 }
 0x192   : > { %1353 = vrot.lane.b32.xlu2 %v1350_v49, %s5401_s27 }
 0x193   : > { %v784_v38 = vpop.permute.xlu0 %783  ;;  %v4196_v29 = vpop.permute.xlu1 %825  ;;  %v1452_v59 = vrot.slane %v1446_v50, 2  ;;  %v4299_v50 = vld [vmem:[#allocation2 + $0x30] sm:$0xff] }
 0x194   : > { %v788_v47 = vadd.f32 %v784_v38, %v4128_v14  ;;  %v929_v45 = vpop.permute.xlu2 %928  ;;  %v1411_v14 = vsel %vm665_vm4, %v1409_v54, %v1410_v7  ;;  %v1430_v38 = vrot.slane %v1424_v25, 2  ;;  %v917_v7 = vstv %s4226_s7  ;;  %s4426_s7 = sld [smem:[#allocation8 + $0x82]] }
 0x195   : > { %v1453_v57 = vsel %vm665_vm4, %v1451_v35, %v1452_v59 }
 0x196   : > { %v4199_v34 = vadd.f32 %v868_v43, %v788_v47  ;;  %v905_v43 = vstv %s4202_s29  ;;  %v1486_v47 = vstv %s4218_s5  ;;  %v1432_v8 = vsel %vm665_vm4, %v1430_v38, %v1431_v21  ;;  %s2973_s29 = sld [smem:[#allocation8 + $0x5e]] }
 0x197   : > { %v907_v49 = vmul.f32 %v905_v43, %v3978_v23  ;;  %v906_v36 = vmul.f32 %v905_v43, %v3954_v22  ;;  %v1488_v15 = vmul.f32 %v1486_v47, %v3978_v23  ;;  %v901_v43 = vmul.f32 %v899_v52, %v3978_v23  ;;  %s2972_s5 = sld [smem:[#allocation8 + $0x3a]] }
 0x198   : > { %v1487_v25 = vmul.f32 %v1486_v47, %v3954_v22 }
 0x199   : > { %1372 = vrot.lane.b32.xlu0 %v1369_v46, %s5401_s27  ;;  %1414 = vrot.lane.b32.xlu1 %v1411_v14, %s5401_s27  ;;  %v1474_v46 = vsel %vm665_vm4, %v1472_v48, %v1473_v20  ;;  %v1489_v14 = vmul.f32 %v1486_v47, %v4049_v27  ;;  %v908_v6 = vadd.f32 %v906_v36, %v850_v4 }
 0x19a   : > { %1393 = vrot.lane.b32.xlu2 %v1390_v18, %s5401_s27  ;;  %v808_v18 = vadd.f32 %v4181_v33, %v4110_v31 }
 0x19b   : > { %v824_v62 = vpop.permute.xlu0 %823  ;;  %v4216_v9 = vpop.permute.xlu1 %865  ;;  %v1496_v33 = vrot.slane %v1489_v14, 2  ;;  %v4340_v14 = vstv %s2932_s1  ;;  %s4474_s1 = sld [smem:[#allocation8 + $0x5f]] }
 0x19c   : > { %v829_v0 = vadd.f32 %v824_v62, %v745_v13  ;;  %v945_v51 = vpop.permute.xlu2 %944  ;;  %v918_v13 = vmul.f32 %v917_v7, %v3954_v22 }
 0x19e   : > { %v902_v2 = vadd.f32 %v900_v32, %v829_v0  ;;  %v1454_v32 = vrot.slane %v1447_v5, 2  ;;  %v1494_v0 = vrot.slane %v1488_v15, 2 }
 0x1a0   : > { %v4233_v28 = vadd.f32 %v929_v45, %v902_v2 }
 0x1a1   : > { %1395 = vrot.lane.b32.xlu0 %v1392_v24, %s5401_s27  ;;  %1437 = vrot.lane.b32.xlu1 %v1434_v41, %s3270_s0  ;;  %v1455_v24 = vsel %vm665_vm4, %v1452_v59, %v1454_v32  ;;  %v4353_v32 = vmul.f32 %v4340_v14, %v3978_v23 }
 0x1a2   : > { %1416 = vrot.lane.b32.xlu2 %v1413_v63, %s5401_s27 }
 0x1a3   : > { %v847_v37 = vpop.permute.xlu0 %846  ;;  %v889_v60 = vpop.permute.xlu1 %888 }
 0x1a4   : > { %v851_v45 = vadd.f32 %v847_v37, %v767_v56  ;;  %v4249_v26 = vadd.f32 %v889_v60, %v809_v3  ;;  %v971_v54 = vpop.permute.xlu2 %970  ;;  %v787_v56 = vadd.f32 %v4122_v42, %v4147_v16  ;;  %v1493_v37 = vrot.slane %v1487_v25, 2 }
 0x1a5   : > { %v1535_v60 = vstv %s4281_s8  ;;  %v912_v42 = vmul.f32 %v911_v11, %v3954_v22  ;;  %v1605_v25 = vstv %s4346_s19  ;;  %s2975_s8 = sld [smem:[#allocation8 + $0x17]] }
 0x1a6   : > { %v909_v10 = vadd.f32 %v907_v49, %v851_v45  ;;  %v871_v38 = vadd.f32 %v4216_v9, %v787_v56  ;;  %v1495_v45 = vsel %vm665_vm4, %v1493_v37, %v1494_v0  ;;  %s4556_s19 = sld [smem:[#allocation8 + $0x3d]] }
 0x1a8   : > { %v4262_v1 = vadd.f32 %v945_v51, %v909_v10  ;;  %v746_v51 = vadd.f32 %v4099_v40, %v4125_v17  ;;  %v1497_v40 = vsel %vm665_vm4, %v1494_v0, %v1496_v33  ;;  %v913_v17 = vmul.f32 %v911_v11, %v3978_v23 }
 0x1a9   : > { %1435 = vrot.lane.b32.xlu0 %v1432_v8, %s3270_s0  ;;  %1477 = vrot.lane.b32.xlu1 %v1474_v46, %s3270_s0  ;;  %v914_v16 = vadd.f32 %v912_v42, %v871_v38  ;;  %v1563_v10 = vstv %s4305_s10  ;;  %v1035_v0 = vstv %s2931_s26  ;;  %s4465_s10 = sld [smem:[#allocation8 + $0x57]] }
 0x1aa   : > { %1456 = vrot.lane.b32.xlu2 %v1453_v57, %s3270_s0  ;;  %v830_v2 = vadd.f32 %v4196_v29, %v746_v51  ;;  %v1476_v29 = vsel %vm665_vm4, %v1473_v20, %v1475_v30  ;;  %v915_v52 = vadd.f32 %v913_v17, %v4199_v34  ;;  %v1550_v34 = vmul.f32 %v1549_v12, %v4299_v50  ;;  %v4318_v20 = vld [vmem:[#allocation2 + $0x38] sm:$0xff]  ;;  %s4522_s26 = sld [smem:[#allocation8 + $0x19]] }
 0x1ab   : > { %v887_v62 = vpop.permute.xlu0 %886  ;;  %v943_v61 = vpop.permute.xlu1 %942  ;;  %v1537_v5 = vmul.f32 %v1535_v60, %v4318_v20  ;;  %v1565_v15 = vmul.f32 %v1563_v10, %v4318_v20  ;;  %v1551_v8 = vmul.f32 %v1549_v12, %v4318_v20  ;;  %v1564_v51 = vmul.f32 %v1563_v10, %v4299_v50 }
 0x1ac   : > { %v892_v21 = vadd.f32 %v887_v62, %v808_v18  ;;  %v4278_v39 = vadd.f32 %v943_v61, %v908_v6  ;;  %v987_v31 = vpop.permute.xlu2 %986  ;;  %v903_v58 = vadd.f32 %v901_v43, %v830_v2  ;;  %v1591_v62 = vstv %s4324_s20  ;;  %s4488_s20 = sld [smem:[#allocation8 + $0x33]] }
 0x1ad   : > { %v1053_v61 = vmul.f32 %v4340_v14, %v3954_v22  ;;  %v1060_v30 = vrot.slane %v4353_v32, 1  ;;  %v1037_v11 = vmul.f32 %v1035_v0, %v3978_v23  ;;  %v1038_v2 = vmul.f32 %v1035_v0, %v4049_v27 }
 0x1ae   : > { %v920_v19 = vadd.f32 %v918_v13, %v892_v21  ;;  %v1593_v56 = vmul.f32 %v1591_v62, %v4318_v20  ;;  %v1036_v38 = vmul.f32 %v1035_v0, %v3954_v22  ;;  %v1619_v10 = vstv %s4368_s22  ;;  %s2985_s22 = sld [smem:[#allocation8 + $0x61]] }
 0x1af   : > { %v1059_v33 = vrot.slane %v1053_v61, 1 }
 0x1b0   : > { %v4291_v41 = vadd.f32 %v971_v54, %v920_v19  ;;  %v1536_v54 = vmul.f32 %v1535_v60, %v4299_v50 }
 0x1b1   : > { %1458 = vrot.lane.b32.xlu0 %v1455_v24, %s3270_s0  ;;  %1500 = vrot.lane.b32.xlu1 %v1497_v40, %s3270_s0 }
 0x1b2   : > { %1479 = vrot.lane.b32.xlu2 %v1476_v29, %s3270_s0 }
 0x1b3   : > { %v931_v53 = vpop.permute.xlu0 %930  ;;  %v959_v63 = vpop.permute.xlu1 %958 }
 0x1b4   : > { %v935_v55 = vadd.f32 %v931_v53, %v903_v58  ;;  %v4303_v3 = vadd.f32 %v959_v63, %v915_v52  ;;  %v1013_v49 = vpop.permute.xlu2 %1012  ;;  %v1061_v58 = vsel %vm428_vm3, %v1059_v33, %v1060_v30  ;;  %v1043_v53 = vrot.slane %v1037_v11, 1 }
 0x1b5   : > { %v1045_v63 = vrot.slane %v1038_v2, 1 }
 0x1b6   : > { %v4309_v47 = vadd.f32 %v987_v31, %v935_v55  ;;  %v1069_v31 = vstv %s2933_s6  ;;  %s4526_s6 = sld [smem:[#allocation8 + $0x83]] }
 0x1b7   : > { %v1071_v29 = vmul.f32 %v1069_v31, %v3978_v23  ;;  %v1072_v52 = vmul.f32 %v1069_v31, %v4049_v27  ;;  %v1046_v60 = vsel %vm428_vm3, %v1043_v53, %v1045_v63 }
 0x1b9   : > { %1498 = vrot.lane.b32.xlu0 %v1495_v45, %s3270_s0  ;;  %1554 = vrot.lane.b32.xlu1 %v1550_v34, %s5401_s27  ;;  %v1077_v55 = vrot.slane %v1071_v29, 1  ;;  %v1079_v37 = vrot.slane %v1072_v52, 1  ;;  %v1070_v34 = vmul.f32 %v1069_v31, %v3954_v22  ;;  %v1050_v45 = vadd.f32 %v1046_v60, %v4309_v47 }
 0x1ba   : > { %1540 = vrot.lane.b32.xlu2 %v1536_v54, %s5401_s27  ;;  %v1606_v47 = vmul.f32 %v1605_v25, %v4299_v50 }
 0x1bb   : > { %v957_v9 = vpop.permute.xlu0 %956  ;;  %v985_v48 = vpop.permute.xlu1 %984  ;;  %v1076_v22 = vrot.slane %v1070_v34, 1 }
 0x1bc   : > { %v962_v35 = vadd.f32 %v957_v9, %v914_v16  ;;  %v4321_v59 = vadd.f32 %v985_v48, %v4233_v28  ;;  %v1029_v4 = vpop.permute.xlu2 %1028  ;;  %v919_v28 = vmul.f32 %v917_v7, %v3978_v23  ;;  %v1577_v7 = vstv %s4326_s23  ;;  %v4393_v9 = vld [vmem:[#allocation2 + $0x40] sm:$0x3]  ;;  %s4506_s23 = sld [smem:[#allocation8 + $0x7b]] }
 0x1bd   : > { %v1578_v21 = vmul.f32 %v1577_v7, %v4299_v50  ;;  %v1633_v16 = vstv %s4366_s28  ;;  %s4590_s28 = sld [smem:[#allocation8 + $0x85]] }
 0x1be   : > { %v4328_v36 = vadd.f32 %v1013_v49, %v962_v35  ;;  %v921_v46 = vadd.f32 %v919_v28, %v4249_v26  ;;  %v1086_v28 = vstv %s2934_s4  ;;  %v1635_v52 = vmul.f32 %v1633_v16, %v4318_v20  ;;  %s4622_s4 = sld [smem:[#allocation8 + $0x12]] }
 0x1c1   : > { %1542 = vrot.lane.b32.xlu0 %v1537_v5, %s5401_s27  ;;  %1570 = vrot.lane.b32.xlu1 %v1565_v15, %s5401_s27  ;;  %v1715_v5 = vstv %s2971_s30  ;;  %v1080_v15 = vsel %vm428_vm3, %v1077_v55, %v1079_v37  ;;  %v4446_v37 = vld [vmem:[#allocation2 + $0x18] sm:$0xff]  ;;  %s2987_s30 = sld [smem:[#allocation8 + $0x1a]] }
 0x1c2   : > { %1556 = vrot.lane.b32.xlu2 %v1551_v8, %s5401_s27  ;;  %v1042_v8 = vrot.slane %v1036_v38, 1  ;;  %v1087_v32 = vmul.f32 %v4446_v37, %v1086_v28 }
 0x1c3   : > { %v973_v57 = vpop.permute.xlu0 %972  ;;  %v1001_v44 = vpop.permute.xlu1 %1000 }
 0x1c4   : > { %v977_v18 = vadd.f32 %v973_v57, %v921_v46  ;;  %v4343_v6 = vadd.f32 %v1001_v44, %v4262_v1  ;;  %v1137_v13 = vpop.permute.xlu2 %1136  ;;  %v1592_v1 = vmul.f32 %v1591_v62, %v4299_v50  ;;  %v1634_v57 = vmul.f32 %v1633_v16, %v4299_v50 }
 0x1c5   : > { %v4403_v44 = vmul.f32 %v1715_v5, %v4318_v20  ;;  %v4410_v62 = vmul.f32 %v1086_v28, %v3978_v23  ;;  %v1044_v0 = vsel %vm428_vm3, %v1042_v8, %v1043_v53  ;;  %v1716_v53 = vmul.f32 %v1715_v5, %v4299_v50 }
 0x1c6   : > { %v4355_v26 = vadd.f32 %v1029_v4, %v977_v18  ;;  %v1055_v18 = vmul.f32 %v4340_v14, %v4049_v27  ;;  %v1049_v14 = vadd.f32 %v1044_v0, %v4321_v59  ;;  %v1736_v59 = vstv %s2972_s5  ;;  %s2988_s5 = sld [smem:[#allocation8 + $0x3e]] }
 0x1c7   : > { %v1723_v31 = vrot.slane %v4403_v44, 1  ;;  %v1778_v8 = vstv %s4426_s7  ;;  %s4648_s7 = sld [smem:[#allocation8 + $0x36]] }
 0x1c8   : > { %v1062_v11 = vrot.slane %v1055_v18, 1 }
 0x1c9   : > { %1568 = vrot.lane.b32.xlu0 %v1564_v51, %s5401_s27  ;;  %1596 = vrot.lane.b32.xlu1 %v1592_v1, %s3270_s0  ;;  %v1078_v51 = vsel %vm428_vm3, %v1076_v22, %v1077_v55  ;;  %v1738_v55 = vmul.f32 %v1736_v59, %v4318_v20 }
 0x1ca   : > { %1582 = vrot.lane.b32.xlu2 %v1578_v21, %s5401_s27  ;;  %v1083_v1 = vadd.f32 %v1078_v51, %v4328_v36  ;;  %v1621_v36 = vmul.f32 %v1619_v10, %v4318_v20  ;;  %v1063_v63 = vsel %vm428_vm3, %v1060_v30, %v1062_v11  ;;  %v1820_v51 = vstv %s2976_s11  ;;  %v4480_v11 = vld [vmem:[#allocation2 + $0x20] sm:$0xff]  ;;  %s4663_s11 = sld [smem:[#allocation8 + $0x7e]] }
 0x1cb   : > { %v999_v19 = vpop.permute.xlu0 %998  ;;  %v1027_v24 = vpop.permute.xlu1 %1026  ;;  %v1067_v30 = vadd.f32 %v1063_v63, %v4343_v6 }
 0x1cc   : > { %v1004_v43 = vadd.f32 %v999_v19, %v4278_v39  ;;  %v4372_v40 = vadd.f32 %v1027_v24, %v4291_v41  ;;  %v1160_v17 = vpop.permute.xlu2 %1159  ;;  %v1579_v39 = vmul.f32 %v1577_v7, %v4318_v20  ;;  %v1607_v41 = vmul.f32 %v1605_v25, %v4318_v20 }
 0x1cd   : > { %v1089_v7 = vmul.f32 %v1086_v28, %v4049_v27  ;;  %v1757_v25 = vstv %s2973_s29  ;;  %s2989_s29 = sld [smem:[#allocation8 + $0x62]] }
 0x1ce   : > { %v1066_v12 = vadd.f32 %v1061_v58, %v1004_v43  ;;  %v1094_v43 = vrot.slane %v4410_v62, 1 }
 0x1d0   : > { %v4383_v49 = vadd.f32 %v1137_v13, %v1066_v12  ;;  %v1620_v13 = vmul.f32 %v1619_v10, %v4299_v50 }
 0x1d1   : > { %1584 = vrot.lane.b32.xlu0 %v1579_v39, %s5401_s27  ;;  %1612 = vrot.lane.b32.xlu1 %v1607_v41, %s3270_s0  ;;  %v1758_v39 = vmul.f32 %v1757_v25, %v4299_v50  ;;  %v4440_v41 = vmul.f32 %v1757_v25, %v4318_v20 }
 0x1d2   : > { %1598 = vrot.lane.b32.xlu2 %v1593_v56, %s3270_s0  ;;  %v1737_v56 = vmul.f32 %v1736_v59, %v4299_v50 }
 0x1d3   : > { %v1015_v54 = vpop.permute.xlu0 %1014  ;;  %v1118_v42 = vpop.permute.xlu1 %1117 }
 0x1d4   : > { %v1019_v48 = vadd.f32 %v1015_v54, %v4303_v3  ;;  %v4396_v35 = vadd.f32 %v1118_v42, %v1050_v45  ;;  %v1200_v4 = vpop.permute.xlu2 %1199  ;;  %v1718_v3 = vmul.f32 %v1715_v5, %v4393_v9  ;;  %v1722_v45 = vrot.slane %v1716_v53, 1 }
 0x1d5   : > { %v1743_v10 = vrot.slane %v1737_v56, 1  ;;  %v1744_v5 = vrot.slane %v1738_v55, 1 }
 0x1d6   : > { %v1084_v46 = vadd.f32 %v1080_v15, %v1019_v48  ;;  %v1725_v33 = vrot.slane %v1718_v3, 1  ;;  %v1764_v48 = vrot.slane %v1758_v39, 1  ;;  %v1093_v15 = vrot.slane %v1087_v32, 1 }
 0x1d7   : > { %v1724_v22 = vsel %vm428_vm3, %v1722_v45, %v1723_v31  ;;  %v1760_v3 = vmul.f32 %v1757_v25, %v4393_v9 }
 0x1d8   : > { %v4413_v61 = vadd.f32 %v1160_v17, %v1084_v46  ;;  %v1096_v17 = vrot.slane %v1089_v7, 1  ;;  %v1726_v58 = vsel %vm428_vm3, %v1723_v31, %v1725_v33  ;;  %v4462_v46 = vmul.f32 %v1778_v8, %v4318_v20 }
 0x1d9   : > { %1610 = vrot.lane.b32.xlu0 %v1606_v47, %s3270_s0  ;;  %1638 = vrot.lane.b32.xlu1 %v1634_v57, %s3270_s0  ;;  %v1781_v47 = vmul.f32 %v1778_v8, %v4393_v9  ;;  %v1745_v57 = vsel %vm428_vm3, %v1743_v10, %v1744_v5  ;;  %v1095_v44 = vsel %vm428_vm3, %v1093_v15, %v1094_v43  ;;  %v1767_v33 = vrot.slane %v1760_v3, 1 }
 0x1da   : > { %1624 = vrot.lane.b32.xlu2 %v1620_v13, %s3270_s0  ;;  %v1097_v12 = vsel %vm428_vm3, %v1094_v43, %v1096_v17  ;;  %v1100_v18 = vadd.f32 %v1095_v44, %v4372_v40  ;;  %v1271_v13 = vstv %s2943_s9  ;;  %v1779_v17 = vmul.f32 %v1778_v8, %v4299_v50  ;;  %s2990_s9 = sld [smem:[#allocation8 + $0x86]] }
 0x1db   : > { %v1116_v23 = vpop.permute.xlu0 %1115  ;;  %v1158_v21 = vpop.permute.xlu1 %1157  ;;  %v1101_v60 = vadd.f32 %v1097_v12, %v4355_v26  ;;  %v1739_v26 = vmul.f32 %v1736_v59, %v4393_v9  ;;  %v1788_v31 = vrot.slane %v1781_v47, 1  ;;  %v1273_v40 = vmul.f32 %v4480_v11, %v1271_v13 }
 0x1dc   : > { %v1121_v2 = vadd.f32 %v1116_v23, %v1049_v14  ;;  %v4423_v19 = vadd.f32 %v1158_v21, %v1083_v1  ;;  %v1223_v24 = vpop.permute.xlu2 %1222  ;;  %v1786_v21 = vrot.slane %v4462_v46, 1  ;;  %v4492_v59 = vmul.f32 %v1820_v51, %v4318_v20 }
 0x1dd   : > { %v1746_v0 = vrot.slane %v1739_v26, 1  ;;  %v1279_v63 = vrot.slane %v1273_v40, 2  ;;  %v1272_v39 = vmul.f32 %v4446_v37, %v1271_v13  ;;  %v1288_v26 = vstv %s4488_s20  ;;  %s4730_s20 = sld [smem:[#allocation8 + $0x64]] }
 0x1de   : > { %v4428_v29 = vadd.f32 %v1200_v4, %v1121_v2  ;;  %v1765_v4 = vrot.slane %v4440_v41, 1  ;;  %v1274_v2 = vmul.f32 %v1271_v13, %v4049_v27  ;;  %v1785_v41 = vrot.slane %v1779_v17, 1 }
 0x1df   : > { %v1747_v25 = vsel %vm428_vm3, %v1744_v5, %v1746_v0  ;;  %v1278_v5 = vrot.slane %v1272_v39, 2  ;;  %v1823_v46 = vmul.f32 %v1820_v51, %v4393_v9  ;;  %v1322_v13 = vstv %s4506_s23  ;;  %s2968_s23 = sld [smem:[#allocation8 + $0x39]] }
 0x1e0   : > { %v1766_v28 = vsel %vm428_vm3, %v1764_v48, %v1765_v4  ;;  %v1768_v53 = vsel %vm428_vm3, %v1765_v4, %v1767_v33  ;;  %v1281_v12 = vrot.slane %v1274_v2, 2  ;;  %v1787_v47 = vsel %vm428_vm3, %v1785_v41, %v1786_v21 }
 0x1e1   : > { %1626 = vrot.lane.b32.xlu0 %v1621_v36, %s3270_s0  ;;  %1729 = vrot.lane.b32.xlu1 %v1726_v58, %s5401_s27  ;;  %v1789_v36 = vsel %vm428_vm3, %v1786_v21, %v1788_v31  ;;  %v1830_v2 = vrot.slane %v1823_v46, 1 }
 0x1e2   : > { %1640 = vrot.lane.b32.xlu2 %v1635_v52, %s3270_s0  ;;  %v4500_v52 = vstv %s4465_s10  ;;  %v1282_v10 = vsel %vm665_vm4, %v1279_v63, %v1281_v12  ;;  %s4705_s10 = sld [smem:[#allocation8 + $0x40]] }
 0x1e3   : > { %v1139_v38 = vpop.permute.xlu0 %1138  ;;  %v1181_v34 = vpop.permute.xlu1 %1180 }
 0x1e4   : > { %v1143_v54 = vadd.f32 %v1139_v38, %v1067_v30  ;;  %v4452_v42 = vadd.f32 %v1181_v34, %v1101_v60  ;;  %v1263_v16 = vpop.permute.xlu2 %1262  ;;  %v1828_v30 = vrot.slane %v4492_v59, 1  ;;  %v1306_v60 = vmul.f32 %v4446_v37, %v4500_v52 }
 0x1e5   : > { %v4514_v38 = vmul.f32 %v4480_v11, %v4500_v52  ;;  %v1841_v34 = vstv %s4474_s1  ;;  %s4708_s1 = sld [smem:[#allocation8 + $0x1c]] }
 0x1e6   : > { %v4456_v6 = vadd.f32 %v1223_v24, %v1143_v54  ;;  %v1799_v24 = vstv %s2975_s8  ;;  %v1831_v39 = vsel %vm428_vm3, %v1828_v30, %v1830_v2  ;;  %s4682_s8 = sld [smem:[#allocation8 + $0x5a]] }
 0x1e7   : > { %v1800_v58 = vmul.f32 %v1799_v24, %v4299_v50  ;;  %v4497_v27 = vmul.f32 %v1799_v24, %v4318_v20  ;;  %v1802_v15 = vmul.f32 %v1799_v24, %v4393_v9 }
 0x1e9   : > { %1727 = vrot.lane.b32.xlu0 %v1724_v22, %s5401_s27  ;;  %1769 = vrot.lane.b32.xlu1 %v1766_v28, %s5401_s27  ;;  %v1806_v48 = vrot.slane %v1800_v58, 1  ;;  %v1807_v4 = vrot.slane %v4497_v27, 1  ;;  %v1312_v22 = vrot.slane %v1306_v60, 2  ;;  %v1313_v28 = vrot.slane %v4514_v38, 2 }
 0x1ea   : > { %1748 = vrot.lane.b32.xlu2 %v1745_v57, %s5401_s27  ;;  %v1862_v27 = vstv %s4526_s6  ;;  %s4751_s6 = sld [smem:[#allocation8 + $0x88]] }
 0x1eb   : > { %v1179_v62 = vpop.permute.xlu0 %1178  ;;  %v1221_v7 = vpop.permute.xlu1 %1220  ;;  %v1808_v44 = vsel %vm428_vm3, %v1806_v48, %v1807_v4  ;;  %v1314_v31 = vsel %vm665_vm4, %v1312_v22, %v1313_v28  ;;  %v1323_v48 = vmul.f32 %v4446_v37, %v1322_v13 }
 0x1ec   : > { %v1184_v14 = vadd.f32 %v1179_v62, %v1100_v18  ;;  %v4477_v1 = vadd.f32 %v1221_v7, %v4383_v49  ;;  %v1354_v23 = vpop.permute.xlu2 %1353  ;;  %v1821_v49 = vmul.f32 %v1820_v51, %v4299_v50  ;;  %v1280_v18 = vsel %vm665_vm4, %v1278_v5, %v1279_v63  ;;  %v4547_v7 = vld [vmem:[#allocation2 + $0x28] sm:$0x3] }
 0x1ed   : > { %v4545_v62 = vmul.f32 %v4480_v11, %v1288_v26  ;;  %v1291_v0 = vmul.f32 %v4547_v7, %v1288_v26  ;;  %v1285_v51 = vadd.f32 %v1280_v18, %v4428_v29  ;;  %v1324_v29 = vmul.f32 %v4480_v11, %v1322_v13 }
 0x1ee   : > { %v4484_v43 = vadd.f32 %v1263_v16, %v1184_v14  ;;  %v1827_v56 = vrot.slane %v1821_v49, 1  ;;  %v1809_v14 = vrot.slane %v1802_v15, 1  ;;  %v1325_v59 = vmul.f32 %v4547_v7, %v1322_v13 }
 0x1ef   : > { %v1298_v58 = vrot.slane %v1291_v0, 2  ;;  %v1865_v13 = vmul.f32 %v1862_v27, %v4393_v9 }
 0x1f0   : > { %v1829_v57 = vsel %vm428_vm3, %v1827_v56, %v1828_v30  ;;  %v1810_v63 = vsel %vm428_vm3, %v1807_v4, %v1809_v14  ;;  %v1330_v56 = vrot.slane %v1324_v29, 2  ;;  %v1332_v30 = vrot.slane %v1325_v59, 2 }
 0x1f1   : > { %1750 = vrot.lane.b32.xlu0 %v1747_v25, %s5401_s27  ;;  %1792 = vrot.lane.b32.xlu1 %v1789_v36, %s5401_s27  ;;  %v1951_v25 = vstv %s4522_s26  ;;  %v1296_v36 = vrot.slane %v4545_v62, 2  ;;  %v1872_v29 = vrot.slane %v1865_v13, 1  ;;  %s4749_s26 = sld [smem:[#allocation8 + $0x1d]] }
 0x1f2   : > { %1771 = vrot.lane.b32.xlu2 %v1768_v53, %s5401_s27  ;;  %v1952_v41 = vmul.f32 %v1951_v25, %v4299_v50  ;;  %v4572_v11 = vmul.f32 %v1951_v25, %v4318_v20  ;;  %v1954_v14 = vmul.f32 %v1951_v25, %v4393_v9 }
 0x1f3   : > { %v1202_v55 = vpop.permute.xlu0 %1201  ;;  %v1244_v32 = vpop.permute.xlu1 %1243 }
 0x1f4   : > { %v1206_v45 = vadd.f32 %v1202_v55, %v4396_v35  ;;  %v4519_v54 = vadd.f32 %v1244_v32, %v4413_v61  ;;  %v1394_v16 = vpop.permute.xlu2 %1393  ;;  %v4529_v35 = vmul.f32 %v1841_v34, %v4318_v20  ;;  %v1844_v61 = vmul.f32 %v1841_v34, %v4393_v9 }
 0x1f5   : > { %v1863_v55 = vmul.f32 %v1862_v27, %v4299_v50  ;;  %v1864_v32 = vmul.f32 %v1862_v27, %v4318_v20 }
 0x1f6   : > { %v1286_v8 = vadd.f32 %v1282_v10, %v1206_v45  ;;  %v1851_v21 = vrot.slane %v1844_v61, 1  ;;  %v1289_v45 = vmul.f32 %v4446_v37, %v1288_v26  ;;  %v1333_v37 = vsel %vm665_vm4, %v1330_v56, %v1332_v30 }
 0x1f7   : > { %v1870_v26 = vrot.slane %v1864_v32, 1 }
 0x1f8   : > { %v4538_v3 = vadd.f32 %v1354_v23, %v1286_v8  ;;  %v1849_v23 = vrot.slane %v4529_v35, 1  ;;  %v1959_v8 = vrot.slane %v4572_v11, 2  ;;  %v1972_v35 = vstv %s4556_s19  ;;  %s2967_s19 = sld [smem:[#allocation8 + $0x15]] }
 0x1f9   : > { %1790 = vrot.lane.b32.xlu0 %v1787_v47, %s5401_s27  ;;  %1832 = vrot.lane.b32.xlu1 %v1829_v57, %s3270_s0  ;;  %v1869_v47 = vrot.slane %v1863_v55, 1  ;;  %v1295_v57 = vrot.slane %v1289_v45, 2  ;;  %v1974_v62 = vmul.f32 %v1972_v35, %v4318_v20 }
 0x1fa   : > { %1811 = vrot.lane.b32.xlu2 %v1808_v44, %s3270_s0  ;;  %v1852_v12 = vsel %vm428_vm3, %v1849_v23, %v1851_v21 }
 0x1fb   : > { %v1242_v33 = vpop.permute.xlu0 %1241  ;;  %v1352_v40 = vpop.permute.xlu1 %1351  ;;  %v1980_v25 = vrot.slane %v1974_v62, 2 }
 0x1fc   : > { %v1247_v24 = vadd.f32 %v1242_v33, %v4423_v19  ;;  %v4559_v17 = vadd.f32 %v1352_v40, %v1285_v51  ;;  %v1417_v49 = vpop.permute.xlu2 %1416  ;;  %v1842_v19 = vmul.f32 %v1841_v34, %v4299_v50  ;;  %v1299_v34 = vsel %vm665_vm4, %v1296_v36, %v1298_v58 }
 0x1fd   : > { %v1303_v4 = vadd.f32 %v1299_v34, %v4456_v6  ;;  %v1329_v6 = vrot.slane %v1323_v48, 2  ;;  %v1871_v51 = vsel %vm428_vm3, %v1869_v47, %v1870_v26  ;;  %v1308_v33 = vmul.f32 %v4547_v7, %v4500_v52 }
 0x1fe   : > { %v1319_v53 = vadd.f32 %v1314_v31, %v1247_v24  ;;  %v1848_v15 = vrot.slane %v1842_v19, 1  ;;  %v1993_v7 = vstv %s2985_s22  ;;  %s4771_s22 = sld [smem:[#allocation8 + $0x41]] }
 0x1ff   : > { %v1331_v31 = vsel %vm665_vm4, %v1329_v6, %v1330_v56  ;;  %v1994_v55 = vmul.f32 %v1993_v7, %v4299_v50  ;;  %v1995_v32 = vmul.f32 %v1993_v7, %v4318_v20 }
 0x200   : > { %v4576_v60 = vadd.f32 %v1394_v16, %v1319_v53  ;;  %v1958_v16 = vrot.slane %v1952_v41, 2  ;;  %v1850_v18 = vsel %vm428_vm3, %v1848_v15, %v1849_v23  ;;  %v1297_v23 = vsel %vm665_vm4, %v1295_v57, %v1296_v36 }
 0x201   : > { %1813 = vrot.lane.b32.xlu0 %v1810_v63, %s3270_s0  ;;  %1855 = vrot.lane.b32.xlu1 %v1852_v12, %s3270_s0  ;;  %v1302_v40 = vadd.f32 %v1297_v23, %v4477_v1  ;;  %v1336_v2 = vadd.f32 %v1331_v31, %v4484_v43  ;;  %v1961_v53 = vrot.slane %v1954_v14, 2  ;;  %v2014_v63 = vstv %s4590_s28  ;;  %s2969_s28 = sld [smem:[#allocation8 + $0x5d]] }
 0x202   : > { %1834 = vrot.lane.b32.xlu2 %v1831_v39, %s3270_s0  ;;  %v1960_v0 = vsel %vm665_vm4, %v1958_v16, %v1959_v8  ;;  %v1315_v12 = vrot.slane %v1308_v33, 2  ;;  %v1973_v1 = vmul.f32 %v1972_v35, %v4299_v50  ;;  %v2015_v43 = vmul.f32 %v2014_v63, %v4299_v50 }
 0x203   : > { %v1265_v10 = vpop.permute.xlu0 %1264  ;;  %v1375_v5 = vpop.permute.xlu1 %1374  ;;  %v1873_v39 = vsel %vm428_vm3, %v1870_v26, %v1872_v29  ;;  %v1962_v41 = vsel %vm665_vm4, %v1959_v8, %v1961_v53  ;;  %v2016_v11 = vmul.f32 %v2014_v63, %v4318_v20  ;;  %v2000_v16 = vrot.slane %v1994_v55, 2 }
 0x204   : > { %v1269_v61 = vadd.f32 %v1265_v10, %v4452_v42  ;;  %v4588_v22 = vadd.f32 %v1375_v5, %v1303_v4  ;;  %v1457_v46 = vpop.permute.xlu2 %1456  ;;  %v1975_v42 = vmul.f32 %v1972_v35, %v4393_v9  ;;  %v1316_v56 = vsel %vm665_vm4, %v1313_v28, %v1315_v12 }
 0x205   : > { %v1320_v30 = vadd.f32 %v1316_v56, %v4519_v54  ;;  %v1979_v48 = vrot.slane %v1973_v1, 2  ;;  %v2021_v4 = vrot.slane %v2015_v43, 2  ;;  %v2022_v15 = vrot.slane %v2016_v11, 2 }
 0x206   : > { %v1337_v44 = vadd.f32 %v1333_v37, %v1269_v61  ;;  %v1982_v59 = vrot.slane %v1975_v42, 2  ;;  %v2035_v28 = vstv %s2987_s30  ;;  %v2001_v8 = vrot.slane %v1995_v32, 2  ;;  %s4791_s30 = sld [smem:[#allocation8 + $0x89]] }
 0x207   : > { %v1996_v54 = vmul.f32 %v1993_v7, %v4393_v9  ;;  %v2037_v61 = vmul.f32 %v2035_v28, %v4318_v20  ;;  %v2023_v47 = vsel %vm665_vm4, %v2021_v4, %v2022_v15  ;;  %v2038_v26 = vmul.f32 %v2035_v28, %v4393_v9 }
 0x208   : > { %v4600_v21 = vadd.f32 %v1417_v49, %v1337_v44  ;;  %v1983_v19 = vsel %vm665_vm4, %v1980_v25, %v1982_v59  ;;  %v2002_v37 = vsel %vm665_vm4, %v2000_v16, %v2001_v8  ;;  %v2017_v57 = vmul.f32 %v2014_v63, %v4393_v9 }
 0x209   : > { %1853 = vrot.lane.b32.xlu0 %v1850_v18, %s3270_s0  ;;  %1963 = vrot.lane.b32.xlu1 %v1960_v0, %s5401_s27  ;;  %v2003_v13 = vrot.slane %v1996_v54, 2  ;;  %v2043_v62 = vrot.slane %v2037_v61, 2  ;;  %v2045_v14 = vrot.slane %v2038_v26, 2  ;;  %v2077_v23 = vstv %s2989_s29  ;;  %s4803_s29 = sld [smem:[#allocation8 + $0x65]] }
 0x20a   : > { %1874 = vrot.lane.b32.xlu2 %v1871_v51, %s3270_s0  ;;  %v2024_v31 = vrot.slane %v2017_v57, 2  ;;  %v1517_v59 = vstv %s4648_s7  ;;  %v2098_v55 = vstv %s2990_s9  ;;  %s4823_s7 = sld [smem:[#allocation8 + $0x67]] }
 0x20b   : > { %v1373_v24 = vpop.permute.xlu0 %1372  ;;  %v1415_v49 = vpop.permute.xlu1 %1414  ;;  %v1519_v43 = vmul.f32 %v1517_v59, %v4318_v20  ;;  %v2101_v4 = vmul.f32 %v2098_v55, %v4393_v9  ;;  %s4829_s9 = sld [smem:[#allocation8 + $0x43]] }
 0x20c   : > { %v1378_v58 = vadd.f32 %v1373_v24, %v1302_v40  ;;  %v4611_v27 = vadd.f32 %v1415_v49, %v1336_v2  ;;  %v1480_v36 = vpop.permute.xlu2 %1479  ;;  %v2056_v40 = vstv %s2988_s5  ;;  %v2036_v2 = vmul.f32 %v2035_v28, %v4299_v50  ;;  %s2970_s5 = sld [smem:[#allocation8 + $0x81]] }
 0x20d   : > { %v2078_v24 = vmul.f32 %v2077_v23, %v4299_v50  ;;  %v4661_v49 = vmul.f32 %v2077_v23, %v4318_v20  ;;  %v2108_v57 = vrot.slane %v2101_v4, 2 }
 0x20e   : > { %v4614_v52 = vadd.f32 %v1457_v46, %v1378_v58  ;;  %v1981_v46 = vsel %vm665_vm4, %v1979_v48, %v1980_v25  ;;  %v2025_v25 = vsel %vm665_vm4, %v2022_v15, %v2024_v31  ;;  %v2057_v58 = vmul.f32 %v2056_v40, %v4299_v50 }
 0x20f   : > { %v2042_v12 = vrot.slane %v2036_v2, 2  ;;  %v2084_v7 = vrot.slane %v2078_v24, 2  ;;  %v2085_v1 = vrot.slane %v4661_v49, 2  ;;  %v2059_v48 = vmul.f32 %v2056_v40, %v4393_v9 }
 0x210   : > { %v2063_v11 = vrot.slane %v2057_v58, 2  ;;  %v2080_v15 = vmul.f32 %v2077_v23, %v4393_v9 }
 0x211   : > { %1876 = vrot.lane.b32.xlu0 %v1873_v39, %s3270_s0  ;;  %1986 = vrot.lane.b32.xlu1 %v1983_v19, %s5401_s27  ;;  %v2066_v61 = vrot.slane %v2059_v48, 2 }
 0x212   : > { %1965 = vrot.lane.b32.xlu2 %v1962_v41, %s5401_s27 }
 0x213   : > { %v1396_v34 = vpop.permute.xlu0 %1395  ;;  %v1438_v45 = vpop.permute.xlu1 %1437 }
 0x214   : > { %v1400_v10 = vadd.f32 %v1396_v34, %v1320_v30  ;;  %v4634_v5 = vadd.f32 %v1438_v45, %v4538_v3  ;;  %v1541_v38 = vpop.permute.xlu2 %1540  ;;  %v1511_v3 = vstv %s4622_s4  ;;  %v2044_v30 = vsel %vm665_vm4, %v2042_v12, %v2043_v62  ;;  %s3007_s4 = sld [smem:[#allocation8 + $0x1f]] }
 0x215   : > { %v1512_v6 = vmul.f32 %v1511_v3, %v4299_v50  ;;  %v2086_v34 = vsel %vm665_vm4, %v2084_v7, %v2085_v1  ;;  %v1529_v45 = vstv %s4663_s11  ;;  %v4743_v7 = vld [vmem:[#allocation2 + $0x50] sm:$0xff]  ;;  %s4857_s11 = sld [smem:[#allocation8 + $0x8b]] }
 0x216   : > { %v4636_v35 = vadd.f32 %v1480_v36, %v1400_v10  ;;  %v2058_v36 = vmul.f32 %v2056_v40, %v4318_v20  ;;  %v1530_v16 = vmul.f32 %v1529_v45, %v4299_v50  ;;  %v4725_v40 = vld [vmem:[#allocation2 + $0x48] sm:$0xff] }
 0x218   : > { %v2064_v56 = vrot.slane %v2058_v36, 2 }
 0x219   : > { %1984 = vrot.lane.b32.xlu0 %v1981_v46, %s5401_s27  ;;  %2026 = vrot.lane.b32.xlu1 %v2023_v47, %s5401_s27 }
 0x21a   : > { %2005 = vrot.lane.b32.xlu2 %v2002_v37, %s5401_s27 }
 0x21b   : > { %v1436_v44 = vpop.permute.xlu0 %1435  ;;  %v1478_v18 = vpop.permute.xlu1 %1477 }
 0x21c   : > { %v1441_v42 = vadd.f32 %v1436_v44, %v4559_v17  ;;  %v4656_v0 = vadd.f32 %v1478_v18, %v4576_v60  ;;  %v1557_v51 = vpop.permute.xlu2 %1556  ;;  %v2004_v17 = vsel %vm665_vm4, %v2001_v8, %v2003_v13  ;;  %v2046_v60 = vsel %vm665_vm4, %v2043_v62, %v2045_v14 }
 0x21d   : > { %v1523_v44 = vstv %s4682_s8  ;;  %v1513_v18 = vmul.f32 %v1511_v3, %v4318_v20  ;;  %v2099_v13 = vmul.f32 %v2098_v55, %v4299_v50  ;;  %v2067_v62 = vsel %vm665_vm4, %v2064_v56, %v2066_v61  ;;  %s2979_s8 = sld [smem:[#allocation8 + $0x18]] }
 0x21e   : > { %v1514_v33 = vadd.f32 %v1512_v6, %v1441_v42  ;;  %v2087_v6 = vrot.slane %v2080_v15, 2  ;;  %v1525_v42 = vmul.f32 %v1523_v44, %v4318_v20  ;;  %v1524_v36 = vmul.f32 %v1523_v44, %v4299_v50 }
 0x21f   : > { %v1515_v3 = vadd.f32 %v1513_v18, %v4634_v5  ;;  %v1681_v61 = vstv %s2969_s28  ;;  %s4965_s28 = sld [smem:[#allocation8 + $0x8c]] }
 0x220   : > { %v4667_v29 = vadd.f32 %v1541_v38, %v1514_v33  ;;  %v2065_v38 = vsel %vm665_vm4, %v2063_v11, %v2064_v56  ;;  %v2088_v14 = vsel %vm665_vm4, %v2085_v1, %v2087_v6  ;;  %v1527_v23 = vadd.f32 %v1525_v42, %v4636_v35 }
 0x221   : > { %2007 = vrot.lane.b32.xlu0 %v2004_v17, %s5401_s27  ;;  %2049 = vrot.lane.b32.xlu1 %v2046_v60, %s3270_s0  ;;  %v2105_v17 = vrot.slane %v2099_v13, 2  ;;  %v2161_v60 = vstv %s4705_s10  ;;  %v2217_v13 = vstv %s4771_s22  ;;  %v1684_v42 = vmul.f32 %v1681_v61, %v4393_v9  ;;  %s4882_s10 = sld [smem:[#allocation8 + $0x44]] }
 0x222   : > { %2028 = vrot.lane.b32.xlu2 %v2025_v25, %s5401_s27  ;;  %v2147_v25 = vstv %s4708_s1  ;;  %v2162_v5 = vmul.f32 %v2161_v60, %v4725_v40  ;;  %s4888_s1 = sld [smem:[#allocation8 + $0x20]] }
 0x223   : > { %v1459_v53 = vpop.permute.xlu0 %1458  ;;  %v1501_v63 = vpop.permute.xlu1 %1500  ;;  %v2148_v58 = vmul.f32 %v2147_v25, %v4725_v40  ;;  %s5000_s22 = sld [smem:[#allocation8 + $0x46]] }
 0x224   : > { %v1463_v39 = vadd.f32 %v1459_v53, %v4588_v22  ;;  %v4680_v19 = vadd.f32 %v1501_v63, %v4600_v21  ;;  %v1583_v41 = vpop.permute.xlu2 %1582  ;;  %v1518_v22 = vmul.f32 %v1517_v59, %v4299_v50  ;;  %v2100_v21 = vmul.f32 %v2098_v55, %v4318_v20 }
 0x225   : > { %v1526_v53 = vadd.f32 %v1524_v36, %v4656_v0  ;;  %v2149_v0 = vmul.f32 %v2147_v25, %v4743_v7  ;;  %v2163_v55 = vmul.f32 %v2161_v60, %v4743_v7  ;;  %v2245_v36 = vstv %s4791_s30  ;;  %s3022_s30 = sld [smem:[#allocation8 + $0x8e]] }
 0x226   : > { %v1521_v32 = vadd.f32 %v1519_v43, %v1463_v39  ;;  %v1520_v28 = vadd.f32 %v1518_v22, %v4614_v52  ;;  %v2106_v37 = vrot.slane %v2100_v21, 2 }
 0x228   : > { %v4691_v10 = vadd.f32 %v1557_v51, %v1521_v32  ;;  %v2107_v35 = vsel %vm665_vm4, %v2105_v17, %v2106_v37  ;;  %v1691_v17 = vrot.slane %v1684_v42, 1 }
 0x229   : > { %2047 = vrot.lane.b32.xlu0 %v2044_v30, %s3270_s0  ;;  %2089 = vrot.lane.b32.xlu1 %v2086_v34, %s3270_s0  ;;  %v4765_v30 = vstv %s2968_s23  ;;  %s4916_s23 = sld [smem:[#allocation8 + $0x3c]] }
 0x22a   : > { %2068 = vrot.lane.b32.xlu2 %v2065_v38, %s3270_s0  ;;  %v2203_v38 = vstv %s4749_s26  ;;  %v1665_v15 = vmul.f32 %v4765_v30, %v4299_v50  ;;  %s3013_s26 = sld [smem:[#allocation8 + $0x68]] }
 0x22b   : > { %v1499_v8 = vpop.permute.xlu0 %1498  ;;  %v1555_v54 = vpop.permute.xlu1 %1554 }
 0x22c   : > { %v1504_v46 = vadd.f32 %v1499_v8, %v4611_v27  ;;  %v4703_v47 = vadd.f32 %v1555_v54, %v1520_v28  ;;  %v1599_v26 = vpop.permute.xlu2 %1598  ;;  %v2109_v27 = vsel %vm665_vm4, %v2106_v37, %v2108_v57  ;;  %v4778_v28 = vmul.f32 %v4765_v30, %v4318_v20 }
 0x22d   : > { %v1671_v50 = vrot.slane %v1665_v15, 1 }
 0x22e   : > { %v1532_v52 = vadd.f32 %v1530_v16, %v1504_v46  ;;  %v1647_v16 = vstv %s2967_s19  ;;  %v1672_v46 = vrot.slane %v4778_v28, 1  ;;  %s4954_s19 = sld [smem:[#allocation8 + $0x22]] }
 0x22f   : > { %v1650_v37 = vmul.f32 %v1647_v16, %v4393_v9 }
 0x230   : > { %v4717_v51 = vadd.f32 %v1583_v41, %v1532_v52  ;;  %v2175_v41 = vstv %s4730_s20  ;;  %s4909_s20 = sld [smem:[#allocation8 + $0x60]] }
 0x231   : > { %2070 = vrot.lane.b32.xlu0 %v2067_v62, %s3270_s0  ;;  %2112 = vrot.lane.b32.xlu1 %v2109_v27, %s3270_s0  ;;  %v2177_v56 = vmul.f32 %v2175_v41, %v4743_v7  ;;  %v2176_v8 = vmul.f32 %v2175_v41, %v4725_v40  ;;  %v1683_v62 = vmul.f32 %v1681_v61, %v4318_v20  ;;  %v4825_v41 = vld [vmem:[#allocation2 + $0x58] sm:$0x3] }
 0x232   : > { %2091 = vrot.lane.b32.xlu2 %v2088_v14, %s3270_s0  ;;  %v1673_v27 = vsel %vm428_vm3, %v1671_v50, %v1672_v46 }
 0x233   : > { %v1543_v31 = vpop.permute.xlu0 %1542  ;;  %v1571_v33 = vpop.permute.xlu1 %1570 }
 0x234   : > { %v1547_v2 = vadd.f32 %v1543_v31, %v1515_v3  ;;  %v4727_v24 = vadd.f32 %v1571_v33, %v1527_v23  ;;  %v1625_v49 = vpop.permute.xlu2 %1624  ;;  %v1657_v3 = vrot.slane %v1650_v37, 1  ;;  %v4808_v31 = vld [vmem:[#allocation2 + $0x30] sm:$0xff] }
 0x235   : > { %v1648_v33 = vmul.f32 %v4808_v31, %v1647_v16  ;;  %v1682_v25 = vmul.f32 %v4808_v31, %v1681_v61 }
 0x236   : > { %v4733_v59 = vadd.f32 %v1599_v26, %v1547_v2  ;;  %v1649_v26 = vmul.f32 %v1647_v16, %v4318_v20  ;;  %v4846_v16 = vld [vmem:[#allocation2 + $0x38] sm:$0xff] }
 0x238   : > { %v1655_v14 = vrot.slane %v1649_v26, 1 }
 0x239   : > { %2110 = vrot.lane.b32.xlu0 %v2107_v35, %s3270_s0  ;;  %2166 = vrot.lane.b32.xlu1 %v2162_v5, %s5401_s27 }
 0x23a   : > { %2152 = vrot.lane.b32.xlu2 %v2148_v58, %s5401_s27  ;;  %v1658_v60 = vsel %vm428_vm3, %v1655_v14, %v1657_v3 }
 0x23b   : > { %v1569_v63 = vpop.permute.xlu0 %1568  ;;  %v1597_v12 = vpop.permute.xlu1 %1596  ;;  %v1662_v5 = vadd.f32 %v1658_v60, %v4733_v59 }
 0x23c   : > { %v1574_v1 = vadd.f32 %v1569_v63, %v1526_v53  ;;  %v4746_v43 = vadd.f32 %v1597_v12, %v4667_v29  ;;  %v1641_v39 = vpop.permute.xlu2 %1640  ;;  %v1531_v29 = vmul.f32 %v1529_v45, %v4318_v20  ;;  %v2189_v45 = vstv %s4751_s6  ;;  %s4934_s6 = sld [smem:[#allocation8 + $0x84]] }
 0x23d   : > { %v2190_v54 = vmul.f32 %v2189_v45, %v4725_v40  ;;  %v2205_v20 = vmul.f32 %v2203_v38, %v4743_v7 }
 0x23e   : > { %v4753_v11 = vadd.f32 %v1625_v49, %v1574_v1  ;;  %v1533_v32 = vadd.f32 %v1531_v29, %v4680_v19  ;;  %v1689_v49 = vrot.slane %v1683_v62, 1  ;;  %v1654_v1 = vrot.slane %v1648_v33, 1 }
 0x23f   : > { %v1698_v29 = vstv %s2970_s5  ;;  %s5056_s5 = sld [smem:[#allocation8 + $0x1b]] }
 0x241   : > { %2154 = vrot.lane.b32.xlu0 %v2149_v0, %s5401_s27  ;;  %2182 = vrot.lane.b32.xlu1 %v2177_v56, %s5401_s27  ;;  %v1692_v0 = vsel %vm428_vm3, %v1689_v49, %v1691_v17  ;;  %v2231_v56 = vstv %s4803_s29  ;;  %v1699_v17 = vmul.f32 %v4808_v31, %v1698_v29  ;;  %s3023_s29 = sld [smem:[#allocation8 + $0x23]] }
 0x242   : > { %2168 = vrot.lane.b32.xlu2 %v2163_v55, %s5401_s27  ;;  %v1688_v55 = vrot.slane %v1682_v25, 1 }
 0x243   : > { %v1585_v34 = vpop.permute.xlu0 %1584  ;;  %v1613_v48 = vpop.permute.xlu1 %1612 }
 0x244   : > { %v1589_v22 = vadd.f32 %v1585_v34, %v1533_v32  ;;  %v4768_v21 = vadd.f32 %v1613_v48, %v4691_v10  ;;  %v1749_v4 = vpop.permute.xlu2 %1748  ;;  %v2204_v10 = vmul.f32 %v2203_v38, %v4725_v40  ;;  %v2218_v32 = vmul.f32 %v2217_v13, %v4725_v40 }
 0x245   : > { %v1667_v48 = vmul.f32 %v4765_v30, %v4393_v9  ;;  %v1690_v15 = vsel %vm428_vm3, %v1688_v55, %v1689_v49  ;;  %v1701_v30 = vmul.f32 %v1698_v29, %v4393_v9 }
 0x246   : > { %v4780_v19 = vadd.f32 %v1641_v39, %v1589_v22  ;;  %v2327_v39 = vstv %s3007_s4  ;;  %v2232_v22 = vmul.f32 %v2231_v56, %v4725_v40  ;;  %s3021_s4 = sld [smem:[#allocation8 + $0x6a]] }
 0x247   : > { %v4834_v34 = vmul.f32 %v2327_v39, %v4743_v7  ;;  %v2330_v38 = vmul.f32 %v2327_v39, %v4825_v41  ;;  %v1674_v37 = vrot.slane %v1667_v48, 1  ;;  %v1708_v62 = vrot.slane %v1701_v30, 1 }
 0x249   : > { %2180 = vrot.lane.b32.xlu0 %v2176_v8, %s5401_s27  ;;  %2208 = vrot.lane.b32.xlu1 %v2204_v10, %s3270_s0  ;;  %v1700_v8 = vmul.f32 %v4846_v16, %v1698_v29  ;;  %v2335_v26 = vrot.slane %v4834_v34, 1 }
 0x24a   : > { %2194 = vrot.lane.b32.xlu2 %v2190_v54, %s5401_s27  ;;  %v1695_v54 = vadd.f32 %v1690_v15, %v4753_v11  ;;  %v2247_v11 = vmul.f32 %v2245_v36, %v4743_v7 }
 0x24b   : > { %v1611_v57 = vpop.permute.xlu0 %1610  ;;  %v1639_v6 = vpop.permute.xlu1 %1638  ;;  %v1706_v9 = vrot.slane %v1700_v8, 1 }
 0x24c   : > { %v1616_v44 = vadd.f32 %v1611_v57, %v4703_v47  ;;  %v4795_v52 = vadd.f32 %v1639_v6, %v4717_v51  ;;  %v1772_v18 = vpop.permute.xlu2 %1771  ;;  %v2191_v47 = vmul.f32 %v2189_v45, %v4743_v7  ;;  %v2219_v51 = vmul.f32 %v2217_v13, %v4743_v7 }
 0x24d   : > { %v2369_v13 = vstv %s4823_s7  ;;  %v1709_v33 = vsel %vm428_vm3, %v1706_v9, %v1708_v62  ;;  %s3025_s7 = sld [smem:[#allocation8 + $0x6b]] }
 0x24e   : > { %v1678_v23 = vadd.f32 %v1673_v27, %v1616_v44  ;;  %v2348_v27 = vstv %s4829_s9  ;;  %v2370_v3 = vmul.f32 %v2369_v13, %v4725_v40  ;;  %s3024_s9 = sld [smem:[#allocation8 + $0x47]] }
 0x24f   : > { %v2350_v49 = vmul.f32 %v2348_v27, %v4743_v7 }
 0x250   : > { %v4811_v2 = vadd.f32 %v1749_v4, %v1678_v23  ;;  %v1656_v4 = vsel %vm428_vm3, %v1654_v1, %v1655_v14  ;;  %v2328_v14 = vmul.f32 %v2327_v39, %v4725_v40  ;;  %v2390_v1 = vstv %s4857_s11  ;;  %s5074_s11 = sld [smem:[#allocation8 + $0x3f]] }
 0x251   : > { %2196 = vrot.lane.b32.xlu0 %v2191_v47, %s5401_s27  ;;  %2224 = vrot.lane.b32.xlu1 %v2219_v51, %s3270_s0  ;;  %v1661_v10 = vadd.f32 %v1656_v4, %v4746_v43  ;;  %v2233_v43 = vmul.f32 %v2231_v56, %v4743_v7  ;;  %v1675_v47 = vsel %vm428_vm3, %v1672_v46, %v1674_v37 }
 0x252   : > { %2210 = vrot.lane.b32.xlu2 %v2205_v20, %s3270_s0  ;;  %v4871_v51 = vmul.f32 %v2369_v13, %v4743_v7  ;;  %v2349_v20 = vmul.f32 %v2348_v27, %v4725_v40  ;;  %v1679_v28 = vadd.f32 %v1675_v47, %v4768_v21  ;;  %v1713_v46 = vadd.f32 %v1709_v33, %v4780_v19 }
 0x253   : > { %v1627_v35 = vpop.permute.xlu0 %1626  ;;  %v1730_v58 = vpop.permute.xlu1 %1729  ;;  %v1705_v21 = vrot.slane %v1699_v17, 1  ;;  %v2351_v19 = vmul.f32 %v2348_v27, %v4825_v41  ;;  %v4894_v55 = vmul.f32 %v2390_v1, %v4743_v7  ;;  %v2391_v62 = vmul.f32 %v2390_v1, %v4725_v40 }
 0x254   : > { %v1631_v53 = vadd.f32 %v1627_v35, %v4727_v24  ;;  %v4821_v63 = vadd.f32 %v1730_v58, %v1662_v5  ;;  %v1812_v12 = vpop.permute.xlu2 %1811  ;;  %v2246_v24 = vmul.f32 %v2245_v36, %v4725_v40  ;;  %v2334_v5 = vrot.slane %v2328_v14, 1 }
 0x255   : > { %v2376_v35 = vrot.slane %v2370_v3, 1  ;;  %v2355_v39 = vrot.slane %v2349_v20, 1  ;;  %v1707_v48 = vsel %vm428_vm3, %v1705_v21, %v1706_v9  ;;  %v2358_v30 = vrot.slane %v2351_v19, 1 }
 0x256   : > { %v1696_v59 = vadd.f32 %v1692_v0, %v1631_v53  ;;  %v2356_v0 = vrot.slane %v2350_v49, 1  ;;  %v2336_v29 = vsel %vm428_vm3, %v2334_v5, %v2335_v26  ;;  %v1712_v4 = vadd.f32 %v1707_v48, %v4795_v52 }
 0x257   : > { %v2397_v20 = vrot.slane %v2391_v62, 1  ;;  %v4944_v49 = vstv %s4909_s20  ;;  %s3005_s20 = sld [smem:[#allocation8 + $0x66]] }
 0x258   : > { %v4841_v45 = vadd.f32 %v1772_v18, %v1696_v59  ;;  %v2337_v18 = vrot.slane %v2330_v38, 1  ;;  %v1883_v59 = vstv %s2979_s8  ;;  %v2357_v34 = vsel %vm428_vm3, %v2355_v39, %v2356_v0  ;;  %s3026_s8 = sld [smem:[#allocation8 + $0x8f]] }
 0x259   : > { %2222 = vrot.lane.b32.xlu0 %v2218_v32, %s3270_s0  ;;  %2250 = vrot.lane.b32.xlu1 %v2246_v24, %s3270_s0  ;;  %v2393_v24 = vmul.f32 %v2390_v1, %v4825_v41  ;;  %v4907_v38 = vmul.f32 %v4846_v16, %v1883_v59  ;;  %v2359_v3 = vsel %vm428_vm3, %v2356_v0, %v2358_v30  ;;  %v1900_v1 = vstv %s4916_s23  ;;  %s3016_s23 = sld [smem:[#allocation8 + $0x45]] }
 0x25a   : > { %2236 = vrot.lane.b32.xlu2 %v2232_v22, %s3270_s0  ;;  %v2338_v23 = vsel %vm428_vm3, %v2335_v26, %v2337_v18  ;;  %v2372_v22 = vmul.f32 %v2369_v13, %v4825_v41  ;;  %v1918_v39 = vmul.f32 %v4808_v31, %v4944_v49  ;;  %v4960_v0 = vmul.f32 %v4846_v16, %v4944_v49 }
 0x25b   : > { %v1728_v61 = vpop.permute.xlu0 %1727  ;;  %v1770_v50 = vpop.permute.xlu1 %1769  ;;  %v1891_v9 = vrot.slane %v4907_v38, 2 }
 0x25c   : > { %v1733_v57 = vadd.f32 %v1728_v61, %v1661_v10  ;;  %v4854_v6 = vadd.f32 %v1770_v50, %v1695_v54  ;;  %v1835_v44 = vpop.permute.xlu2 %1834  ;;  %v2398_v10 = vrot.slane %v4894_v55, 1  ;;  %v4912_v54 = vld [vmem:[#allocation2 + $0x40] sm:$0x3]  ;;  %v2432_v50 = vstv %s4882_s10  ;;  %s5095_s10 = sld [smem:[#allocation8 + $0x87]] }
 0x25d   : > { %v1886_v61 = vmul.f32 %v4912_v54, %v1883_v59  ;;  %v2379_v18 = vrot.slane %v2372_v22, 1  ;;  %v2433_v27 = vmul.f32 %v2432_v50, %v4725_v40  ;;  %v1903_v22 = vmul.f32 %v4912_v54, %v1900_v1 }
 0x25e   : > { %v4860_v42 = vadd.f32 %v1812_v12, %v1733_v57  ;;  %v2377_v12 = vrot.slane %v4871_v51, 1  ;;  %v2400_v57 = vrot.slane %v2393_v24, 1  ;;  %v1884_v51 = vmul.f32 %v4808_v31, %v1883_v59 }
 0x25f   : > { %v2439_v33 = vrot.slane %v2433_v27, 1  ;;  %v2399_v55 = vsel %vm428_vm3, %v2397_v20, %v2398_v10  ;;  %v4973_v24 = vmul.f32 %v4846_v16, %v1900_v1  ;;  %v1924_v38 = vrot.slane %v1918_v39, 2 }
 0x260   : > { %v2378_v32 = vsel %vm428_vm3, %v2376_v35, %v2377_v12  ;;  %v2380_v47 = vsel %vm428_vm3, %v2377_v12, %v2379_v18  ;;  %v2453_v12 = vstv %s3013_s26  ;;  %v1890_v21 = vrot.slane %v1884_v51, 2  ;;  %s3015_s26 = sld [smem:[#allocation8 + $0x21]] }
 0x261   : > { %2238 = vrot.lane.b32.xlu0 %v2233_v43, %s3270_s0  ;;  %2341 = vrot.lane.b32.xlu1 %v2338_v23, %s5401_s27  ;;  %v1893_v43 = vrot.slane %v1886_v61, 2  ;;  %v2401_v23 = vsel %vm428_vm3, %v2398_v10, %v2400_v57  ;;  %v4968_v59 = vmul.f32 %v2453_v12, %v4743_v7  ;;  %v2454_v51 = vmul.f32 %v2453_v12, %v4725_v40 }
 0x262   : > { %2252 = vrot.lane.b32.xlu2 %v2247_v11, %s3270_s0  ;;  %v4928_v11 = vmul.f32 %v2432_v50, %v4743_v7 }
 0x263   : > { %v1751_v60 = vpop.permute.xlu0 %1750  ;;  %v1793_v25 = vpop.permute.xlu1 %1792  ;;  %v1894_v17 = vsel %vm665_vm4, %v1891_v9, %v1893_v43  ;;  %v2461_v57 = vrot.slane %v4968_v59, 1 }
 0x264   : > { %v1755_v58 = vadd.f32 %v1751_v60, %v1679_v28  ;;  %v4884_v36 = vadd.f32 %v1793_v25, %v1713_v46  ;;  %v1875_v53 = vpop.permute.xlu2 %1874  ;;  %v2440_v60 = vrot.slane %v4928_v11, 1  ;;  %v2563_v11 = vstv %s4954_s19  ;;  %s3006_s19 = sld [smem:[#allocation8 + $0x8a]] }
 0x265   : > { %v2564_v20 = vmul.f32 %v2563_v11, %v4725_v40 }
 0x266   : > { %v4890_v56 = vadd.f32 %v1835_v44, %v1755_v58  ;;  %v2411_v44 = vstv %s4888_s1  ;;  %s5113_s1 = sld [smem:[#allocation8 + $0x63]] }
 0x267   : > { %v4932_v14 = vmul.f32 %v2411_v44, %v4743_v7  ;;  %v2414_v19 = vmul.f32 %v2411_v44, %v4825_v41 }
 0x269   : > { %2339 = vrot.lane.b32.xlu0 %v2336_v29, %s5401_s27  ;;  %2381 = vrot.lane.b32.xlu1 %v2378_v32, %s5401_s27  ;;  %v2419_v5 = vrot.slane %v4932_v14, 1  ;;  %v2456_v29 = vmul.f32 %v2453_v12, %v4825_v41  ;;  %v1934_v32 = vstv %s4934_s6  ;;  %v2421_v30 = vrot.slane %v2414_v19, 1  ;;  %s3017_s6 = sld [smem:[#allocation8 + $0x69]] }
 0x26a   : > { %2360 = vrot.lane.b32.xlu2 %v2357_v34, %s5401_s27  ;;  %v2441_v34 = vsel %vm428_vm3, %v2439_v33, %v2440_v60  ;;  %v1937_v18 = vmul.f32 %v4912_v54, %v1934_v32  ;;  %v5009_v33 = vmul.f32 %v2563_v11, %v4743_v7 }
 0x26b   : > { %v1791_v15 = vpop.permute.xlu0 %1790  ;;  %v1833_v8 = vpop.permute.xlu1 %1832 }
 0x26c   : > { %v1796_v26 = vadd.f32 %v1791_v15, %v1712_v4  ;;  %v4919_v52 = vadd.f32 %v1833_v8, %v4811_v2  ;;  %v1966_v37 = vpop.permute.xlu2 %1965  ;;  %v2412_v2 = vmul.f32 %v2411_v44, %v4725_v40  ;;  %v1925_v15 = vrot.slane %v4960_v0, 2 }
 0x26d   : > { %v1892_v8 = vsel %vm665_vm4, %v1890_v21, %v1891_v9  ;;  %v2463_v44 = vrot.slane %v2456_v29, 1  ;;  %v1908_v9 = vrot.slane %v4973_v24, 2  ;;  %v2571_v19 = vrot.slane %v5009_v33, 2 }
 0x26e   : > { %v4922_v13 = vadd.f32 %v1875_v53, %v1796_v26  ;;  %v2418_v25 = vrot.slane %v2412_v2, 1  ;;  %v1897_v10 = vadd.f32 %v1892_v8, %v4860_v42  ;;  %v1910_v42 = vrot.slane %v1903_v22, 2 }
 0x26f   : > { %v2422_v2 = vsel %vm428_vm3, %v2419_v5, %v2421_v30  ;;  %v2566_v8 = vmul.f32 %v2563_v11, %v4825_v41 }
 0x270   : > { %v2420_v48 = vsel %vm428_vm3, %v2418_v25, %v2419_v5 }
 0x271   : > { %2362 = vrot.lane.b32.xlu0 %v2359_v3, %s5401_s27  ;;  %2404 = vrot.lane.b32.xlu1 %v2401_v23, %s5401_s27 }
 0x272   : > { %2383 = vrot.lane.b32.xlu2 %v2380_v47, %s5401_s27  ;;  %v2474_v47 = vstv %s4965_s28  ;;  %s5239_s28 = sld [smem:[#allocation9 + $0x1]] }
 0x273   : > { %v1814_v28 = vpop.permute.xlu0 %1813  ;;  %v1856_v46 = vpop.permute.xlu1 %1855  ;;  %v2476_v5 = vmul.f32 %v2474_v47, %v4743_v7 }
 0x274   : > { %v1818_v35 = vadd.f32 %v1814_v28, %v4821_v63  ;;  %v4951_v58 = vadd.f32 %v1856_v46, %v4841_v45  ;;  %v2006_v53 = vpop.permute.xlu2 %2005  ;;  %v2435_v45 = vmul.f32 %v2432_v50, %v4825_v41  ;;  %v4987_v50 = vmul.f32 %v4846_v16, %v1934_v32 }
 0x275   : > { %v1926_v16 = vsel %vm665_vm4, %v1924_v38, %v1925_v15  ;;  %v1911_v28 = vsel %vm665_vm4, %v1908_v9, %v1910_v42  ;;  %v1901_v46 = vmul.f32 %v4808_v31, %v1900_v1  ;;  %v2460_v1 = vrot.slane %v2454_v51, 1 }
 0x276   : > { %v1898_v63 = vadd.f32 %v1894_v17, %v1818_v35  ;;  %v2442_v61 = vrot.slane %v2435_v45, 1  ;;  %v1942_v23 = vrot.slane %v4987_v50, 2  ;;  %v1944_v17 = vrot.slane %v1937_v18, 2 }
 0x277   : > { %v1935_v35 = vmul.f32 %v4808_v31, %v1934_v32  ;;  %v1915_v12 = vadd.f32 %v1911_v28, %v4890_v56  ;;  %v1907_v29 = vrot.slane %v1901_v46, 2  ;;  %v2482_v32 = vrot.slane %v2476_v5, 1 }
 0x278   : > { %v4978_v4 = vadd.f32 %v1966_v37, %v1898_v63  ;;  %v2443_v3 = vsel %vm428_vm3, %v2440_v60, %v2442_v61  ;;  %v2475_v60 = vmul.f32 %v2474_v47, %v4725_v40  ;;  %v1945_v63 = vsel %vm665_vm4, %v1942_v23, %v1944_v17 }
 0x279   : > { %2402 = vrot.lane.b32.xlu0 %v2399_v55, %s5401_s27  ;;  %2444 = vrot.lane.b32.xlu1 %v2441_v34, %s3270_s0  ;;  %v1941_v24 = vrot.slane %v1935_v35, 2  ;;  %v2584_v34 = vstv %s5000_s22  ;;  %v2477_v38 = vmul.f32 %v2474_v47, %v4825_v41  ;;  %s5252_s22 = sld [smem:[#allocation8 + $0x8d]] }
 0x27a   : > { %2423 = vrot.lane.b32.xlu2 %v2420_v48, %s3270_s0  ;;  %v2481_v31 = vrot.slane %v2475_v60, 1  ;;  %v2462_v48 = vsel %vm428_vm3, %v2460_v1, %v2461_v57  ;;  %v2586_v30 = vmul.f32 %v2584_v34, %v4743_v7 }
 0x27b   : > { %v1854_v26 = vpop.permute.xlu0 %1853  ;;  %v1964_v37 = vpop.permute.xlu1 %1963 }
 0x27c   : > { %v1859_v62 = vadd.f32 %v1854_v26, %v4854_v6  ;;  %v4993_v27 = vadd.f32 %v1964_v37, %v1897_v10  ;;  %v2029_v43 = vpop.permute.xlu2 %2028  ;;  %v2464_v6 = vsel %vm428_vm3, %v2461_v57, %v2463_v44  ;;  %v2587_v10 = vmul.f32 %v2584_v34, %v4825_v41 }
 0x27d   : > { %v2483_v50 = vsel %vm428_vm3, %v2481_v31, %v2482_v32  ;;  %v1943_v26 = vsel %vm665_vm4, %v1941_v24, %v1942_v23  ;;  %v1920_v37 = vmul.f32 %v4912_v54, %v4944_v49  ;;  %v2626_v23 = vstv %s3022_s30  ;;  %s5262_s30 = sld [smem:[#allocation9]] }
 0x27e   : > { %v1931_v14 = vadd.f32 %v1926_v16, %v1859_v62  ;;  %v1948_v44 = vadd.f32 %v1943_v26, %v4922_v13  ;;  %v2484_v62 = vrot.slane %v2477_v38, 1  ;;  %v2605_v49 = vstv %s3021_s4  ;;  %s5270_s4 = sld [smem:[#allocation9 + $0x2]] }
 0x27f   : > { %v2585_v13 = vmul.f32 %v2584_v34, %v4725_v40  ;;  %v2627_v51 = vmul.f32 %v2626_v23, %v4725_v40  ;;  %v2606_v17 = vmul.f32 %v2605_v49, %v4725_v40  ;;  %v2607_v28 = vmul.f32 %v2605_v49, %v4743_v7 }
 0x280   : > { %v5013_v25 = vadd.f32 %v2006_v53, %v1931_v14  ;;  %v2570_v53 = vrot.slane %v2564_v20, 2  ;;  %v2594_v14 = vrot.slane %v2587_v10, 2  ;;  %v2628_v20 = vmul.f32 %v2626_v23, %v4743_v7 }
 0x281   : > { %2425 = vrot.lane.b32.xlu0 %v2422_v2, %s3270_s0  ;;  %2467 = vrot.lane.b32.xlu1 %v2464_v6, %s3270_s0  ;;  %v2592_v2 = vrot.slane %v2586_v30, 2  ;;  %v2591_v35 = vrot.slane %v2585_v13, 2  ;;  %v2633_v0 = vrot.slane %v2627_v51, 2  ;;  %v2629_v24 = vmul.f32 %v2626_v23, %v4825_v41 }
 0x282   : > { %2446 = vrot.lane.b32.xlu2 %v2443_v3, %s3270_s0  ;;  %v2572_v22 = vsel %vm665_vm4, %v2570_v53, %v2571_v19  ;;  %v1927_v3 = vrot.slane %v1920_v37, 2  ;;  %v2634_v1 = vrot.slane %v2628_v20, 2  ;;  %v2613_v53 = vrot.slane %v2607_v28, 2 }
 0x283   : > { %v1877_v39 = vpop.permute.xlu0 %1876  ;;  %v1987_v21 = vpop.permute.xlu1 %1986  ;;  %v2595_v47 = vsel %vm665_vm4, %v2592_v2, %v2594_v14  ;;  %v2689_v26 = vstv %s3025_s7  ;;  %s5317_s7 = sld [smem:[#allocation9 + $0x3]] }
 0x284   : > { %v1881_v55 = vadd.f32 %v1877_v39, %v4884_v36  ;;  %v5025_v45 = vadd.f32 %v1987_v21, %v1915_v12  ;;  %v2069_v59 = vpop.permute.xlu2 %2068  ;;  %v1909_v36 = vsel %vm665_vm4, %v1907_v29, %v1908_v9  ;;  %v1928_v33 = vsel %vm665_vm4, %v1925_v15, %v1927_v3 }
 0x285   : > { %v1914_v57 = vadd.f32 %v1909_v36, %v4919_v52  ;;  %v2485_v52 = vsel %vm428_vm3, %v2482_v32, %v2484_v62  ;;  %v1932_v46 = vadd.f32 %v1928_v33, %v4951_v58  ;;  %v2612_v15 = vrot.slane %v2606_v17, 2 }
 0x286   : > { %v1949_v56 = vadd.f32 %v1945_v63, %v1881_v55  ;;  %v2593_v58 = vsel %vm665_vm4, %v2591_v35, %v2592_v2  ;;  %v2608_v55 = vmul.f32 %v2605_v49, %v4825_v41  ;;  %v2691_v62 = vmul.f32 %v2689_v26, %v4743_v7 }
 0x287   : > { %v2614_v32 = vsel %vm665_vm4, %v2612_v15, %v2613_v53  ;;  %v2710_v17 = vstv %s3026_s8 }
 0x288   : > { %v5035_v61 = vadd.f32 %v2029_v43, %v1949_v56  ;;  %v2573_v43 = vrot.slane %v2566_v8, 2  ;;  %v2697_v51 = vrot.slane %v2691_v62, 2 }
 0x289   : > { %2465 = vrot.lane.b32.xlu0 %v2462_v48, %s3270_s0  ;;  %2575 = vrot.lane.b32.xlu1 %v2572_v22, %s5401_s27  ;;  %v2615_v22 = vrot.slane %v2608_v55, 2 }
 0x28a   : > { %2486 = vrot.lane.b32.xlu2 %v2483_v50, %s3270_s0  ;;  %v2574_v6 = vsel %vm665_vm4, %v2571_v19, %v2573_v43  ;;  %v2647_v19 = vstv %s3023_s29  ;;  %v2636_v50 = vrot.slane %v2629_v24, 2  ;;  %s5409_s29 = sshll.u32 %s3393_s17, 6 }
 0x28b   : > { %v1985_v18 = vpop.permute.xlu0 %1984  ;;  %v2027_v9 = vpop.permute.xlu1 %2026  ;;  %v2649_v29 = vmul.f32 %v2647_v19, %v4743_v7  ;;  %v2650_v31 = vmul.f32 %v2647_v19, %v4825_v41 }
 0x28c   : > { %v1990_v42 = vadd.f32 %v1985_v18, %v1914_v57  ;;  %v5046_v11 = vadd.f32 %v2027_v9, %v1948_v44  ;;  %v2092_v16 = vpop.permute.xlu2 %2091  ;;  %v2668_v57 = vstv %s3024_s9  ;;  %v2616_v44 = vsel %vm665_vm4, %v2613_v53, %v2615_v22  ;;  %s3042_s9 = sshll.u32 %s3314_s16, 6 }
 0x28d   : > { %v2655_v30 = vrot.slane %v2649_v29, 2  ;;  %v2657_v10 = vrot.slane %v2650_v31, 2  ;;  %v2129_v18 = vstv %s5074_s11  ;;  %v2648_v9 = vmul.f32 %v2647_v19, %v4725_v40 }
 0x28e   : > { %v5048_v54 = vadd.f32 %v2069_v59, %v1990_v42  ;;  %v2123_v59 = vstv %s5056_s5  ;;  %v2637_v42 = vsel %vm665_vm4, %v2634_v1, %v2636_v50  ;;  %v2670_v2 = vmul.f32 %v2668_v57, %v4743_v7  ;;  %s5290_s5 = scalar_lea.vmem [#allocation10], %s5409_s29 }
 0x28f   : > { %v2124_v34 = vmul.f32 %v2123_v59, %v4725_v40  ;;  %v2131_v14 = vmul.f32 %v2129_v18, %v4743_v7  ;;  %v2654_v49 = vrot.slane %v2648_v9, 2  ;;  %v2671_v35 = vmul.f32 %v2668_v57, %v4825_v41  ;;  %s2771_s16 = sshll.u32 %s5290_s5, 4  ;;  %s2772_s16 = int_to_ptr.vmem [resolvable:$true] %s2771_s16 }
 0x290   : > { %v2676_v33 = vrot.slane %v2670_v2, 2  ;;  %v2125_v22 = vmul.f32 %v2123_v59, %v4743_v7 }
 0x291   : > { %2488 = vrot.lane.b32.xlu0 %v2485_v52, %s3270_s0  ;;  %2598 = vrot.lane.b32.xlu1 %v2595_v47, %s5401_s27  ;;  %v2678_v55 = vrot.slane %v2671_v35, 2 }
 0x292   : > { %2577 = vrot.lane.b32.xlu2 %v2574_v6, %s5401_s27 }
 0x293   : > { %v2008_v60 = vpop.permute.xlu0 %2007  ;;  %v2050_v5 = vpop.permute.xlu1 %2049 }
 0x294   : > { %v2012_v12 = vadd.f32 %v2008_v60, %v1932_v46  ;;  %v5068_v39 = vadd.f32 %v2050_v5, %v4978_v4  ;;  %v2153_v21 = vpop.permute.xlu2 %2152  ;;  %v2635_v4 = vsel %vm665_vm4, %v2633_v0, %v2634_v1  ;;  %v2656_v46 = vsel %vm665_vm4, %v2654_v49, %v2655_v30 }
 0x295   : > { %v2141_v60 = vstv %s5095_s10  ;;  %v2130_v5 = vmul.f32 %v2129_v18, %v4725_v40  ;;  %v2692_v1 = vmul.f32 %v2689_v26, %v4825_v41  ;;  %s2770_s10 = scalar_lea.hbm %s5383_s3, %s3042_s9 }
 0x296   : > { %v5070_v63 = vadd.f32 %v2092_v16, %v2012_v12  ;;  %v2669_v16 = vmul.f32 %v2668_v57, %v4725_v40  ;;  %v2713_v12 = vmul.f32 %v2710_v17, %v4825_v41  ;;  %v2142_v53 = vmul.f32 %v2141_v60, %v4725_v40 }
 0x297   : > { %v2132_v15 = vadd.f32 %v2130_v5, %v5048_v54  ;;  %v2711_v54 = vmul.f32 %v2710_v17, %v4725_v40  ;;  %v2127_v50 = vadd.f32 %v2125_v22, %v5068_v39 }
 0x298   : > { %v2675_v20 = vrot.slane %v2669_v16, 2  ;;  %v2720_v24 = vrot.slane %v2713_v12, 2 }
 0x299   : > { %2596 = vrot.lane.b32.xlu0 %v2593_v58, %s5401_s27  ;;  %2638 = vrot.lane.b32.xlu1 %v2635_v4, %s5401_s27  ;;  %v2717_v9 = vrot.slane %v2711_v54, 2  ;;  %v2293_v54 = vstv %s3005_s20 }
 0x29a   : > { %2617 = vrot.lane.b32.xlu2 %v2614_v32, %s5401_s27  ;;  %v2677_v0 = vsel %vm665_vm4, %v2675_v20, %v2676_v33 }
 0x29b   : > { %v2048_v56 = vpop.permute.xlu0 %2047  ;;  %v2090_v48 = vpop.permute.xlu1 %2089 }
 0x29c   : > { %v2053_v38 = vadd.f32 %v2048_v56, %v4993_v27  ;;  %v5090_v8 = vadd.f32 %v2090_v48, %v5013_v25  ;;  %v2169_v36 = vpop.permute.xlu2 %2168  ;;  %v2658_v27 = vsel %vm665_vm4, %v2655_v30, %v2657_v10  ;;  %v2690_v25 = vmul.f32 %v2689_v26, %v4725_v40 }
 0x29d   : > { %v2135_v56 = vstv %s5113_s1  ;;  %s2773_s1 = sshll.u32 %s2770_s10, 4  ;;  %s2774_s1 = int_to_ptr.hbm [resolvable:$true] %s2773_s1 }
 0x29e   : > { %v2126_v37 = vadd.f32 %v2124_v34, %v2053_v38  ;;  %v2696_v6 = vrot.slane %v2690_v25, 2  ;;  %v2699_v34 = vrot.slane %v2692_v1, 2  ;;  %v2679_v38 = vsel %vm665_vm4, %v2676_v33, %v2678_v55 }
 0x29f   : > { %v2137_v30 = vmul.f32 %v2135_v56, %v4743_v7  ;;  %v2136_v62 = vmul.f32 %v2135_v56, %v4725_v40 }
 0x2a0   : > { %v5100_v43 = vadd.f32 %v2153_v21, %v2126_v37  ;;  %v2700_v10 = vsel %vm665_vm4, %v2697_v51, %v2699_v34 }
 0x2a1   : > { %2619 = vrot.lane.b32.xlu0 %v2616_v44, %s5401_s27  ;;  %2661 = vrot.lane.b32.xlu1 %v2658_v27, %s3270_s0  ;;  %v2139_v59 = vadd.f32 %v2137_v30, %v5070_v63 }
 0x2a2   : > { %2640 = vrot.lane.b32.xlu2 %v2637_v42, %s5401_s27  ;;  %v2138_v42 = vadd.f32 %v2136_v62, %v5090_v8  ;;  %s3004_s27 = sld [smem:[#allocation8 + $0x42]] }
 0x2a3   : > { %v2071_v3 = vpop.permute.xlu0 %2070  ;;  %v2113_v23 = vpop.permute.xlu1 %2112 }
 0x2a4   : > { %v2075_v52 = vadd.f32 %v2071_v3, %v5025_v45  ;;  %v5111_v13 = vadd.f32 %v2113_v23, %v5035_v61  ;;  %v2195_v47 = vpop.permute.xlu2 %2194  ;;  %v2698_v45 = vsel %vm665_vm4, %v2696_v6, %v2697_v51  ;;  %v2712_v61 = vmul.f32 %v2710_v17, %v4743_v7 }
 0x2a5   : > { %v2143_v23 = vmul.f32 %v2141_v60, %v4743_v7 }
 0x2a6   : > { %v2133_v28 = vadd.f32 %v2131_v14, %v2075_v52  ;;  %v2718_v32 = vrot.slane %v2712_v61, 2 }
 0x2a7   : > { %v2145_v49 = vadd.f32 %v2143_v23, %v5111_v13 }
 0x2a8   : > { %v2173_v21 = vadd.f32 %v2169_v36, %v2133_v28  ;;  %v2721_v36 = vsel %vm665_vm4, %v2718_v32, %v2720_v24  ;;  %v2719_v25 = vsel %vm665_vm4, %v2717_v9, %v2718_v32  ;;  %v2495_v9 = vstv %s3015_s26 }
 0x2a9   : > { %2659 = vrot.lane.b32.xlu0 %v2656_v46, %s3270_s0  ;;  %2701 = vrot.lane.b32.xlu1 %v2698_v45, %s3270_s0 }
 0x2aa   : > { %2680 = vrot.lane.b32.xlu2 %v2677_v0, %s3270_s0 }
 0x2ab   : > { %v2111_v19 = vpop.permute.xlu0 %2110  ;;  %v2167_v58 = vpop.permute.xlu1 %2166 }
 0x2ac   : > { %v2116_v4 = vadd.f32 %v2111_v19, %v5046_v11  ;;  %v5130_v29 = vadd.f32 %v2167_v58, %v2132_v15  ;;  %v2211_v31 = vpop.permute.xlu2 %2210  ;;  %v2276_v58 = vstv %s3004_s27  ;;  %s2759_s27 = scalar_lea.sflag [#allocation5], %s3393_s17 }
 0x2ae   : > { %v2144_v48 = vadd.f32 %v2142_v53, %v2116_v4  ;;  %v2277_v4 = vmul.f32 %v2276_v58, %v4725_v40  ;;  %v5207_v40 = vstv %s3016_s23 }
 0x2b0   : > { %v2200_v11 = vadd.f32 %v2195_v47, %v2144_v48  ;;  %v2283_v24 = vrot.slane %v2277_v4, 1 }
 0x2b1   : > { %2682 = vrot.lane.b32.xlu0 %v2679_v38, %s3270_s0  ;;  %2724 = vrot.lane.b32.xlu1 %v2721_v36, %s3270_s0 }
 0x2b2   : > { %2703 = vrot.lane.b32.xlu2 %v2700_v10, %s3270_s0  ;;  %v2296_v10 = vmul.f32 %v2293_v54, %v4825_v41 }
 0x2b3   : > { %v2155_v26 = vpop.permute.xlu0 %2154  ;;  %v2183_v37 = vpop.permute.xlu1 %2182 }
 0x2b4   : > { %v2159_v57 = vadd.f32 %v2155_v26, %v2127_v50  ;;  %v5146_v44 = vadd.f32 %v2183_v37, %v2139_v59  ;;  %v2237_v18 = vpop.permute.xlu2 %2236  ;;  %v5218_v37 = vmul.f32 %v5207_v40, %v4743_v7  ;;  %v2303_v62 = vrot.slane %v2296_v10, 1 }
 0x2b6   : > { %v5148_v27 = vadd.f32 %v2211_v31, %v2159_v57  ;;  %v5197_v31 = vmul.f32 %v2276_v58, %v4743_v7  ;;  %v5220_v57 = vld [vmem:[#allocation2 + $0x48] sm:$0xff] }
 0x2b8   : > { %v2284_v34 = vrot.slane %v5197_v31, 1 }
 0x2b9   : > { %2722 = vrot.lane.b32.xlu0 %v2719_v25, %s3270_s0  ;;  %s3003_s0 = sld [smem:[#allocation8 + $0x1e]] }
 0x2ba   : > { %v2285_v30 = vsel %vm428_vm3, %v2283_v24, %v2284_v34 }
 0x2bb   : > { %v2181_v39 = vpop.permute.xlu0 %2180  ;;  %v2209_v16 = vpop.permute.xlu1 %2208 }
 0x2bc   : > { %v2186_v63 = vadd.f32 %v2181_v39, %v2138_v42  ;;  %v5155_v2 = vadd.f32 %v2209_v16, %v5100_v43  ;;  %v2253_v14 = vpop.permute.xlu2 %2252  ;;  %v2294_v39 = vmul.f32 %v5220_v57, %v2293_v54 }
 0x2be   : > { %v5157_v3 = vadd.f32 %v2237_v18, %v2186_v63  ;;  %v2513_v18 = vmul.f32 %v5220_v57, %v5207_v40  ;;  %v2300_v24 = vrot.slane %v2294_v39, 1 }
 0x2bf   : > { %v2259_v32 = vstv %s3003_s0  ;;  %s3201_s0 = sshra.s32 %s2774_s1, 4  ;;  %s3202_s0 = int_to_ptr.hbm [resolvable:$true] %s3201_s0 }
 0x2c0   : > { %v2261_v38 = vmul.f32 %v2259_v32, %v4743_v7  ;;  %v2262_v36 = vmul.f32 %v2259_v32, %v4825_v41  ;;  %v2260_v42 = vmul.f32 %v5220_v57, %v2259_v32  ;;  %s3203_s20 = scalar_lea.hbm %s3202_s0, 64  ;;  %p3208_p0 = scmp.lt.s32.totalorder %s3202_s0, %s5383_s3 }
 0x2c1   : > { %p3204_p4 = scmp.ne.s32.totalorder %s3202_s0, %s3203_s20 }
 0x2c2   : > { %v2267_v59 = vrot.slane %v2261_v38, 1  ;;  %v2269_v26 = vrot.slane %v2262_v36, 1  ;;  %v2266_v32 = vrot.slane %v2260_v42, 1  ;;  %v2310_v38 = vstv %s3006_s19 }
 0x2c3   : > { %v2197_v52 = vpop.permute.xlu0 %2196  ;;  %v2225_v47 = vpop.permute.xlu1 %2224  ;;  %v2313_v42 = vmul.f32 %v2310_v38, %v4825_v41  ;;  %p3205_p6 = pnand %p3204_p4, %p3345_p11 }
 0x2c4   : > { %v2201_v6 = vadd.f32 %v2197_v52, %v2145_v49  ;;  %v5161_v51 = vadd.f32 %v2225_v47, %v2173_v21  ;;  %v2361_v20 = vpop.permute.xlu2 %2360  ;;  %v2529_v49 = vstv %s3017_s6  ;;  %v5232_v52 = vld [vmem:[#allocation2 + $0x50] sm:$0xff]  ;;  %s3207_s6 = scalar_lea.hbm %s5383_s3, 128 }
 0x2c5   : > { %v5235_v47 = vmul.f32 %v5232_v52, %v2495_v9  ;;  %v2531_v36 = vmul.f32 %v5232_v52, %v2529_v49  ;;  %p3206_p13 = pneg %p3205_p6  ;;  %p3209_p7 = scmp.lt.s32.totalorder %s3207_s6, %s3203_s20 }
 0x2c6   : > { %v5163_v8 = vadd.f32 %v2253_v14, %v2201_v6  ;;  %v2498_v6 = vmul.f32 %v2495_v9, %v4825_v41 }
 0x2c7   : > { %p3210_p5 = por %p3209_p7, %p3208_p0 }
 0x2c9   : > { %p3211_p8 = pnand %p3210_p5, %p3206_p13 }
 0x2cb   : > { %v2223_v33 = vpop.permute.xlu0 %2222  ;;  %v2251_v17 = vpop.permute.xlu1 %2250 }
 0x2cc   : > { %v5165_v28 = vadd.f32 %v2251_v17, %v2200_v11  ;;  %v5167_v43 = vpop.permute.xlu2 %2383  ;;  %v2228_v22 = vadd.f32 %v2223_v33, %v5130_v29  ;;  %v2295_v11 = vmul.f32 %v2293_v54, %v4743_v7  ;;  %v2270_v7 = vsel %vm428_vm3, %v2267_v59, %v2269_v26 }
 0x2cd   : > { %v2520_v33 = vrot.slane %v5218_v37, 2  ;;  %v2519_v17 = vrot.slane %v2513_v18, 2  ;;  %v2274_v4 = vadd.f32 %v2270_v7, %v5148_v27  ;;  %v2530_v7 = vmul.f32 %v5220_v57, %v2529_v49 }
 0x2ce   : > { %v2290_v50 = vadd.f32 %v2285_v30, %v2228_v22  ;;  %v2301_v25 = vrot.slane %v2295_v11, 1  ;;  %v2503_v30 = vrot.slane %v5235_v47, 2  ;;  %v2505_v11 = vrot.slane %v2498_v6, 2 }
 0x2cf   : > { %v2521_v27 = vsel %vm665_vm4, %v2519_v17, %v2520_v33 }
 0x2d0   : > { %v2366_v23 = vadd.f32 %v2361_v20, %v2290_v50  ;;  %v2304_v20 = vsel %vm428_vm3, %v2301_v25, %v2303_v62  ;;  %v2302_v18 = vsel %vm428_vm3, %v2300_v24, %v2301_v25  ;;  %v5257_v62 = vmul.f32 %v5232_v52, %v2310_v38 }
 0x2d1   : > { %v2506_v25 = vsel %vm665_vm4, %v2503_v30, %v2505_v11 }
 0x2d3   : > { %v2239_v46 = vpop.permute.xlu0 %2238  ;;  %v5169_v5 = vpop.permute.xlu1 %2341 }
 0x2d4   : > { %v5171_v60 = vpop.permute.xlu2 %2423  ;;  %v2243_v14 = vadd.f32 %v2239_v46, %v5146_v44  ;;  %v2279_v44 = vmul.f32 %v2276_v58, %v4825_v41  ;;  %v2346_v54 = vadd.f32 %v5169_v5, %v2274_v4  ;;  %v2532_v58 = vmul.f32 %v2529_v49, %v4825_v41 }
 0x2d5   : > { %v2268_v5 = vsel %vm428_vm3, %v2266_v32, %v2267_v59  ;;  %v2738_v4 = vstv %s5239_s28  ;;  %v2496_v32 = vmul.f32 %v5220_v57, %v2495_v9 }
 0x2d6   : > { %v2308_v22 = vadd.f32 %v2304_v20, %v2243_v14  ;;  %v2273_v59 = vadd.f32 %v2268_v5, %v5155_v2  ;;  %v2539_v17 = vrot.slane %v2532_v58, 2  ;;  %v2318_v20 = vrot.slane %v5257_v62, 1 }
 0x2d7   : > { %v2320_v2 = vrot.slane %v2313_v42, 1  ;;  %v2502_v31 = vrot.slane %v2496_v32, 2 }
 0x2db   : > { %v5173_v13 = vpop.permute.xlu0 %2339  ;;  %v5175_v35 = vpop.permute.xlu1 %2381 }
 0x2dc   : > { %v5177_v45 = vpop.permute.xlu2 %2446  ;;  %v2345_v24 = vadd.f32 %v5173_v13, %v2273_v59  ;;  %v2321_v13 = vsel %vm428_vm3, %v2318_v20, %v2320_v2 }
 0x2e3   : > { %v5179_v61 = vpop.permute.xlu0 %2362  ;;  %v5181_v12 = vpop.permute.xlu1 %2404 }
 0x2e4   : > { %v5183_v21 = vpop.permute.xlu2 %2486 }
 0x2eb   : > { %v5185_v0 = vpop.permute.xlu0 %2402  ;;  %v2445_v1 = vpop.permute.xlu1 %2444 }
 0x2ec   : > { %v5187_v15 = vpop.permute.xlu2 %2577  ;;  %v2450_v46 = vadd.f32 %v2445_v1, %v2366_v23  ;;  %v2286_v1 = vrot.slane %v2279_v44, 1  ;;  %v2537_v23 = vrot.slane %v2531_v36, 2  ;;  %v2307_v44 = vadd.f32 %v2302_v18, %v5157_v3 }
 0x2ee   : > { %v2526_v26 = vadd.f32 %v2521_v27, %v2450_v46  ;;  %v2287_v3 = vsel %vm428_vm3, %v2284_v34, %v2286_v1  ;;  %v2546_v27 = vstv %s5252_s22  ;;  %v2731_v1 = vstv %s5262_s30 }
 0x2ef   : > { %v2291_v5 = vadd.f32 %v2287_v3, %v5161_v51  ;;  %v2548_v18 = vmul.f32 %v5232_v52, %v2546_v27  ;;  %v2549_v62 = vmul.f32 %v2546_v27, %v4825_v41 }
 0x2f1   : > { %v2367_v51 = vadd.f32 %v5179_v61, %v2291_v5 }
 0x2f3   : > { %v5189_v53 = vpop.permute.xlu0 %2425  ;;  %v5191_v19 = vpop.permute.xlu1 %2467 }
 0x2f4   : > { %v5193_v55 = vpop.permute.xlu2 %2617  ;;  %v2430_v10 = vadd.f32 %v5189_v53, %v2346_v54  ;;  %v2388_v53 = vadd.f32 %v5167_v43, %v2308_v22  ;;  %v2387_v22 = vadd.f32 %v5175_v35, %v2307_v44  ;;  %v2536_v54 = vrot.slane %v2530_v7, 2 }
 0x2f5   : > { %v2311_v35 = vmul.f32 %v5220_v57, %v2310_v38  ;;  %v2325_v38 = vadd.f32 %v2321_v13, %v5163_v8  ;;  %v2556_v44 = vrot.slane %v2549_v62, 2 }
 0x2f6   : > { %v2510_v46 = vadd.f32 %v2506_v25, %v2430_v10  ;;  %v2472_v43 = vadd.f32 %v5191_v19, %v2388_v53  ;;  %v2540_v19 = vsel %vm665_vm4, %v2537_v23, %v2539_v17  ;;  %v2554_v17 = vrot.slane %v2548_v18, 2 }
 0x2f7   : > { %v2409_v52 = vadd.f32 %v5181_v12, %v2325_v38  ;;  %v2317_v8 = vrot.slane %v2311_v35, 1  ;;  %v2451_v12 = vadd.f32 %v5177_v45, %v2367_v51  ;;  %v2547_v45 = vmul.f32 %v5220_v57, %v2546_v27 }
 0x2f8   : > { %v2544_v58 = vadd.f32 %v2540_v19, %v2472_v43  ;;  %v2582_v9 = vadd.f32 %v5187_v15, %v2510_v46 }
 0x2f9   : > { %v2319_v32 = vsel %vm428_vm3, %v2317_v8, %v2318_v20  ;;  %v2553_v37 = vrot.slane %v2547_v45, 2 }
 0x2fb   : > { %v5200_v56 = vpop.permute.xlu0 %2465  ;;  %v5202_v48 = vpop.permute.xlu1 %2575 }
 0x2fc   : > { %v5214_v29 = vpop.permute.xlu2 %2640  ;;  %v2471_v11 = vadd.f32 %v5200_v56, %v2387_v22  ;;  %v2429_v56 = vadd.f32 %v5171_v60, %v2345_v24  ;;  %v2504_v60 = vsel %vm665_vm4, %v2502_v31, %v2503_v30 }
 0x2fe   : > { %v2509_v41 = vadd.f32 %v2504_v60, %v2429_v56 }
 0x300   : > { %v2581_v46 = vadd.f32 %v5202_v48, %v2509_v41  ;;  %v2557_v48 = vsel %vm665_vm4, %v2554_v17, %v2556_v44 }
 0x303   : > { %v5226_v16 = vpop.permute.xlu0 %2488  ;;  %v5228_v63 = vpop.permute.xlu1 %2598 }
 0x304   : > { %v2681_v50 = vpop.permute.xlu2 %2680  ;;  %v2493_v47 = vadd.f32 %v5226_v16, %v2409_v52 }
 0x306   : > { %v2561_v16 = vadd.f32 %v2557_v48, %v2493_v47 }
 0x308   : > { %v2645_v20 = vadd.f32 %v5214_v29, %v2561_v16 }
 0x30b   : > { %v2597_v39 = vpop.permute.xlu0 %2596  ;;  %v5260_v14 = vpop.permute.xlu1 %2638 }
 0x30c   : > { %v2602_v6 = vadd.f32 %v2597_v39, %v2526_v26  ;;  %v2704_v42 = vpop.permute.xlu2 %2703  ;;  %v2745_v39 = vstv %s5270_s4 }
 0x30e   : > { %v2686_v49 = vadd.f32 %v2681_v50, %v2602_v6  ;;  %v2538_v50 = vsel %vm665_vm4, %v2536_v54, %v2537_v23  ;;  %v3126_v23 = vld [vmem:[#allocation2 + $0x58] sm:$0x3] }
 0x30f   : > { %v2543_v53 = vadd.f32 %v2538_v50, %v2471_v11  ;;  %v2515_v59 = vmul.f32 %v3126_v23, %v5207_v40 }
 0x310   : > { %v2739_v36 = vadd.f32 %v2738_v4, %v2686_v49 }
 0x311   : > { %v2623_v30 = vadd.f32 %v5193_v55, %v2543_v53  ;;  %v2522_v40 = vrot.slane %v2515_v59, 2  ;;  %v2324_v55 = vadd.f32 %v2319_v32, %v5165_v28 }
 0x312   : > { %3028 = vst.msk [vmem:[%s5290_s5 + $0x10] sm:$0xff] %vm2734_vm5, %v2739_v36 }
 0x313   : > { %v2620_v34 = vpop.permute.xlu0 %2619  ;;  %v2662_v10 = vpop.permute.xlu1 %2661  ;;  %v2523_v54 = vsel %vm665_vm4, %v2520_v33, %v2522_v40  ;;  %v2408_v36 = vadd.f32 %v5185_v0, %v2324_v55  ;;  %v2752_v33 = vstv %s5317_s7 }
 0x314   : > { %v2624_v15 = vadd.f32 %v2620_v34, %v2544_v58  ;;  %v2666_v26 = vadd.f32 %v2662_v10, %v2582_v9  ;;  %v2527_v3 = vadd.f32 %v2523_v54, %v2451_v12 }
 0x315   : > { %v2492_v57 = vadd.f32 %v5183_v21, %v2408_v36 }
 0x316   : > { %v2708_v7 = vadd.f32 %v2704_v42, %v2624_v15  ;;  %v2733_v6 = vadd.f32 %v2731_v1, %v2666_v26  ;;  %v2603_v28 = vadd.f32 %v5228_v63, %v2527_v3  ;;  %v2555_v63 = vsel %vm665_vm4, %v2553_v37, %v2554_v17 }
 0x317   : > { %v2560_v29 = vadd.f32 %v2555_v63, %v2492_v57 }
 0x318   : > { %2736 = vst.msk [vmem:[%s5290_s5 + $0x8] sm:$0xff] %vm2734_vm5, %v2733_v6  ;;  %v2747_v25 = vadd.f32 %v2745_v39, %v2708_v7 }
 0x319   : > { %v2644_v21 = vadd.f32 %v5260_v14, %v2560_v29 }
 0x31a   : > { %3032 = vst.msk [vmem:[%s5290_s5 + $0x28] sm:$0xff] %vm2734_vm5, %v2747_v25 }
 0x31b   : > { %v2660_v43 = vpop.permute.xlu0 %2659  ;;  %v2702_v61 = vpop.permute.xlu1 %2701 }
 0x31c   : > { %v2665_v49 = vadd.f32 %v2660_v43, %v2581_v46  ;;  %v2707_v2 = vadd.f32 %v2702_v61, %v2623_v30 }
 0x31e   : > { %v2732_v24 = vadd.f32 %v2731_v1, %v2665_v49  ;;  %v2746_v22 = vadd.f32 %v2745_v39, %v2707_v2 }
 0x320   : > { %2735 = vst.msk [vmem:[%s5290_s5] sm:$0xff] %vm2734_vm5, %v2732_v24 }
 0x321   : > { %3031 = vst.msk [vmem:[%s5290_s5 + $0x20] sm:$0xff] %vm2734_vm5, %v2746_v22 }
 0x323   : > { %v2683_v19 = vpop.permute.xlu0 %2682  ;;  %v2725_v11 = vpop.permute.xlu1 %2724 }
 0x324   : > { %v2687_v27 = vadd.f32 %v2683_v19, %v2603_v28  ;;  %v2729_v0 = vadd.f32 %v2725_v11, %v2645_v20 }
 0x326   : > { %v2740_v58 = vadd.f32 %v2738_v4, %v2687_v27  ;;  %v2754_v9 = vadd.f32 %v2752_v33, %v2729_v0 }
 0x328   : > { %3029 = vst.msk [vmem:[%s5290_s5 + $0x18] sm:$0xff] %vm2734_vm5, %v2740_v58 }
 0x329   : > { %3035 = vst.msk [vmem:[%s5290_s5 + $0x38] sm:$0xff] %vm2734_vm5, %v2754_v9 }
 0x32b   : > { %v2723_v13 = vpop.permute.xlu0 %2722 }
 0x32c   : > { %v2728_v4 = vadd.f32 %v2723_v13, %v2644_v21 }
 0x32e   : > { %v2753_v35 = vadd.f32 %v2752_v33, %v2728_v4 }
 0x330   : > { %3034 = vst.msk [vmem:[%s5290_s5 + $0x30] sm:$0xff] %vm2734_vm5, %v2753_v35 }
 0x331   : > { %3214 = shalt.err (!%p3211_p8)
}
 0x332   : > { %s3271_s17 = smov 128   ;;  %s3272_s22 = smov 8  }
 0x333   : > { %3053 = dma.vmem_to_hbm [thread:$0]  (%p3345_p11), %s2772_s16, 1024, %s2774_s1, %s2759_s27, %s3271_s17, %s3271_s17, %s3272_s22  }
 0x334 PF: > { %s2788_s30 = sand.u32 1, %s3249_s12   ;;  %p5410_p9 = scmp.ge.s32.totalorder %s3261_s15, 2 }
 0x335   : > { %s2789_s4 = scalar_lea.sflag [#allocation5], %s2788_s30 }
 0x336   : > { %p3067_p10 = pnand %p5410_p9, %p3349_p12 }
 0x338   : > { %p3068_p1 = pneg %p3067_p10 }
 0x33a   : > { %3244 = dma.done.wait (%p3068_p1), %s2789_s4, 1024  }
 0x33b   : > { %3246 = vsyncadd (%p3068_p1), %s2789_s4, 4294966272  ;;  %p18_p2 = scmp.ge.s32.totalorder %s3318_s18, 4   ;;  %s5411_s12 = smov %s3253_s13 }
 0x33c   : > { %s5412_s13 = smov %s3257_s14  ;;  %s5413_s14 = smov %s3330_s21 }
 0x33d   : > { %s5414_s15 = smov %s3318_s18  ;;  %20 = sbr.rel (!%p18_p2) target bundleno = 10 (0xa), region = 93 }
 0x342   :  { %2795 = vsyncpa [#allocation4], 1 }
 0x343   :  { %2797 = vsyncpa [#allocation4 + $0x1], 1 }
 0x344   :  { %2798 = vsyncpa [#allocation5], 1 }
 0x345   :  { %2800 = vsyncpa [#allocation5 + $0x1], 1 }
 0x346   :  { %2801 = vsyncpa [#allocation6], 1 }
 0x347   :  { %2803 = vsyncpa [#allocation6 + $0x1], 1 }
 0x348   :  { %2804 = vsyncpa [#allocation7], 1 }
 0x349   :  { %2806 = vsyncpa [#allocation7 + $0x1], 1 }

</bundles_post_ra>
